<compile_context>
chip_gen: v5e
topology: v5e:2x2
jax: 0.10.0
libtpu: 0.0.40
codegen_flags: <defaults>
</compile_context>

<pallas_src>
import jax
import jax.numpy as jnp
from jax.experimental import pallas as pl
from jax.experimental.pallas import tpu as pltpu

HIDDEN = 1024  # fixed by the module definition
EPS = 1e-5


def _round_up(v, m):
    return ((v + m - 1) // m) * m


def _residual_linear_kernel(x_ref, w1_ref, b1_ref, w2_ref, b2_ref, o_ref):
    x = x_ref[...]                                   # (TILE_N, F) f32

    # Linear(F -> 1024) with BN1 pre-folded into (w1, b1), then ReLU.
    h = jnp.dot(x.astype(jnp.bfloat16), w1_ref[...],
                preferred_element_type=jnp.float32)  # (TILE_N, 1024) f32 MXU acc
    h = jnp.maximum(h + b1_ref[...], 0.0)

    # Linear(1024 -> F) with BN2 pre-folded into (w2, b2), then ReLU.
    z = jnp.dot(h.astype(jnp.bfloat16), w2_ref[...],
                preferred_element_type=jnp.float32)  # (TILE_N, F) f32 MXU acc
    z = jnp.maximum(z + b2_ref[...], 0.0)

    # Residual add in f32; cast only on store (supports bf16 output mode).
    o_ref[...] = (z + x).astype(o_ref.dtype)


def _vmem_limit_bytes():
    """Generation-aware scoped-VMEM limit: ~3/4 of physical VMEM.
    v5e/v6e (128 MiB) -> 96 MiB; v7x (64 MiB) -> 48 MiB."""
    try:
        cap = pltpu.get_tpu_info().vmem_capacity_bytes
    except Exception:
        cap = 64 << 20  # conservative (v7x-sized) fallback
    return int(cap * 3 // 4)


def _pick_tile_n(n):
    """Batch-tile heuristic: big tiles amortize the ~0.35us/grid-step overhead,
    but keep >= 4 grid steps when the batch allows it so the software pipeline
    (and both TensorCores on v7x) stays busy."""
    if n <= 1024:
        # One or two tiles at most; just cover the batch (rounded to 8 sublanes).
        return min(512, max(8, _round_up(n, 8)))
    for tile in (1024, 512, 256):
        if pl.cdiv(n, tile) >= 4:
            return tile
    return 256


# Resolved on first call: whether pipeline_mode=pl.Buffered(1) is supported.
_SINGLE_BUFFER_WEIGHTS = None


def _build_call(n, f, tile_n, out_dtype, *, single_buffer, donate_x):
    grid = (pl.cdiv(n, tile_n),)

    const_kwargs = {}
    if single_buffer:
        # Weights/biases have constant index maps (never change across grid steps):
        # one VMEM buffer is enough.  Halves weight residency (key on v7x, 64 MiB).
        const_kwargs = dict(pipeline_mode=pl.Buffered(1))

    def const_spec(shape):
        return pl.BlockSpec(shape, lambda i: (0, 0), **const_kwargs)

    # Advisory cost model so XLA schedules neighbors around the custom call well.
    x_bytes = n * f * 4
    o_bytes = n * f * jnp.dtype(out_dtype).itemsize
    w_bytes = 2 * f * HIDDEN * 2 + (HIDDEN + f) * 4  # bf16 weights + f32 biases
    cost = pl.CostEstimate(flops=4 * n * f * HIDDEN,
                           transcendentals=0,
                           bytes_accessed=x_bytes + o_bytes + w_bytes)

    return pl.pallas_call(
        _residual_linear_kernel,
        out_shape=jax.ShapeDtypeStruct((n, f), out_dtype),
        grid=grid,
        in_specs=[
            pl.BlockSpec((tile_n, f), lambda i: (i, 0)),   # x: tiled over batch
            const_spec((f, HIDDEN)),                       # w1 (VMEM resident)
            const_spec((1, HIDDEN)),                       # b1
            const_spec((HIDDEN, f)),                       # w2 (VMEM resident)
            const_spec((1, f)),                            # b2
        ],
        out_specs=pl.BlockSpec((tile_n, f), lambda i: (i, 0)),
        compiler_params=pltpu.CompilerParams(
            dimension_semantics=("parallel",),   # shard batch tiles across TCs (v7x)
            vmem_limit_bytes=_vmem_limit_bytes(),
        ),
        cost_estimate=cost,
        input_output_aliases={0: 0} if donate_x else {},
    )


def residual_linear(x, params, *, tile_n=None, out_dtype=None, donate_x=False):
    """Fused ResidualLinear forward (eval-mode BatchNorm folded into params).

    x         : (N, F) float32
    params    : dict of BN-folded bf16 weights + f32 biases (see init_params)
    tile_n    : batch rows per grid step (auto-picked if None)
    out_dtype : output dtype (defaults to x.dtype; pass bf16 to halve HBM writeback)
    donate_x  : alias the output onto x's HBM buffer (only if the caller does not
                reuse x afterwards; requires out_dtype == x.dtype)
    """
    global _SINGLE_BUFFER_WEIGHTS
    n, f = x.shape
    out_dtype = x.dtype if out_dtype is None else jnp.dtype(out_dtype)
    if donate_x and out_dtype != x.dtype:
        raise ValueError("donate_x requires out_dtype == x.dtype")
    if tile_n is None:
        tile_n = _pick_tile_n(n)

    # Biases presented as (1, C) rows for lane-major broadcasting.
    args = (x, params["w1"], params["b1"].reshape(1, -1),
            params["w2"], params["b2"].reshape(1, -1))

    if _SINGLE_BUFFER_WEIGHTS is None:
        # Probe once: single-buffered constants is the preferred path; fall back
        # to default double-buffering on JAX versions without pipeline_mode support.
        try:
            out = _build_call(n, f, tile_n, out_dtype,
                              single_buffer=True, donate_x=donate_x)(*args)
            _SINGLE_BUFFER_WEIGHTS = True
            return out
        except Exception:
            _SINGLE_BUFFER_WEIGHTS = False

    return _build_call(n, f, tile_n, out_dtype,
                       single_buffer=_SINGLE_BUFFER_WEIGHTS,
                       donate_x=donate_x)(*args)


def init_params(key, features):
    """Deterministic synthetic parameters mirroring the module's __init__ shapes,
    with eval-mode BatchNorm folded into the weights/biases (done once, at init)."""
    ks = jax.random.split(key, 10)
    # Linear weights, stored as [in, out] (transpose of PyTorch's [out, in]).
    w1 = jax.random.normal(ks[0], (features, HIDDEN), jnp.float32) * 0.02
    b1 = jax.random.normal(ks[1], (HIDDEN,), jnp.float32) * 0.02
    w2 = jax.random.normal(ks[2], (HIDDEN, features), jnp.float32) * 0.02
    b2 = jax.random.normal(ks[3], (features,), jnp.float32) * 0.02
    # BatchNorm1d(1024) eval-mode params.
    g1 = 1.0 + 0.1 * jax.random.normal(ks[4], (HIDDEN,), jnp.float32)
    be1 = 0.1 * jax.random.normal(ks[5], (HIDDEN,), jnp.float32)
    rm1 = 0.1 * jax.random.normal(ks[6], (HIDDEN,), jnp.float32)
    rv1 = jnp.abs(1.0 + 0.1 * jax.random.normal(ks[7], (HIDDEN,), jnp.float32))
    # BatchNorm1d(features) eval-mode params.
    g2 = 1.0 + 0.1 * jax.random.normal(ks[8], (features,), jnp.float32)
    be2 = 0.1 * jax.random.normal(ks[9], (features,), jnp.float32)
    rm2 = jnp.zeros((features,), jnp.float32)
    rv2 = jnp.ones((features,), jnp.float32)

    # BN -> per-channel scale / shift:  y = x * s + t
    s1 = g1 / jnp.sqrt(rv1 + EPS)
    t1 = be1 - rm1 * s1
    s2 = g2 / jnp.sqrt(rv2 + EPS)
    t2 = be2 - rm2 * s2

    # Fold BN into the Linear layers (w' = w*s, b' = b*s + t); weights to bf16.
    w1f = (w1 * s1[None, :]).astype(jnp.bfloat16)
    b1f = b1 * s1 + t1
    w2f = (w2 * s2[None, :]).astype(jnp.bfloat16)
    b2f = b2 * s2 + t2
    return dict(w1=w1f, b1=b1f, w2=w2f, b2=b2f)


def reference(x, p):
    """Pure-JAX reference with identical numerics (bf16 matmul inputs, f32 accum)."""
    h = jnp.dot(x.astype(jnp.bfloat16), p["w1"],
                preferred_element_type=jnp.float32) + p["b1"]
    h = jnp.maximum(h, 0.0)
    z = jnp.dot(h.astype(jnp.bfloat16), p["w2"],
                preferred_element_type=jnp.float32) + p["b2"]
    z = jnp.maximum(z, 0.0)
    return z + x


if __name__ == "__main__":
    features = 256
    key = jax.random.PRNGKey(0)
    kx, kp, kx2 = jax.random.split(key, 3)
    params = init_params(kp, features)

    # Small single-tile path (batch 8, auto tile).
    x = jax.random.normal(kx, (8, features), jnp.float32)
    out = jax.block_until_ready(residual_linear(x, params))
    ref = reference(x, params)
    assert out.shape == x.shape
    assert jnp.allclose(out, ref, atol=2e-3, rtol=2e-3), "mismatch vs JAX reference (small)"

    # Multi-step grid with a partial last block (300 rows, tile 128 -> 3 steps,
    # last step has 44 valid rows) -- exercises the no-pad boundary path.
    x2 = jax.random.normal(kx2, (300, features), jnp.float32)
    out2 = jax.block_until_ready(residual_linear(x2, params, tile_n=128))
    ref2 = reference(x2, params)
    assert out2.shape == x2.shape
    assert jnp.allclose(out2, ref2, atol=2e-3, rtol=2e-3), "mismatch vs JAX reference (tiled)"

    # bf16 output mode (halves HBM writeback); looser tolerance due to rounding.
    out3 = jax.block_until_ready(residual_linear(x2, params, out_dtype=jnp.bfloat16))
    assert out3.dtype == jnp.bfloat16
    assert jnp.allclose(out3.astype(jnp.float32), ref2, atol=3e-2, rtol=3e-2), \
        "mismatch vs JAX reference (bf16 output)"

    print("KERNEL_OK")
</pallas_src>

<mosaic_0001>
module attributes {stable_mosaic.version = 11 : i64} {
  func.func @_residual_linear_kernel(%arg0: i32, %arg1: memref<8x256xf32, #tpu.memory_space<vmem>>, %arg2: memref<256x1024xbf16, #tpu.memory_space<vmem>>, %arg3: memref<1x1024xf32, #tpu.memory_space<vmem>>, %arg4: memref<1024x256xbf16, #tpu.memory_space<vmem>>, %arg5: memref<1x256xf32, #tpu.memory_space<vmem>>, %arg6: memref<8x256xf32, #tpu.memory_space<vmem>>) attributes {dimension_semantics = [#tpu.dimension_semantics<parallel>], iteration_bounds = array<i64: 1>, scalar_prefetch = 0 : i64, scratch_operands = 0 : i64, tpu.core_type = #tpu.core_type<tc>, window_params = [{transform_indices = @transform_0, window_bounds = array<i64: 8, 256>}, {pipeline_mode = #tpu.pipeline_mode<synchronous>, transform_indices = @transform_1, window_bounds = array<i64: 256, 1024>}, {pipeline_mode = #tpu.pipeline_mode<synchronous>, transform_indices = @transform_2, window_bounds = array<i64: 1, 1024>}, {pipeline_mode = #tpu.pipeline_mode<synchronous>, transform_indices = @transform_3, window_bounds = array<i64: 1024, 256>}, {pipeline_mode = #tpu.pipeline_mode<synchronous>, transform_indices = @transform_4, window_bounds = array<i64: 1, 256>}, {transform_indices = @transform_5, window_bounds = array<i64: 8, 256>}]} {
    %c0 = arith.constant 0 : index
    %c0_0 = arith.constant 0 : index
    %0 = vector.load %arg1[%c0, %c0_0] : memref<8x256xf32, #tpu.memory_space<vmem>>, vector<8x256xf32>
    %1 = arith.truncf %0 : vector<8x256xf32> to vector<8x256xbf16>
    %c0_1 = arith.constant 0 : index
    %c0_2 = arith.constant 0 : index
    %2 = vector.load %arg2[%c0_1, %c0_2] : memref<256x1024xbf16, #tpu.memory_space<vmem>>, vector<256x1024xbf16>
    %cst = arith.constant dense<0.000000e+00> : vector<8x1024xf32>
    %3 = tpu.matmul %1, %2, %cst {dimension_numbers = #tpu.dot_dimension_numbers<[1], [0], [0], [1], [0, 0, 1, 1], [], []>} : vector<8x256xbf16>, vector<256x1024xbf16>, vector<8x1024xf32> -> vector<8x1024xf32>
    %c0_3 = arith.constant 0 : index
    %c0_4 = arith.constant 0 : index
    %4 = vector.load %arg3[%c0_3, %c0_4] : memref<1x1024xf32, #tpu.memory_space<vmem>>, vector<1x1024xf32>
    %5 = vector.broadcast %4 : vector<1x1024xf32> to vector<8x1024xf32>
    %6 = arith.addf %3, %5 : vector<8x1024xf32>
    %cst_5 = arith.constant 0.000000e+00 : f32
    %7 = vector.broadcast %cst_5 : f32 to vector<8x1024xf32>
    %8 = arith.maximumf %6, %7 : vector<8x1024xf32>
    %9 = arith.truncf %8 : vector<8x1024xf32> to vector<8x1024xbf16>
    %c0_6 = arith.constant 0 : index
    %c0_7 = arith.constant 0 : index
    %10 = vector.load %arg4[%c0_6, %c0_7] : memref<1024x256xbf16, #tpu.memory_space<vmem>>, vector<1024x256xbf16>
    %cst_8 = arith.constant dense<0.000000e+00> : vector<8x256xf32>
    %11 = tpu.matmul %9, %10, %cst_8 {dimension_numbers = #tpu.dot_dimension_numbers<[1], [0], [0], [1], [0, 0, 1, 1], [], []>} : vector<8x1024xbf16>, vector<1024x256xbf16>, vector<8x256xf32> -> vector<8x256xf32>
    %c0_9 = arith.constant 0 : index
    %c0_10 = arith.constant 0 : index
    %12 = vector.load %arg5[%c0_9, %c0_10] : memref<1x256xf32, #tpu.memory_space<vmem>>, vector<1x256xf32>
    %13 = vector.broadcast %12 : vector<1x256xf32> to vector<8x256xf32>
    %14 = arith.addf %11, %13 : vector<8x256xf32>
    %cst_11 = arith.constant 0.000000e+00 : f32
    %15 = vector.broadcast %cst_11 : f32 to vector<8x256xf32>
    %16 = arith.maximumf %14, %15 : vector<8x256xf32>
    %17 = arith.addf %16, %0 : vector<8x256xf32>
    %c0_12 = arith.constant 0 : index
    %c0_13 = arith.constant 0 : index
    %18 = vector.load %arg6[%c0_12, %c0_13] : memref<8x256xf32, #tpu.memory_space<vmem>>, vector<8x256xf32>
    tpu.vector_store %arg6[%c0_12, %c0_13], %17 {strides = array<i32>} : memref<8x256xf32, #tpu.memory_space<vmem>>, vector<8x256xf32>,
    return
  }
  func.func @transform_0(%arg0: i32) -> (i32, i32) {
    %c0_i32 = arith.constant 0 : i32
    %c0_i32_0 = arith.constant 0 : i32
    return %arg0, %c0_i32 : i32, i32
  }
  func.func @transform_1(%arg0: i32) -> (i32, i32) {
    %c0_i32 = arith.constant 0 : i32
    %c0_i32_0 = arith.constant 0 : i32
    %c0_i32_1 = arith.constant 0 : i32
    return %c0_i32, %c0_i32_0 : i32, i32
  }
  func.func @transform_2(%arg0: i32) -> (i32, i32) {
    %c0_i32 = arith.constant 0 : i32
    %c0_i32_0 = arith.constant 0 : i32
    %c0_i32_1 = arith.constant 0 : i32
    return %c0_i32, %c0_i32_0 : i32, i32
  }
  func.func @transform_3(%arg0: i32) -> (i32, i32) {
    %c0_i32 = arith.constant 0 : i32
    %c0_i32_0 = arith.constant 0 : i32
    %c0_i32_1 = arith.constant 0 : i32
    return %c0_i32, %c0_i32_0 : i32, i32
  }
  func.func @transform_4(%arg0: i32) -> (i32, i32) {
    %c0_i32 = arith.constant 0 : i32
    %c0_i32_0 = arith.constant 0 : i32
    %c0_i32_1 = arith.constant 0 : i32
    return %c0_i32, %c0_i32_0 : i32, i32
  }
  func.func @transform_5(%arg0: i32) -> (i32, i32) {
    %c0_i32 = arith.constant 0 : i32
    %c0_i32_0 = arith.constant 0 : i32
    return %arg0, %c0_i32 : i32, i32
  }
}

module attributes {stable_mosaic.version = 11 : i64} {
  func.func @_residual_linear_kernel(%arg0: i32, %arg1: memref<8x256xf32, #tpu.memory_space<vmem>>, %arg2: memref<256x1024xbf16, #tpu.memory_space<vmem>>, %arg3: memref<1x1024xf32, #tpu.memory_space<vmem>>, %arg4: memref<1024x256xbf16, #tpu.memory_space<vmem>>, %arg5: memref<1x256xf32, #tpu.memory_space<vmem>>, %arg6: memref<8x256xf32, #tpu.memory_space<vmem>>) attributes {dimension_semantics = [#tpu.dimension_semantics<parallel>], iteration_bounds = array<i64: 1>, scalar_prefetch = 0 : i64, scratch_operands = 0 : i64, tpu.core_type = #tpu.core_type<tc>, window_params = [{transform_indices = @transform_0, window_bounds = array<i64: 8, 256>}, {pipeline_mode = #tpu.pipeline_mode<synchronous>, transform_indices = @transform_1, window_bounds = array<i64: 256, 1024>}, {pipeline_mode = #tpu.pipeline_mode<synchronous>, transform_indices = @transform_2, window_bounds = array<i64: 1, 1024>}, {pipeline_mode = #tpu.pipeline_mode<synchronous>, transform_indices = @transform_3, window_bounds = array<i64: 1024, 256>}, {pipeline_mode = #tpu.pipeline_mode<synchronous>, transform_indices = @transform_4, window_bounds = array<i64: 1, 256>}, {transform_indices = @transform_5, window_bounds = array<i64: 8, 256>}]} {
    %c0 = arith.constant 0 : index
    %c0_0 = arith.constant 0 : index
    %0 = vector.load %arg1[%c0, %c0_0] : memref<8x256xf32, #tpu.memory_space<vmem>>, vector<8x256xf32>
    %1 = arith.truncf %0 : vector<8x256xf32> to vector<8x256xbf16>
    %c0_1 = arith.constant 0 : index
    %c0_2 = arith.constant 0 : index
    %2 = vector.load %arg2[%c0_1, %c0_2] : memref<256x1024xbf16, #tpu.memory_space<vmem>>, vector<256x1024xbf16>
    %cst = arith.constant dense<0.000000e+00> : vector<8x1024xf32>
    %3 = tpu.matmul %1, %2, %cst {dimension_numbers = #tpu.dot_dimension_numbers<[1], [0], [0], [1], [0, 0, 1, 1], [], []>} : vector<8x256xbf16>, vector<256x1024xbf16>, vector<8x1024xf32> -> vector<8x1024xf32>
    %c0_3 = arith.constant 0 : index
    %c0_4 = arith.constant 0 : index
    %4 = vector.load %arg3[%c0_3, %c0_4] : memref<1x1024xf32, #tpu.memory_space<vmem>>, vector<1x1024xf32>
    %5 = vector.broadcast %4 : vector<1x1024xf32> to vector<8x1024xf32>
    %6 = arith.addf %3, %5 : vector<8x1024xf32>
    %cst_5 = arith.constant 0.000000e+00 : f32
    %7 = vector.broadcast %cst_5 : f32 to vector<8x1024xf32>
    %8 = arith.maximumf %6, %7 : vector<8x1024xf32>
    %9 = arith.truncf %8 : vector<8x1024xf32> to vector<8x1024xbf16>
    %c0_6 = arith.constant 0 : index
    %c0_7 = arith.constant 0 : index
    %10 = vector.load %arg4[%c0_6, %c0_7] : memref<1024x256xbf16, #tpu.memory_space<vmem>>, vector<1024x256xbf16>
    %cst_8 = arith.constant dense<0.000000e+00> : vector<8x256xf32>
    %11 = tpu.matmul %9, %10, %cst_8 {dimension_numbers = #tpu.dot_dimension_numbers<[1], [0], [0], [1], [0, 0, 1, 1], [], []>} : vector<8x1024xbf16>, vector<1024x256xbf16>, vector<8x256xf32> -> vector<8x256xf32>
    %c0_9 = arith.constant 0 : index
    %c0_10 = arith.constant 0 : index
    %12 = vector.load %arg5[%c0_9, %c0_10] : memref<1x256xf32, #tpu.memory_space<vmem>>, vector<1x256xf32>
    %13 = vector.broadcast %12 : vector<1x256xf32> to vector<8x256xf32>
    %14 = arith.addf %11, %13 : vector<8x256xf32>
    %cst_11 = arith.constant 0.000000e+00 : f32
    %15 = vector.broadcast %cst_11 : f32 to vector<8x256xf32>
    %16 = arith.maximumf %14, %15 : vector<8x256xf32>
    %17 = arith.addf %16, %0 : vector<8x256xf32>
    %c0_12 = arith.constant 0 : index
    %c0_13 = arith.constant 0 : index
    %18 = vector.load %arg6[%c0_12, %c0_13] : memref<8x256xf32, #tpu.memory_space<vmem>>, vector<8x256xf32>
    tpu.vector_store %arg6[%c0_12, %c0_13], %17 {strides = array<i32>} : memref<8x256xf32, #tpu.memory_space<vmem>>, vector<8x256xf32>,
    return
  }
  func.func @transform_0(%arg0: i32) -> (i32, i32) {
    %c0_i32 = arith.constant 0 : i32
    %c0_i32_0 = arith.constant 0 : i32
    return %arg0, %c0_i32 : i32, i32
  }
  func.func @transform_1(%arg0: i32) -> (i32, i32) {
    %c0_i32 = arith.constant 0 : i32
    %c0_i32_0 = arith.constant 0 : i32
    %c0_i32_1 = arith.constant 0 : i32
    return %c0_i32, %c0_i32_0 : i32, i32
  }
  func.func @transform_2(%arg0: i32) -> (i32, i32) {
    %c0_i32 = arith.constant 0 : i32
    %c0_i32_0 = arith.constant 0 : i32
    %c0_i32_1 = arith.constant 0 : i32
    return %c0_i32, %c0_i32_0 : i32, i32
  }
  func.func @transform_3(%arg0: i32) -> (i32, i32) {
    %c0_i32 = arith.constant 0 : i32
    %c0_i32_0 = arith.constant 0 : i32
    %c0_i32_1 = arith.constant 0 : i32
    return %c0_i32, %c0_i32_0 : i32, i32
  }
  func.func @transform_4(%arg0: i32) -> (i32, i32) {
    %c0_i32 = arith.constant 0 : i32
    %c0_i32_0 = arith.constant 0 : i32
    %c0_i32_1 = arith.constant 0 : i32
    return %c0_i32, %c0_i32_0 : i32, i32
  }
  func.func @transform_5(%arg0: i32) -> (i32, i32) {
    %c0_i32 = arith.constant 0 : i32
    %c0_i32_0 = arith.constant 0 : i32
    return %arg0, %c0_i32 : i32, i32
  }
}

</mosaic_0001>

<bundles_post_ra>
// kernel: tpu_custom_call.1
= control target key start
LH: loop header
LB: loop body
LE: loop exit
PB: predicated region body
PF: predicated region fallthrough
CT: control target
= control target key end

     0   :  { %10 = vsyncpa [#allocation3], 0  ;;  %s3639_s0 = inlined_call_operand.hbm [shape: f32[8,256], index: 0, kind: input, shape index: {}]   ;;  %s3640_s1 = inlined_call_operand.hbm [shape: bf16[256,1024], index: 1, kind: input, shape index: {}]   ;;  %s3641_s2 = inlined_call_operand.hbm [shape: f32[1,1024], index: 2, kind: input, shape index: {}]   ;;  %s3642_s3 = inlined_call_operand.hbm [shape: bf16[1024,256], index: 3, kind: input, shape index: {}]   ;;  %s3643_s4 = inlined_call_operand.vmem [shape: f32[1,256], index: 4, kind: input, shape index: {}]   ;;  %s3644_s5 = inlined_call_operand.hbm [shape: f32[8,256], index: 5, kind: output, shape index: {}]  }
   0x1   :  { %11 = vsyncpa [#allocation6], 0 }
   0x2   :  { %12 = vsyncpa [#allocation9], 0  ;;  %s29_s20 = sshll.u32 %s3640_s1, 4  ;;  %s30_s20 = int_to_ptr.hbm [resolvable:$true] %s29_s20 }
   0x3   :  { %13 = vsyncpa [#allocation4], 0  ;;  %s3520_s21 = smov [#allocation5]   ;;  %s19_s25 = sshll.u32 %s3639_s0, 4  ;;  %s20_s25 = int_to_ptr.hbm [resolvable:$true] %s19_s25 }
   0x4   :  { %s31_s22 = sshll.u32 %s3520_s21, 4  ;;  %s3521_s26 = smov 512   ;;  %s32_s22 = int_to_ptr.vmem [resolvable:$true] %s31_s22 }
   0x5   :  { %s3522_s27 = smov 32   ;;  %s3523_s28 = smov [#allocation2]  }
   0x6   :  { %37 = dma.hbm_to_vmem [thread:$0]  %s30_s20, 16384, %s32_s22, [#allocation6], %s3521_s26, %s3521_s26, %s3522_s27  }
   0x7   :  { %s21_s29 = sshll.u32 %s3523_s28, 4  ;;  %s43_s7 = sshll.u32 %s3641_s2, 4  ;;  %s22_s29 = int_to_ptr.vmem [resolvable:$true] %s21_s29  ;;  %s44_s7 = int_to_ptr.hbm [resolvable:$true] %s43_s7 }
   0x8   :  { %24 = dma.hbm_to_vmem [thread:$0]  %s20_s25, 256, %s22_s29, [#allocation3]  }
   0x9   :  { %s53_s9 = sshll.u32 %s3642_s3, 4  ;;  %s3524_s10 = smov [#allocation7]   ;;  %s54_s9 = int_to_ptr.hbm [resolvable:$true] %s53_s9 }
   0xa   :  { %s45_s11 = sshll.u32 %s3524_s10, 4  ;;  %s3525_s0 = smov [#allocation8]   ;;  %s46_s11 = int_to_ptr.vmem [resolvable:$true] %s45_s11 }
   0xb   :  { %48 = dma.hbm_to_vmem [thread:$0]  %s44_s7, 128, %s46_s11, [#allocation6]  }
   0xc   :  { %s55_s12 = sshll.u32 %s3525_s0, 4  ;;  %s3526_s13 = smov 128   ;;  %s56_s12 = int_to_ptr.vmem [resolvable:$true] %s55_s12 }
   0xd   :  { %s3527_s14 = smov 8  }
   0xe   :  { %61 = dma.hbm_to_vmem [thread:$0]  %s54_s9, 16384, %s56_s12, [#allocation9], %s3526_s13, %s3526_s13, %s3527_s14  }
   0xf   :  { %3512 = dma.done.wait [#allocation3], 256  }
  0x10   :  { %3513 = vsyncadd [#allocation3], 4294967040 }
  0x11   :  { %3514 = dma.done.wait [#allocation6], 16512  }
  0x12   :  { %3515 = vsyncadd [#allocation6], 4294950784 }
  0x13   :  { %3516 = dma.done.wait [#allocation9], 16384  }
  0x14   :  { %3517 = vsyncadd [#allocation9], 4294950912  ;;  %v2327_v0 = vld [vmem:[#allocation5 + $0x1c0] sm:$0xf]  ;;  %v3181_v5 = vld [vmem:[#allocation5 + $0x1c4] sm:$0xf] }
  0x15   :  { %v3185_v1 = vld [vmem:[#allocation5 + $0x1dc] sm:$0xf0]  ;;  %v2329_v6 = vld [vmem:[#allocation5 + $0x1e0] sm:$0xf0]  ;;  %s2089_s18 = sshll.u32 %s3644_s5, 4  ;;  %s2090_s18 = int_to_ptr.hbm [resolvable:$true] %s2089_s18 }
  0x16   :  { %v2583_v2 = vld [vmem:[#allocation5 + $0x3c0] sm:$0xf]  ;;  %v2328_v3 = vor.u32 %v3185_v1, %v2327_v0  ;;  %v2332_v8 = vor.u32 %v3181_v5, %v2329_v6  ;;  %v3245_v9 = vld [vmem:[#allocation5 + $0x3c4] sm:$0xf] }
  0x17   :  { %v3249_v4 = vld [vmem:[#allocation5 + $0x3dc] sm:$0xf0]  ;;  %v2585_v10 = vld [vmem:[#allocation5 + $0x3e0] sm:$0xf0] }
  0x18   :  { %v2584_v7 = vor.u32 %v3249_v4, %v2583_v2  ;;  %v2295_v11 = vld [vmem:[#allocation5 + $0x180] sm:$0xf]  ;;  %870 = vmatpush.bf16.msra.mxu0 %v2328_v3  ;;  %v2588_v12 = vor.u32 %v3245_v9, %v2585_v10  ;;  %896 = vmatpush.bf16.msra.mxu2 %v2332_v8  ;;  %v3173_v18 = vld [vmem:[#allocation5 + $0x184] sm:$0xf] }
  0x19   :  { %v3177_v13 = vld [vmem:[#allocation5 + $0x19c] sm:$0xf0]  ;;  %v2297_v19 = vld [vmem:[#allocation5 + $0x1a0] sm:$0xf0] }
  0x1a   :  { %v2551_v14 = vld [vmem:[#allocation5 + $0x380] sm:$0xf]  ;;  %883 = vmatpush.bf16.msra.mxu1 %v2584_v7  ;;  %v2296_v16 = vor.u32 %v3177_v13, %v2295_v11  ;;  %v3237_v20 = vld [vmem:[#allocation5 + $0x384] sm:$0xf]  ;;  %909 = vmatpush.bf16.msra.mxu3 %v2588_v12  ;;  %v2300_v21 = vor.u32 %v3173_v18, %v2297_v19 }
  0x1b   :  { %v3241_v15 = vld [vmem:[#allocation5 + $0x39c] sm:$0xf0]  ;;  %v2553_v22 = vld [vmem:[#allocation5 + $0x3a0] sm:$0xf0] }
  0x1c   :  { %v2552_v17 = vor.u32 %v3241_v15, %v2551_v14  ;;  %v2263_v23 = vld [vmem:[#allocation5 + $0x140] sm:$0xf]  ;;  %v2556_v25 = vor.u32 %v3237_v20, %v2553_v22  ;;  %v3165_v28 = vld [vmem:[#allocation5 + $0x144] sm:$0xf]  ;;  %871 = vmatpush.bf16.msra.mxu0 %v2296_v16  ;;  %897 = vmatpush.bf16.msra.mxu2 %v2300_v21 }
  0x1d   :  { %v3169_v24 = vld [vmem:[#allocation5 + $0x15c] sm:$0xf0]  ;;  %v2265_v30 = vld [vmem:[#allocation5 + $0x160] sm:$0xf0] }
  0x1e   :  { %v2519_v26 = vld [vmem:[#allocation5 + $0x340] sm:$0xf]  ;;  %v2264_v29 = vor.u32 %v3169_v24, %v2263_v23  ;;  %v3229_v31 = vld [vmem:[#allocation5 + $0x344] sm:$0xf]  ;;  %884 = vmatpush.bf16.msra.mxu1 %v2552_v17  ;;  %v2268_v34 = vor.u32 %v3165_v28, %v2265_v30  ;;  %910 = vmatpush.bf16.msra.mxu3 %v2556_v25  ;;  %v2335_v28 = vld [vmem:[#allocation5 + $0x1c8] sm:$0xf] }
  0x1f   :  { %v3233_v27 = vld [vmem:[#allocation5 + $0x35c] sm:$0xf0]  ;;  %v2521_v32 = vld [vmem:[#allocation5 + $0x360] sm:$0xf0]  ;;  %v2591_v30 = vld [vmem:[#allocation5 + $0x3c8] sm:$0xf] }
  0x20   :  { %v2520_v33 = vor.u32 %v3233_v27, %v2519_v26  ;;  %v2231_v35 = vld [vmem:[#allocation5 + $0x100] sm:$0xf]  ;;  %v2524_v38 = vor.u32 %v3229_v31, %v2521_v32  ;;  %v3157_v40 = vld [vmem:[#allocation5 + $0x104] sm:$0xf]  ;;  %872 = vmatpush.bf16.msra.mxu0 %v2264_v29  ;;  %898 = vmatpush.bf16.msra.mxu2 %v2268_v34  ;;  %v3186_v29 = vld [vmem:[#allocation5 + $0x1e4] sm:$0xf0] }
  0x21   :  { %v3161_v36 = vld [vmem:[#allocation5 + $0x11c] sm:$0xf0]  ;;  %v2233_v41 = vld [vmem:[#allocation5 + $0x120] sm:$0xf0]  ;;  %v3250_v32 = vld [vmem:[#allocation5 + $0x3e4] sm:$0xf0] }
  0x22   :  { %v2487_v37 = vld [vmem:[#allocation5 + $0x300] sm:$0xf]  ;;  %v3221_v42 = vld [vmem:[#allocation5 + $0x304] sm:$0xf]  ;;  %v2232_v44 = vor.u32 %v3161_v36, %v2231_v35  ;;  %885 = vmatpush.bf16.msra.mxu1 %v2520_v33  ;;  %v2236_v46 = vor.u32 %v3157_v40, %v2233_v41  ;;  %911 = vmatpush.bf16.msra.mxu3 %v2524_v38  ;;  %v3182_v33 = vld [vmem:[#allocation5 + $0x1cc] sm:$0xf]  ;;  %v2336_v40 = vor.u32 %v3186_v29, %v2335_v28 }
  0x23   :  { %v3225_v39 = vld [vmem:[#allocation5 + $0x31c] sm:$0xf0]  ;;  %v2489_v43 = vld [vmem:[#allocation5 + $0x320] sm:$0xf0]  ;;  %v2337_v34 = vld [vmem:[#allocation5 + $0x1e8] sm:$0xf0]  ;;  %v2592_v41 = vor.u32 %v3250_v32, %v2591_v30 }
  0x24   :  { %v2488_v45 = vor.u32 %v3225_v39, %v2487_v37  ;;  %v2199_v47 = vld [vmem:[#allocation5 + $0xc0] sm:$0xf]  ;;  %v2492_v50 = vor.u32 %v3221_v42, %v2489_v43  ;;  %v3149_v52 = vld [vmem:[#allocation5 + $0xc4] sm:$0xf]  ;;  %873 = vmatpush.bf16.msra.mxu0 %v2232_v44  ;;  %899 = vmatpush.bf16.msra.mxu2 %v2236_v46  ;;  %v3246_v37 = vld [vmem:[#allocation5 + $0x3cc] sm:$0xf]  ;;  %v2340_v42 = vor.u32 %v3182_v33, %v2337_v34 }
  0x25   :  { %v3153_v48 = vld [vmem:[#allocation5 + $0xdc] sm:$0xf0]  ;;  %v2201_v53 = vld [vmem:[#allocation5 + $0xe0] sm:$0xf0]  ;;  %v2593_v38 = vld [vmem:[#allocation5 + $0x3e8] sm:$0xf0] }
  0x26   :  { %v2455_v49 = vld [vmem:[#allocation5 + $0x2c0] sm:$0xf]  ;;  %v3213_v54 = vld [vmem:[#allocation5 + $0x2c4] sm:$0xf]  ;;  %v2200_v56 = vor.u32 %v3153_v48, %v2199_v47  ;;  %886 = vmatpush.bf16.msra.mxu1 %v2488_v45  ;;  %v2204_v58 = vor.u32 %v3149_v52, %v2201_v53  ;;  %912 = vmatpush.bf16.msra.mxu3 %v2492_v50  ;;  %v2303_v43 = vld [vmem:[#allocation5 + $0x188] sm:$0xf]  ;;  %v2596_v46 = vor.u32 %v3246_v37, %v2593_v38 }
  0x27   :  { %v3217_v51 = vld [vmem:[#allocation5 + $0x2dc] sm:$0xf0]  ;;  %v2457_v55 = vld [vmem:[#allocation5 + $0x2e0] sm:$0xf0]  ;;  %v3178_v44 = vld [vmem:[#allocation5 + $0x1a4] sm:$0xf0] }
  0x28   :  { %v2456_v57 = vor.u32 %v3217_v51, %v2455_v49  ;;  %v2167_v59 = vld [vmem:[#allocation5 + $0x80] sm:$0xf]  ;;  %v2460_v62 = vor.u32 %v3213_v54, %v2457_v55  ;;  %v3141_v0 = vld [vmem:[#allocation5 + $0x84] sm:$0xf]  ;;  %874 = vmatpush.bf16.msra.mxu0 %v2200_v56  ;;  %900 = vmatpush.bf16.msra.mxu2 %v2204_v58  ;;  %v2559_v45 = vld [vmem:[#allocation5 + $0x388] sm:$0xf]  ;;  %v2304_v53 = vor.u32 %v3178_v44, %v2303_v43 }
  0x29   :  { %v3145_v60 = vld [vmem:[#allocation5 + $0x9c] sm:$0xf0]  ;;  %v2169_v1 = vld [vmem:[#allocation5 + $0xa0] sm:$0xf0]  ;;  %v3242_v47 = vld [vmem:[#allocation5 + $0x3a4] sm:$0xf0] }
  0x2a   :  { %v2423_v61 = vld [vmem:[#allocation5 + $0x280] sm:$0xf]  ;;  %v3205_v2 = vld [vmem:[#allocation5 + $0x284] sm:$0xf]  ;;  %v2168_v4 = vor.u32 %v3145_v60, %v2167_v59  ;;  %887 = vmatpush.bf16.msra.mxu1 %v2456_v57  ;;  %v2172_v6 = vor.u32 %v3141_v0, %v2169_v1  ;;  %913 = vmatpush.bf16.msra.mxu3 %v2460_v62  ;;  %v3174_v48 = vld [vmem:[#allocation5 + $0x18c] sm:$0xf]  ;;  %v2560_v56 = vor.u32 %v3242_v47, %v2559_v45 }
  0x2b   :  { %v3209_v63 = vld [vmem:[#allocation5 + $0x29c] sm:$0xf0]  ;;  %v2425_v3 = vld [vmem:[#allocation5 + $0x2a0] sm:$0xf0]  ;;  %v2305_v49 = vld [vmem:[#allocation5 + $0x1a8] sm:$0xf0] }
  0x2c   :  { %v2424_v5 = vor.u32 %v3209_v63, %v2423_v61  ;;  %v2135_v7 = vld [vmem:[#allocation5 + $0x40] sm:$0xf]  ;;  %v2428_v10 = vor.u32 %v3205_v2, %v2425_v3  ;;  %v3133_v12 = vld [vmem:[#allocation5 + $0x44] sm:$0xf]  ;;  %875 = vmatpush.bf16.msra.mxu0 %v2168_v4  ;;  %901 = vmatpush.bf16.msra.mxu2 %v2172_v6  ;;  %v3238_v50 = vld [vmem:[#allocation5 + $0x38c] sm:$0xf]  ;;  %v2308_v57 = vor.u32 %v3174_v48, %v2305_v49 }
  0x2d   :  { %v3137_v8 = vld [vmem:[#allocation5 + $0x5c] sm:$0xf0]  ;;  %v2137_v13 = vld [vmem:[#allocation5 + $0x60] sm:$0xf0]  ;;  %v2561_v51 = vld [vmem:[#allocation5 + $0x3a8] sm:$0xf0] }
  0x2e   :  { %v2391_v9 = vld [vmem:[#allocation5 + $0x240] sm:$0xf]  ;;  %v3197_v14 = vld [vmem:[#allocation5 + $0x244] sm:$0xf]  ;;  %v2136_v16 = vor.u32 %v3137_v8, %v2135_v7  ;;  %888 = vmatpush.bf16.msra.mxu1 %v2424_v5  ;;  %v2140_v20 = vor.u32 %v3133_v12, %v2137_v13  ;;  %914 = vmatpush.bf16.msra.mxu3 %v2428_v10  ;;  %v80_v52 = vld [vmem:[#allocation2] sm:$0xff]  ;;  %v2564_v61 = vor.u32 %v3238_v50, %v2561_v51 }
  0x2f   :  { %v3201_v11 = vld [vmem:[#allocation5 + $0x25c] sm:$0xf0]  ;;  %v2393_v15 = vld [vmem:[#allocation5 + $0x260] sm:$0xf0]  ;;  %v2271_v54 = vld [vmem:[#allocation5 + $0x148] sm:$0xf]  ;;  %v3571_v55 = vpack.c.bf16 %v80_v52, %v80_v52 }
  0x30   :  { %v2103_v17 = vld [vmem:[#allocation5] sm:$0xf]  ;;  %v2392_v19 = vor.u32 %v3201_v11, %v2391_v9  ;;  %v3125_v23 = vld [vmem:[#allocation5 + $0x4] sm:$0xf]  ;;  %v2396_v24 = vor.u32 %v3197_v14, %v2393_v15  ;;  %876 = vmatpush.bf16.msra.mxu0 %v2136_v16  ;;  %902 = vmatpush.bf16.msra.mxu2 %v2140_v20  ;;  %v3170_v58 = vld [vmem:[#allocation5 + $0x164] sm:$0xf0] }
  0x31   :  { %v3129_v18 = vld [vmem:[#allocation5 + $0x1c] sm:$0xf0]  ;;  %v2105_v25 = vld [vmem:[#allocation5 + $0x20] sm:$0xf0]  ;;  %v2527_v59 = vld [vmem:[#allocation5 + $0x348] sm:$0xf]  ;;  %v2272_v4 = vor.u32 %v3170_v58, %v2271_v54 }
  0x32   :  { %v2359_v21 = vld [vmem:[#allocation5 + $0x200] sm:$0xf]  ;;  %v3189_v26 = vld [vmem:[#allocation5 + $0x204] sm:$0xf]  ;;  %v2104_v31 = vor.u32 %v3129_v18, %v2103_v17  ;;  %889 = vmatpush.bf16.msra.mxu1 %v2392_v19  ;;  %v2108_v36 = vor.u32 %v3125_v23, %v2105_v25  ;;  %915 = vmatpush.bf16.msra.mxu3 %v2396_v24  ;;  %v3234_v60 = vld [vmem:[#allocation5 + $0x364] sm:$0xf0] }
  0x33   :  { %v3193_v22 = vld [vmem:[#allocation5 + $0x21c] sm:$0xf0]  ;;  %v2361_v27 = vld [vmem:[#allocation5 + $0x220] sm:$0xf0]  ;;  %v3166_v62 = vld [vmem:[#allocation5 + $0x14c] sm:$0xf]  ;;  %v2528_v5 = vor.u32 %v3234_v60, %v2527_v59 }
  0x34   :  { %v2360_v35 = vor.u32 %v3193_v22, %v2359_v21  ;;  %v2364_v39 = vor.u32 %v3189_v26, %v2361_v27  ;;  %877 = vmatpush.bf16.msra.mxu0 %v2104_v31  ;;  %903 = vmatpush.bf16.msra.mxu2 %v2108_v36  ;;  %v2273_v63 = vld [vmem:[#allocation5 + $0x168] sm:$0xf0]  ;;  %v81_v0 = vld [vmem:[#allocation2 + $0x8] sm:$0xff]  ;;  %v2239_v7 = vld [vmem:[#allocation5 + $0x108] sm:$0xf] }
  0x35   :  { %v3230_v1 = vld [vmem:[#allocation5 + $0x34c] sm:$0xf]  ;;  %v3575_v3 = vpack.c.bf16 %v81_v0, %v81_v0  ;;  %v2276_v6 = vor.u32 %v3166_v62, %v2273_v63  ;;  %v3162_v8 = vld [vmem:[#allocation5 + $0x124] sm:$0xf0] }
  0x36   :  { %890 = vmatpush.bf16.msra.mxu1 %v2360_v35  ;;  %916 = vmatpush.bf16.msra.mxu3 %v2364_v39  ;;  %v2529_v2 = vld [vmem:[#allocation5 + $0x368] sm:$0xf0]  ;;  %v2495_v9 = vld [vmem:[#allocation5 + $0x308] sm:$0xf]  ;;  %v2240_v16 = vor.u32 %v3162_v8, %v2239_v7  ;;  %v3183_v7 = vld [vmem:[#allocation5 + $0x1d4] sm:$0xf] }
  0x37   :  { %878 = vmatmul.bf16.vlgmr.msra.gmra.mxu0 %v3571_v55  ;;  %904 = vmatmul.bf16.vlgmr.msra.gmra.mxu2 %v3571_v55  ;;  %v2532_v10 = vor.u32 %v3230_v1, %v2529_v2  ;;  %v3226_v11 = vld [vmem:[#allocation5 + $0x324] sm:$0xf0]  ;;  %v3158_v12 = vld [vmem:[#allocation5 + $0x10c] sm:$0xf]  ;;  %v2343_v1 = vld [vmem:[#allocation5 + $0x1d0] sm:$0xf] }
  0x38   :  { %922 = vmatpush.bf16.msrb.mxu0 %v2336_v40  ;;  %948 = vmatpush.bf16.msrb.mxu2 %v2340_v42  ;;  %v2241_v13 = vld [vmem:[#allocation5 + $0x128] sm:$0xf0]  ;;  %v2496_v17 = vor.u32 %v3226_v11, %v2495_v9  ;;  %v2207_v19 = vld [vmem:[#allocation5 + $0xc8] sm:$0xf]  ;;  %v3187_v2 = vld [vmem:[#allocation5 + $0x1ec] sm:$0xf0] }
  0x39   :  { %891 = vmatmul.bf16.vlgmr.msra.gmra.mxu1 %v3575_v3  ;;  %v3222_v14 = vld [vmem:[#allocation5 + $0x30c] sm:$0xf]  ;;  %917 = vmatmul.bf16.vlgmr.msra.gmra.mxu3 %v3575_v3  ;;  %v2244_v18 = vor.u32 %v3158_v12, %v2241_v13  ;;  %v3154_v20 = vld [vmem:[#allocation5 + $0xe4] sm:$0xf0]  ;;  %v2345_v8 = vld [vmem:[#allocation5 + $0x1f0] sm:$0xf0] }
  0x3a   :  { %935 = vmatpush.bf16.msrb.mxu1 %v2592_v41  ;;  %961 = vmatpush.bf16.msrb.mxu3 %v2596_v46  ;;  %v2497_v15 = vld [vmem:[#allocation5 + $0x328] sm:$0xf0]  ;;  %v2463_v21 = vld [vmem:[#allocation5 + $0x2c8] sm:$0xf]  ;;  %v2208_v28 = vor.u32 %v3154_v20, %v2207_v19  ;;  %v3247_v11 = vld [vmem:[#allocation5 + $0x3d4] sm:$0xf] }
  0x3b   :  { %v2500_v22 = vor.u32 %v3222_v14, %v2497_v15  ;;  %v3218_v23 = vld [vmem:[#allocation5 + $0x2e4] sm:$0xf0]  ;;  %v3150_v24 = vld [vmem:[#allocation5 + $0xcc] sm:$0xf]  ;;  %v2601_v12 = vld [vmem:[#allocation5 + $0x3f0] sm:$0xf0]  ;;  %v2344_v14 = vor.u32 %v3187_v2, %v2343_v1 }
  0x3c   :  { %923 = vmatpush.bf16.msrb.mxu0 %v2304_v53  ;;  %949 = vmatpush.bf16.msrb.mxu2 %v2308_v57  ;;  %v2209_v25 = vld [vmem:[#allocation5 + $0xe8] sm:$0xf0]  ;;  %v2464_v29 = vor.u32 %v3218_v23, %v2463_v21  ;;  %v2175_v31 = vld [vmem:[#allocation5 + $0x88] sm:$0xf]  ;;  %v2567_v19 = vld [vmem:[#allocation5 + $0x390] sm:$0xf]  ;;  %v2604_v20 = vor.u32 %v3247_v11, %v2601_v12 }
  0x3d   :  { %v3214_v26 = vld [vmem:[#allocation5 + $0x2cc] sm:$0xf]  ;;  %v2212_v30 = vor.u32 %v3150_v24, %v2209_v25  ;;  %v3146_v32 = vld [vmem:[#allocation5 + $0xa4] sm:$0xf0]  ;;  %v3243_v21 = vld [vmem:[#allocation5 + $0x3ac] sm:$0xf0] }
  0x3e   :  { %936 = vmatpush.bf16.msrb.mxu1 %v2560_v56  ;;  %962 = vmatpush.bf16.msrb.mxu3 %v2564_v61  ;;  %v2465_v27 = vld [vmem:[#allocation5 + $0x2e8] sm:$0xf0]  ;;  %v2431_v33 = vld [vmem:[#allocation5 + $0x288] sm:$0xf]  ;;  %v2176_v40 = vor.u32 %v3146_v32, %v2175_v31  ;;  %v2313_v23 = vld [vmem:[#allocation5 + $0x1b0] sm:$0xf0] }
  0x3f   :  { %v2468_v34 = vor.u32 %v3214_v26, %v2465_v27  ;;  %v3210_v35 = vld [vmem:[#allocation5 + $0x2a4] sm:$0xf0]  ;;  %v3142_v36 = vld [vmem:[#allocation5 + $0x8c] sm:$0xf]  ;;  %v3239_v24 = vld [vmem:[#allocation5 + $0x394] sm:$0xf]  ;;  %v2568_v27 = vor.u32 %v3243_v21, %v2567_v19 }
  0x40   :  { %924 = vmatpush.bf16.msrb.mxu0 %v2272_v4  ;;  %950 = vmatpush.bf16.msrb.mxu2 %v2276_v6  ;;  %v2177_v37 = vld [vmem:[#allocation5 + $0xa8] sm:$0xf0]  ;;  %v2432_v41 = vor.u32 %v3210_v35, %v2431_v33  ;;  %v2143_v43 = vld [vmem:[#allocation5 + $0x48] sm:$0xf]  ;;  %v2599_v4 = vld [vmem:[#allocation5 + $0x3d0] sm:$0xf] }
  0x41   :  { %v3206_v38 = vld [vmem:[#allocation5 + $0x28c] sm:$0xf]  ;;  %v2180_v42 = vor.u32 %v3142_v36, %v2177_v37  ;;  %v3138_v44 = vld [vmem:[#allocation5 + $0x64] sm:$0xf0]  ;;  %v3251_v6 = vld [vmem:[#allocation5 + $0x3ec] sm:$0xf0] }
  0x42   :  { %937 = vmatpush.bf16.msrb.mxu1 %v2528_v5  ;;  %963 = vmatpush.bf16.msrb.mxu3 %v2532_v10  ;;  %v2433_v39 = vld [vmem:[#allocation5 + $0x2a8] sm:$0xf0]  ;;  %v2399_v45 = vld [vmem:[#allocation5 + $0x248] sm:$0xf]  ;;  %v2144_v52 = vor.u32 %v3138_v44, %v2143_v43  ;;  %v2600_v15 = vor.u32 %v3251_v6, %v2599_v4  ;;  %v2569_v25 = vld [vmem:[#allocation5 + $0x3b0] sm:$0xf0] }
  0x43   :  { %v2436_v46 = vor.u32 %v3206_v38, %v2433_v39  ;;  %v3202_v47 = vld [vmem:[#allocation5 + $0x264] sm:$0xf0]  ;;  %v3134_v48 = vld [vmem:[#allocation5 + $0x4c] sm:$0xf]  ;;  %v2535_v31 = vld [vmem:[#allocation5 + $0x350] sm:$0xf]  ;;  %v2572_v32 = vor.u32 %v3239_v24, %v2569_v25 }
  0x44   :  { %925 = vmatpush.bf16.msrb.mxu0 %v2240_v16  ;;  %951 = vmatpush.bf16.msrb.mxu2 %v2244_v18  ;;  %v2145_v49 = vld [vmem:[#allocation5 + $0x68] sm:$0xf0]  ;;  %v2111_v53 = vld [vmem:[#allocation5 + $0x8] sm:$0xf]  ;;  %v2400_v56 = vor.u32 %v3202_v47, %v2399_v45  ;;  %v2348_v16 = vor.u32 %v3183_v7, %v2345_v8  ;;  %v3179_v18 = vld [vmem:[#allocation5 + $0x1ac] sm:$0xf0] }
  0x45   :  { %v3198_v50 = vld [vmem:[#allocation5 + $0x24c] sm:$0xf]  ;;  %v3130_v54 = vld [vmem:[#allocation5 + $0x24] sm:$0xf0]  ;;  %v2148_v57 = vor.u32 %v3134_v48, %v2145_v49  ;;  %v3235_v33 = vld [vmem:[#allocation5 + $0x36c] sm:$0xf0] }
  0x46   :  { %938 = vmatpush.bf16.msrb.mxu1 %v2496_v17  ;;  %964 = vmatpush.bf16.msrb.mxu3 %v2500_v22  ;;  %v2401_v51 = vld [vmem:[#allocation5 + $0x268] sm:$0xf0]  ;;  %v2367_v58 = vld [vmem:[#allocation5 + $0x208] sm:$0xf]  ;;  %v2112_v5 = vor.u32 %v3130_v54, %v2111_v53  ;;  %v2311_v17 = vld [vmem:[#allocation5 + $0x190] sm:$0xf]  ;;  %v2536_v39 = vor.u32 %v3235_v33, %v2535_v31 }
  0x47   :  { %v3194_v59 = vld [vmem:[#allocation5 + $0x224] sm:$0xf0]  ;;  %v3126_v60 = vld [vmem:[#allocation5 + $0xc] sm:$0xf]  ;;  %v2404_v61 = vor.u32 %v3198_v50, %v2401_v51  ;;  %v3175_v22 = vld [vmem:[#allocation5 + $0x194] sm:$0xf]  ;;  %v2312_v26 = vor.u32 %v3179_v18, %v2311_v17 }
  0x48   :  { %926 = vmatpush.bf16.msrb.mxu0 %v2208_v28  ;;  %952 = vmatpush.bf16.msrb.mxu2 %v2212_v30  ;;  %v2113_v62 = vld [vmem:[#allocation5 + $0x28] sm:$0xf0]  ;;  %v2368_v9 = vor.u32 %v3194_v59, %v2367_v58  ;;  %v2316_v28 = vor.u32 %v3175_v22, %v2313_v23  ;;  %v3171_v30 = vld [vmem:[#allocation5 + $0x16c] sm:$0xf0]  ;;  %v2281_v35 = vld [vmem:[#allocation5 + $0x170] sm:$0xf0] }
  0x49   :  { %v3190_v63 = vld [vmem:[#allocation5 + $0x20c] sm:$0xf]  ;;  %v2116_v10 = vor.u32 %v3126_v60, %v2113_v62  ;;  %v3231_v36 = vld [vmem:[#allocation5 + $0x354] sm:$0xf]  ;;  %v2503_v43 = vld [vmem:[#allocation5 + $0x310] sm:$0xf] }
  0x4a   :  { %939 = vmatpush.bf16.msrb.mxu1 %v2464_v29  ;;  %965 = vmatpush.bf16.msrb.mxu3 %v2468_v34  ;;  %v2369_v0 = vld [vmem:[#allocation5 + $0x228] sm:$0xf0]  ;;  %v2279_v29 = vld [vmem:[#allocation5 + $0x150] sm:$0xf]  ;;  %v3167_v34 = vld [vmem:[#allocation5 + $0x154] sm:$0xf] }
  0x4b   :  { %v2372_v13 = vor.u32 %v3190_v63, %v2369_v0  ;;  %v2537_v37 = vld [vmem:[#allocation5 + $0x370] sm:$0xf0]  ;;  %v2280_v38 = vor.u32 %v3171_v30, %v2279_v29  ;;  %v3227_v45 = vld [vmem:[#allocation5 + $0x32c] sm:$0xf0] }
  0x4c   :  { %927 = vmatpush.bf16.msrb.mxu0 %v2176_v40  ;;  %953 = vmatpush.bf16.msrb.mxu2 %v2180_v42  ;;  %v2284_v40 = vor.u32 %v3167_v34, %v2281_v35  ;;  %v3163_v42 = vld [vmem:[#allocation5 + $0x12c] sm:$0xf0]  ;;  %v2540_v44 = vor.u32 %v3231_v36, %v2537_v37  ;;  %v2249_v47 = vld [vmem:[#allocation5 + $0x130] sm:$0xf0]  ;;  %v2504_v51 = vor.u32 %v3227_v45, %v2503_v43  ;;  %v2351_v36 = vld [vmem:[#allocation5 + $0x1d8] sm:$0xf] }
  0x4d   :  { %v3223_v48 = vld [vmem:[#allocation5 + $0x314] sm:$0xf]  ;;  %v2215_v53 = vld [vmem:[#allocation5 + $0xd0] sm:$0xf]  ;;  %v3188_v37 = vld [vmem:[#allocation5 + $0x1f4] sm:$0xf0] }
  0x4e   :  { %940 = vmatpush.bf16.msrb.mxu1 %v2432_v41  ;;  %966 = vmatpush.bf16.msrb.mxu3 %v2436_v46  ;;  %v2247_v41 = vld [vmem:[#allocation5 + $0x110] sm:$0xf]  ;;  %v3159_v46 = vld [vmem:[#allocation5 + $0x114] sm:$0xf]  ;;  %v3248_v45 = vld [vmem:[#allocation5 + $0x3dc] sm:$0xf] }
  0x4f   :  { %v2505_v49 = vld [vmem:[#allocation5 + $0x330] sm:$0xf0]  ;;  %v2248_v50 = vor.u32 %v3163_v42, %v2247_v41  ;;  %v3155_v54 = vld [vmem:[#allocation5 + $0xec] sm:$0xf0]  ;;  %v3184_v41 = vld [vmem:[#allocation5 + $0x1dc] sm:$0xf] }
  0x50   :  { %928 = vmatpush.bf16.msrb.mxu0 %v2144_v52  ;;  %954 = vmatpush.bf16.msrb.mxu2 %v2148_v57  ;;  %v2252_v52 = vor.u32 %v3159_v46, %v2249_v47  ;;  %v2508_v57 = vor.u32 %v3223_v48, %v2505_v49  ;;  %v3219_v58 = vld [vmem:[#allocation5 + $0x2ec] sm:$0xf0]  ;;  %v3151_v59 = vld [vmem:[#allocation5 + $0xd4] sm:$0xf]  ;;  %v2216_v63 = vor.u32 %v3155_v54, %v2215_v53  ;;  %v2353_v42 = vld [vmem:[#allocation5 + $0x1f8] sm:$0xf0] }
  0x51   :  { %v2217_v60 = vld [vmem:[#allocation5 + $0xf0] sm:$0xf0]  ;;  %v2183_v2 = vld [vmem:[#allocation5 + $0x90] sm:$0xf]  ;;  %v2609_v46 = vld [vmem:[#allocation5 + $0x3f8] sm:$0xf0]  ;;  %v2352_v48 = vor.u32 %v3188_v37, %v2351_v36 }
  0x52   :  { %941 = vmatpush.bf16.msrb.mxu1 %v2400_v56  ;;  %967 = vmatpush.bf16.msrb.mxu3 %v2404_v61  ;;  %v2471_v56 = vld [vmem:[#allocation5 + $0x2d0] sm:$0xf]  ;;  %v3215_v61 = vld [vmem:[#allocation5 + $0x2d4] sm:$0xf]  ;;  %v2220_v1 = vor.u32 %v3151_v59, %v2217_v60  ;;  %v2575_v53 = vld [vmem:[#allocation5 + $0x398] sm:$0xf]  ;;  %v2612_v54 = vor.u32 %v3248_v45, %v2609_v46 }
  0x53   :  { %v2473_v62 = vld [vmem:[#allocation5 + $0x2f0] sm:$0xf0]  ;;  %v2472_v0 = vor.u32 %v3219_v58, %v2471_v56  ;;  %v3147_v4 = vld [vmem:[#allocation5 + $0xac] sm:$0xf0]  ;;  %v3244_v56 = vld [vmem:[#allocation5 + $0x3b4] sm:$0xf0] }
  0x54   :  { %929 = vmatpush.bf16.msrb.mxu0 %v2112_v5  ;;  %955 = vmatpush.bf16.msrb.mxu2 %v2116_v10  ;;  %v2439_v5 = vld [vmem:[#allocation5 + $0x290] sm:$0xf]  ;;  %v2476_v6 = vor.u32 %v3215_v61, %v2473_v62  ;;  %v3143_v8 = vld [vmem:[#allocation5 + $0x94] sm:$0xf]  ;;  %v2184_v12 = vor.u32 %v3147_v4, %v2183_v2  ;;  %v2321_v58 = vld [vmem:[#allocation5 + $0x1b8] sm:$0xf0]  ;;  %v2576_v62 = vor.u32 %v3244_v56, %v2575_v53 }
  0x55   :  { %v3211_v7 = vld [vmem:[#allocation5 + $0x2ac] sm:$0xf0]  ;;  %v3207_v10 = vld [vmem:[#allocation5 + $0x294] sm:$0xf]  ;;  %v3240_v59 = vld [vmem:[#allocation5 + $0x39c] sm:$0xf] }
  0x56   :  { %942 = vmatpush.bf16.msrb.mxu1 %v2368_v9  ;;  %968 = vmatpush.bf16.msrb.mxu3 %v2372_v13  ;;  %v2185_v9 = vld [vmem:[#allocation5 + $0xb0] sm:$0xf0]  ;;  %v2440_v13 = vor.u32 %v3211_v7, %v2439_v5  ;;  %v2407_v17 = vld [vmem:[#allocation5 + $0x250] sm:$0xf]  ;;  %v2577_v60 = vld [vmem:[#allocation5 + $0x3b8] sm:$0xf0] }
  0x57   :  { %930 = vmatmul.bf16.vlgmr.msrb.gmra.mxu0 %v3571_v55  ;;  %956 = vmatmul.bf16.vlgmr.msrb.gmra.mxu2 %v3571_v55  ;;  %v2441_v11 = vld [vmem:[#allocation5 + $0x2b0] sm:$0xf0]  ;;  %v3203_v19 = vld [vmem:[#allocation5 + $0x26c] sm:$0xf0]  ;;  %v2543_v2 = vld [vmem:[#allocation5 + $0x358] sm:$0xf]  ;;  %v2580_v4 = vor.u32 %v3240_v59, %v2577_v60 }
  0x58   :  { %974 = vmatpush.bf16.msra.mxu0 %v2344_v14  ;;  %1000 = vmatpush.bf16.msra.mxu2 %v2348_v16  ;;  %v2188_v14 = vor.u32 %v3143_v8, %v2185_v9  ;;  %v3139_v16 = vld [vmem:[#allocation5 + $0x6c] sm:$0xf0]  ;;  %v2444_v18 = vor.u32 %v3207_v10, %v2441_v11  ;;  %v2153_v21 = vld [vmem:[#allocation5 + $0x70] sm:$0xf0]  ;;  %v3236_v5 = vld [vmem:[#allocation5 + $0x374] sm:$0xf0] }
  0x59   :  { %943 = vmatmul.bf16.vlgmr.msrb.gmra.mxu1 %v3575_v3  ;;  %969 = vmatmul.bf16.vlgmr.msrb.gmra.mxu3 %v3575_v3  ;;  %v3199_v22 = vld [vmem:[#allocation5 + $0x254] sm:$0xf]  ;;  %v2119_v25 = vld [vmem:[#allocation5 + $0x10] sm:$0xf]  ;;  %v2289_v7 = vld [vmem:[#allocation5 + $0x178] sm:$0xf0]  ;;  %v2544_v11 = vor.u32 %v3236_v5, %v2543_v2 }
  0x5a   :  { %987 = vmatpush.bf16.msra.mxu1 %v2600_v15  ;;  %1013 = vmatpush.bf16.msra.mxu3 %v2604_v20  ;;  %v2151_v15 = vld [vmem:[#allocation5 + $0x50] sm:$0xf]  ;;  %v3135_v20 = vld [vmem:[#allocation5 + $0x54] sm:$0xf]  ;;  %v3232_v8 = vld [vmem:[#allocation5 + $0x35c] sm:$0xf] }
  0x5b   :  { %v2409_v23 = vld [vmem:[#allocation5 + $0x270] sm:$0xf0]  ;;  %v2152_v24 = vor.u32 %v3139_v16, %v2151_v15  ;;  %v2375_v29 = vld [vmem:[#allocation5 + $0x210] sm:$0xf]  ;;  %v2545_v9 = vld [vmem:[#allocation5 + $0x378] sm:$0xf0] }
  0x5c   :  { %975 = vmatpush.bf16.msra.mxu0 %v2312_v26  ;;  %1001 = vmatpush.bf16.msra.mxu2 %v2316_v28  ;;  %v3131_v26 = vld [vmem:[#allocation5 + $0x2c] sm:$0xf0]  ;;  %v2156_v28 = vor.u32 %v3135_v20, %v2153_v21  ;;  %v3127_v31 = vld [vmem:[#allocation5 + $0x14] sm:$0xf]  ;;  %v2511_v15 = vld [vmem:[#allocation5 + $0x318] sm:$0xf]  ;;  %v2548_v16 = vor.u32 %v3232_v8, %v2545_v9 }
  0x5d   :  { %v3195_v30 = vld [vmem:[#allocation5 + $0x22c] sm:$0xf0]  ;;  %v2121_v33 = vld [vmem:[#allocation5 + $0x30] sm:$0xf0]  ;;  %v3224_v20 = vld [vmem:[#allocation5 + $0x31c] sm:$0xf] }
  0x5e   :  { %988 = vmatpush.bf16.msra.mxu1 %v2568_v27  ;;  %1014 = vmatpush.bf16.msra.mxu3 %v2572_v32  ;;  %v2408_v27 = vor.u32 %v3203_v19, %v2407_v17  ;;  %v2412_v32 = vor.u32 %v3199_v22, %v2409_v23  ;;  %v3191_v34 = vld [vmem:[#allocation5 + $0x214] sm:$0xf]  ;;  %v2376_v43 = vor.u32 %v3195_v30, %v2375_v29  ;;  %v3228_v17 = vld [vmem:[#allocation5 + $0x334] sm:$0xf0]  ;;  %v2257_v19 = vld [vmem:[#allocation5 + $0x138] sm:$0xf0] }
  0x5f   :  { %v2377_v35 = vld [vmem:[#allocation5 + $0x230] sm:$0xf0]  ;;  %v2513_v21 = vld [vmem:[#allocation5 + $0x338] sm:$0xf0]  ;;  %v2512_v23 = vor.u32 %v3228_v17, %v2511_v15  ;;  %v3220_v29 = vld [vmem:[#allocation5 + $0x2f4] sm:$0xf0] }
  0x60   :  { %976 = vmatpush.bf16.msra.mxu0 %v2280_v38  ;;  %1002 = vmatpush.bf16.msra.mxu2 %v2284_v40  ;;  %v2607_v38 = vld [vmem:[#allocation5 + $0x3d8] sm:$0xf]  ;;  %v2380_v47 = vor.u32 %v3191_v34, %v2377_v35  ;;  %v3152_v30 = vld [vmem:[#allocation5 + $0xdc] sm:$0xf]  ;;  %v3268_v9 = vld [vmem:[#allocation8 + $0x74] sm:$0xf0] }
  0x61   :  { %v3252_v40 = vld [vmem:[#allocation5 + $0x3f4] sm:$0xf0]  ;;  %v2449_v45 = vld [vmem:[#allocation5 + $0x2b8] sm:$0xf0] }
  0x62   :  { %989 = vmatpush.bf16.msra.mxu1 %v2536_v39  ;;  %1015 = vmatpush.bf16.msra.mxu3 %v2540_v44  ;;  %v2120_v39 = vor.u32 %v3131_v26, %v2119_v25  ;;  %v2124_v44 = vor.u32 %v3127_v31, %v2121_v33  ;;  %v2608_v49 = vor.u32 %v3252_v40, %v2607_v38  ;;  %v2223_v25 = vld [vmem:[#allocation5 + $0xd8] sm:$0xf]  ;;  %v2225_v31 = vld [vmem:[#allocation5 + $0xf8] sm:$0xf0] }
  0x63   :  { %v3156_v26 = vld [vmem:[#allocation5 + $0xf4] sm:$0xf0]  ;;  %v2481_v33 = vld [vmem:[#allocation5 + $0x2f8] sm:$0xf0]  ;;  %v2228_v36 = vor.u32 %v3152_v30, %v2225_v31 }
  0x64   :  { %977 = vmatpush.bf16.msra.mxu0 %v2248_v50  ;;  %1003 = vmatpush.bf16.msra.mxu2 %v2252_v52  ;;  %v2356_v50 = vor.u32 %v3184_v41, %v2353_v42  ;;  %v3180_v52 = vld [vmem:[#allocation5 + $0x1b4] sm:$0xf0]  ;;  %v2224_v34 = vor.u32 %v3156_v26, %v2223_v25  ;;  %v3144_v42 = vld [vmem:[#allocation5 + $0x9c] sm:$0xf]  ;;  %v2791_v26 = vld [vmem:[#allocation8 + $0x160] sm:$0xf] }
  0x65   :  { %v2191_v37 = vld [vmem:[#allocation5 + $0x98] sm:$0xf]  ;;  %v2161_v56 = vld [vmem:[#allocation5 + $0x78] sm:$0xf0] }
  0x66   :  { %990 = vmatpush.bf16.msra.mxu1 %v2504_v51  ;;  %1016 = vmatpush.bf16.msra.mxu3 %v2508_v57  ;;  %v2319_v51 = vld [vmem:[#allocation5 + $0x198] sm:$0xf]  ;;  %v3176_v57 = vld [vmem:[#allocation5 + $0x19c] sm:$0xf] }
  0x67   :  { %v2320_v61 = vor.u32 %v3180_v52, %v2319_v51  ;;  %v3148_v38 = vld [vmem:[#allocation5 + $0xb4] sm:$0xf0]  ;;  %v2129_v5 = vld [vmem:[#allocation5 + $0x38] sm:$0xf0] }
  0x68   :  { %978 = vmatpush.bf16.msra.mxu0 %v2216_v63  ;;  %1004 = vmatpush.bf16.msra.mxu2 %v2220_v1  ;;  %v2324_v63 = vor.u32 %v3176_v57, %v2321_v58  ;;  %v3172_v1 = vld [vmem:[#allocation5 + $0x174] sm:$0xf0]  ;;  %v2192_v46 = vor.u32 %v3148_v38, %v2191_v37  ;;  %v3200_v57 = vld [vmem:[#allocation5 + $0x25c] sm:$0xf]  ;;  %v2711_v38 = vld [vmem:[#allocation8 + $0xc0] sm:$0xf] }
  0x69   :  { %v3212_v41 = vld [vmem:[#allocation5 + $0x2b4] sm:$0xf0]  ;;  %v2417_v58 = vld [vmem:[#allocation5 + $0x278] sm:$0xf0] }
  0x6a   :  { %991 = vmatpush.bf16.msra.mxu1 %v2472_v0  ;;  %1017 = vmatpush.bf16.msra.mxu3 %v2476_v6  ;;  %v2287_v0 = vld [vmem:[#allocation5 + $0x158] sm:$0xf]  ;;  %v3168_v6 = vld [vmem:[#allocation5 + $0x15c] sm:$0xf]  ;;  %v2420_v2 = vor.u32 %v3200_v57, %v2417_v58  ;;  %v2855_v58 = vld [vmem:[#allocation8 + $0x1e0] sm:$0xf] }
  0x6b   :  { %v2288_v10 = vor.u32 %v3172_v1, %v2287_v0  ;;  %v2415_v51 = vld [vmem:[#allocation5 + $0x258] sm:$0xf] }
  0x6c   :  { %979 = vmatpush.bf16.msra.mxu0 %v2184_v12  ;;  %1005 = vmatpush.bf16.msra.mxu2 %v2188_v14  ;;  %v2292_v12 = vor.u32 %v3168_v6, %v2289_v7  ;;  %v3164_v14 = vld [vmem:[#allocation5 + $0x134] sm:$0xf0]  ;;  %v3192_v6 = vld [vmem:[#allocation5 + $0x21c] sm:$0xf] }
  0x6d   :  { %v3204_v53 = vld [vmem:[#allocation5 + $0x274] sm:$0xf0]  ;;  %v2385_v7 = vld [vmem:[#allocation5 + $0x238] sm:$0xf0] }
  0x6e   :  { %992 = vmatpush.bf16.msra.mxu1 %v2440_v13  ;;  %1018 = vmatpush.bf16.msra.mxu3 %v2444_v18  ;;  %v2255_v13 = vld [vmem:[#allocation5 + $0x118] sm:$0xf]  ;;  %v3160_v18 = vld [vmem:[#allocation5 + $0x11c] sm:$0xf]  ;;  %v2388_v15 = vor.u32 %v3192_v6, %v2385_v7 }
  0x6f   :  { %v2256_v22 = vor.u32 %v3164_v14, %v2255_v13  ;;  %v2127_v60 = vld [vmem:[#allocation5 + $0x18] sm:$0xf] }
  0x70   :  { %980 = vmatpush.bf16.msra.mxu0 %v2152_v24  ;;  %1006 = vmatpush.bf16.msra.mxu2 %v2156_v28  ;;  %v2260_v24 = vor.u32 %v3160_v18, %v2257_v19  ;;  %v2516_v28 = vor.u32 %v3224_v20, %v2513_v21  ;;  %v2383_v0 = vld [vmem:[#allocation5 + $0x218] sm:$0xf]  ;;  %v3300_v18 = vld [vmem:[#allocation8 + $0x174] sm:$0xf0]  ;;  %v2663_v19 = vld [vmem:[#allocation8 + $0x60] sm:$0xf] }
  0x71   :  { %v3196_v1 = vld [vmem:[#allocation5 + $0x234] sm:$0xf0]  ;;  %v3266_v20 = vld [vmem:[#allocation8 + $0x64] sm:$0xf0] }
  0x72   :  { %993 = vmatpush.bf16.msra.mxu1 %v2408_v27  ;;  %1019 = vmatpush.bf16.msra.mxu3 %v2412_v32  ;;  %v2479_v27 = vld [vmem:[#allocation5 + $0x2d8] sm:$0xf]  ;;  %v3216_v32 = vld [vmem:[#allocation5 + $0x2dc] sm:$0xf]  ;;  %v2384_v13 = vor.u32 %v3196_v1, %v2383_v0  ;;  %v2664_v25 = vor.u32 %v3266_v20, %v2663_v19  ;;  %v2775_v0 = vld [vmem:[#allocation8 + $0x140] sm:$0xf] }
  0x73   :  { %v2480_v35 = vor.u32 %v3220_v29, %v2479_v27  ;;  %v2484_v40 = vor.u32 %v3216_v32, %v2481_v33  ;;  %v2671_v8 = vld [vmem:[#allocation8 + $0x70] sm:$0xf]  ;;  %v3298_v27 = vld [vmem:[#allocation8 + $0x164] sm:$0xf0]  ;;  %v3264_v29 = vld [vmem:[#allocation8 + $0x54] sm:$0xf0] }
  0x74   :  { %981 = vmatpush.bf16.msra.mxu0 %v2120_v39  ;;  %1007 = vmatpush.bf16.msra.mxu2 %v2124_v44  ;;  %v2447_v39 = vld [vmem:[#allocation5 + $0x298] sm:$0xf]  ;;  %v3208_v44 = vld [vmem:[#allocation5 + $0x29c] sm:$0xf]  ;;  %v3280_v32 = vld [vmem:[#allocation8 + $0xd4] sm:$0xf0]  ;;  %v2792_v33 = vor.u32 %v3298_v27, %v2791_v26 }
  0x75   :  { %v2452_v52 = vor.u32 %v3208_v44, %v2449_v45  ;;  %v2799_v17 = vld [vmem:[#allocation8 + $0x170] sm:$0xf]  ;;  %v3260_v44 = vld [vmem:[#allocation8 + $0x34] sm:$0xf0] }
  0x76   :  { %994 = vmatpush.bf16.msra.mxu1 %v2376_v43  ;;  %1020 = vmatpush.bf16.msra.mxu3 %v2380_v47  ;;  %v2193_v43 = vld [vmem:[#allocation5 + $0xb8] sm:$0xf0]  ;;  %v2448_v47 = vor.u32 %v3212_v41, %v2447_v39  ;;  %v2719_v31 = vld [vmem:[#allocation8 + $0xd0] sm:$0xf]  ;;  %v3278_v39 = vld [vmem:[#allocation8 + $0xc4] sm:$0xf0] }
  0x77   :  { %982 = vmatmul.bf16.vlgmr.msra.gmra.mxu0 %v3571_v55  ;;  %1008 = vmatmul.bf16.vlgmr.msra.gmra.mxu2 %v3571_v55  ;;  %v2720_v37 = vor.u32 %v3280_v32, %v2719_v31  ;;  %v3316_v41 = vld [vmem:[#allocation8 + $0x1f4] sm:$0xf0]  ;;  %v2703_v45 = vld [vmem:[#allocation8 + $0xb0] sm:$0xf]  ;;  %v3330_v31 = vld [vmem:[#allocation8 + $0x264] sm:$0xf0] }
  0x78   :  { %1026 = vmatpush.bf16.msrb.mxu0 %v2352_v48  ;;  %1052 = vmatpush.bf16.msrb.mxu2 %v2356_v50  ;;  %v2196_v48 = vor.u32 %v3144_v42, %v2193_v43  ;;  %v3140_v50 = vld [vmem:[#allocation5 + $0x74] sm:$0xf0]  ;;  %v3348_v20 = vld [vmem:[#allocation8 + $0x2f4] sm:$0xf0] }
  0x79   :  { %995 = vmatmul.bf16.vlgmr.msra.gmra.mxu1 %v3575_v3  ;;  %1021 = vmatmul.bf16.vlgmr.msra.gmra.mxu3 %v3575_v3  ;;  %v2639_v43 = vld [vmem:[#allocation8 + $0x30] sm:$0xf] }
  0x7a   :  { %1039 = vmatpush.bf16.msrb.mxu1 %v2608_v49  ;;  %1065 = vmatpush.bf16.msrb.mxu3 %v2612_v54  ;;  %v2159_v49 = vld [vmem:[#allocation5 + $0x58] sm:$0xf]  ;;  %v3136_v54 = vld [vmem:[#allocation5 + $0x5c] sm:$0xf] }
  0x7b   :  { %v2160_v59 = vor.u32 %v3140_v50, %v2159_v49  ;;  %v3258_v49 = vld [vmem:[#allocation8 + $0x24] sm:$0xf0]  ;;  %v2687_v1 = vld [vmem:[#allocation8 + $0x90] sm:$0xf] }
  0x7c   :  { %1027 = vmatpush.bf16.msrb.mxu0 %v2320_v61  ;;  %1053 = vmatpush.bf16.msrb.mxu2 %v2324_v63  ;;  %v2416_v61 = vor.u32 %v3204_v53, %v2415_v51  ;;  %v3132_v63 = vld [vmem:[#allocation5 + $0x34] sm:$0xf0]  ;;  %v2695_v51 = vld [vmem:[#allocation8 + $0xa0] sm:$0xf] }
  0x7d   :  { %v2783_v53 = vld [vmem:[#allocation8 + $0x150] sm:$0xf] }
  0x7e   :  { %1040 = vmatpush.bf16.msrb.mxu1 %v2576_v62  ;;  %1066 = vmatpush.bf16.msrb.mxu3 %v2580_v4  ;;  %v2164_v62 = vor.u32 %v3136_v54, %v2161_v56  ;;  %v3128_v4 = vld [vmem:[#allocation5 + $0x1c] sm:$0xf]  ;;  %v3296_v54 = vld [vmem:[#allocation8 + $0x154] sm:$0xf0]  ;;  %v2991_v19 = vld [vmem:[#allocation8 + $0x2f0] sm:$0xf] }
  0x7f   :  { %v2132_v14 = vor.u32 %v3128_v4, %v2129_v5  ;;  %v2784_v57 = vor.u32 %v3296_v54, %v2783_v53  ;;  %v3294_v4 = vld [vmem:[#allocation8 + $0x144] sm:$0xf0]  ;;  %v2615_v5 = vld [vmem:[#allocation8] sm:$0xf]  ;;  %v2992_v32 = vor.u32 %v3348_v20, %v2991_v19  ;;  %v2751_v53 = vld [vmem:[#allocation8 + $0x110] sm:$0xf] }
  0x80   :  { %1028 = vmatpush.bf16.msrb.mxu0 %v2288_v10  ;;  %1054 = vmatpush.bf16.msrb.mxu2 %v2292_v12  ;;  %v2128_v10 = vor.u32 %v3132_v63, %v2127_v60  ;;  %v3284_v12 = vld [vmem:[#allocation8 + $0xf4] sm:$0xf0]  ;;  %v2623_v60 = vld [vmem:[#allocation8 + $0x10] sm:$0xf]  ;;  %v2776_v6 = vor.u32 %v3294_v4, %v2775_v0  ;;  %v3306_v0 = vld [vmem:[#allocation8 + $0x1a4] sm:$0xf0] }
  0x81   :  { %v3288_v54 = vld [vmem:[#allocation8 + $0x114] sm:$0xf0] }
  0x82   :  { %1041 = vmatpush.bf16.msrb.mxu1 %v2544_v11  ;;  %1067 = vmatpush.bf16.msrb.mxu3 %v2548_v16  ;;  %v2735_v11 = vld [vmem:[#allocation8 + $0xf0] sm:$0xf]  ;;  %v2672_v16 = vor.u32 %v3268_v9, %v2671_v8  ;;  %v3254_v8 = vld [vmem:[#allocation8 + $0x4] sm:$0xf0] }
  0x83   :  { %v2736_v21 = vor.u32 %v3284_v12, %v2735_v11  ;;  %v2927_v9 = vld [vmem:[#allocation8 + $0x270] sm:$0xf]  ;;  %v2679_v12 = vld [vmem:[#allocation8 + $0x80] sm:$0xf] }
  0x84   :  { %1029 = vmatpush.bf16.msrb.mxu0 %v2256_v22  ;;  %1055 = vmatpush.bf16.msrb.mxu2 %v2260_v24  ;;  %v2727_v22 = vld [vmem:[#allocation8 + $0xe0] sm:$0xf]  ;;  %v2800_v24 = vor.u32 %v3300_v18, %v2799_v17  ;;  %v2767_v17 = vld [vmem:[#allocation8 + $0x130] sm:$0xf]  ;;  %v3292_v18 = vld [vmem:[#allocation8 + $0x134] sm:$0xf0] }
  0x86   :  { %1042 = vmatpush.bf16.msrb.mxu1 %v2512_v23  ;;  %1068 = vmatpush.bf16.msrb.mxu3 %v2516_v28  ;;  %v3282_v23 = vld [vmem:[#allocation8 + $0xe4] sm:$0xf0]  ;;  %v2655_v28 = vld [vmem:[#allocation8 + $0x50] sm:$0xf] }
  0x87   :  { %v2728_v30 = vor.u32 %v3282_v23, %v2727_v22  ;;  %v2839_v22 = vld [vmem:[#allocation8 + $0x1c0] sm:$0xf]  ;;  %v2616_v23 = vor.u32 %v3254_v8, %v2615_v5 }
  0x88   :  { %1030 = vmatpush.bf16.msrb.mxu0 %v2224_v34  ;;  %1056 = vmatpush.bf16.msrb.mxu2 %v2228_v36  ;;  %v2656_v34 = vor.u32 %v3264_v29, %v2655_v28  ;;  %v3262_v36 = vld [vmem:[#allocation8 + $0x44] sm:$0xf0]  ;;  %v2759_v28 = vld [vmem:[#allocation8 + $0x120] sm:$0xf] }
  0x89   :  { %v3290_v29 = vld [vmem:[#allocation8 + $0x124] sm:$0xf0] }
  0x8a   :  { %1043 = vmatpush.bf16.msrb.mxu1 %v2480_v35  ;;  %1069 = vmatpush.bf16.msrb.mxu3 %v2484_v40  ;;  %v2647_v35 = vld [vmem:[#allocation8 + $0x40] sm:$0xf]  ;;  %v2863_v40 = vld [vmem:[#allocation8 + $0x1f0] sm:$0xf] }
  0x8b   :  { %v2864_v42 = vor.u32 %v3316_v41, %v2863_v40  ;;  %v2975_v41 = vld [vmem:[#allocation8 + $0x2d0] sm:$0xf] }
  0x8c   :  { %1031 = vmatpush.bf16.msrb.mxu0 %v2192_v46  ;;  %1057 = vmatpush.bf16.msrb.mxu2 %v2196_v48  ;;  %v3276_v46 = vld [vmem:[#allocation8 + $0xb4] sm:$0xf0]  ;;  %v2631_v48 = vld [vmem:[#allocation8 + $0x20] sm:$0xf] }
  0x8d   :  { %v2704_v50 = vor.u32 %v3276_v46, %v2703_v45  ;;  %v2632_v56 = vor.u32 %v3258_v49, %v2631_v48  ;;  %v2967_v46 = vld [vmem:[#allocation8 + $0x2c0] sm:$0xf]  ;;  %v2831_v48 = vld [vmem:[#allocation8 + $0x1b0] sm:$0xf]  ;;  %v3308_v49 = vld [vmem:[#allocation8 + $0x1b4] sm:$0xf0] }
  0x8e   :  { %1044 = vmatpush.bf16.msrb.mxu1 %v2448_v47  ;;  %1070 = vmatpush.bf16.msrb.mxu3 %v2452_v52  ;;  %v2640_v47 = vor.u32 %v3260_v44, %v2639_v43  ;;  %v3274_v52 = vld [vmem:[#allocation8 + $0xa4] sm:$0xf0]  ;;  %v2903_v44 = vld [vmem:[#allocation8 + $0x240] sm:$0xf] }
  0x90   :  { %1032 = vmatpush.bf16.msrb.mxu0 %v2160_v59  ;;  %1058 = vmatpush.bf16.msrb.mxu2 %v2164_v62  ;;  %v3314_v59 = vld [vmem:[#allocation8 + $0x1e4] sm:$0xf0]  ;;  %v2696_v62 = vor.u32 %v3274_v52, %v2695_v51 }
  0x91   :  { %v2856_v63 = vor.u32 %v3314_v59, %v2855_v58  ;;  %v3324_v58 = vld [vmem:[#allocation8 + $0x234] sm:$0xf0] }
  0x92   :  { %1045 = vmatpush.bf16.msrb.mxu1 %v2416_v61  ;;  %1071 = vmatpush.bf16.msrb.mxu3 %v2420_v2  ;;  %v3256_v61 = vld [vmem:[#allocation8 + $0x14] sm:$0xf0] }
  0x93   :  { %v3272_v2 = vld [vmem:[#allocation8 + $0x94] sm:$0xf0]  ;;  %v2624_v7 = vor.u32 %v3256_v61, %v2623_v60  ;;  %v2752_v60 = vor.u32 %v3288_v54, %v2751_v53  ;;  %v2959_v61 = vld [vmem:[#allocation8 + $0x2b0] sm:$0xf]  ;;  %v3283_v53 = vld [vmem:[#allocation8 + $0xf4] sm:$0xf] }
  0x94   :  { %1033 = vmatpush.bf16.msrb.mxu0 %v2128_v10  ;;  %1059 = vmatpush.bf16.msrb.mxu2 %v2132_v14  ;;  %v3332_v10 = vld [vmem:[#allocation8 + $0x274] sm:$0xf0]  ;;  %v2688_v11 = vor.u32 %v3272_v2, %v2687_v1  ;;  %v2737_v54 = vld [vmem:[#allocation8 + $0xf8] sm:$0xf0] }
  0x95   :  { %v3312_v14 = vld [vmem:[#allocation8 + $0x1d4] sm:$0xf0] }
  0x96   :  { %1046 = vmatpush.bf16.msrb.mxu1 %v2384_v13  ;;  %1072 = vmatpush.bf16.msrb.mxu3 %v2388_v15  ;;  %v2847_v13 = vld [vmem:[#allocation8 + $0x1d0] sm:$0xf]  ;;  %v3270_v15 = vld [vmem:[#allocation8 + $0x84] sm:$0xf0] }
  0x97   :  { %1034 = vmatmul.bf16.vlgmr.msrb.gmra.mxu0 %v3571_v55  ;;  %1060 = vmatmul.bf16.vlgmr.msrb.gmra.mxu2 %v3571_v55  ;;  %v2648_v55 = vor.u32 %v3262_v36, %v2647_v35  ;;  %v2680_v26 = vor.u32 %v3270_v15, %v2679_v12  ;;  %v3346_v35 = vld [vmem:[#allocation8 + $0x2e4] sm:$0xf0]  ;;  %v2815_v15 = vld [vmem:[#allocation8 + $0x190] sm:$0xf] }
  0x98   :  { %1868 = vmatpush.bf16.msra.mxu0 %v2672_v16  ;;  %1894 = vmatpush.bf16.msra.mxu2 %v2800_v24  ;;  %v2848_v16 = vor.u32 %v3312_v14, %v2847_v13  ;;  %v3310_v24 = vld [vmem:[#allocation8 + $0x1c4] sm:$0xf0]  ;;  %v2951_v13 = vld [vmem:[#allocation8 + $0x2a0] sm:$0xf] }
  0x99   :  { %1047 = vmatmul.bf16.vlgmr.msrb.gmra.mxu1 %v3575_v3  ;;  %1073 = vmatmul.bf16.vlgmr.msrb.gmra.mxu3 %v3575_v3  ;;  %v2712_v3 = vor.u32 %v3278_v39, %v2711_v38  ;;  %v2840_v27 = vor.u32 %v3310_v24, %v2839_v22  ;;  %v2911_v38 = vld [vmem:[#allocation8 + $0x250] sm:$0xf]  ;;  %v3328_v39 = vld [vmem:[#allocation8 + $0x254] sm:$0xf0]  ;;  %v3338_v14 = vld [vmem:[#allocation8 + $0x2a4] sm:$0xf0] }
  0x9a   :  { %1881 = vmatpush.bf16.msra.mxu1 %v2736_v21  ;;  %1907 = vmatpush.bf16.msra.mxu3 %v2864_v42  ;;  %v2768_v21 = vor.u32 %v3292_v18, %v2767_v17  ;;  %v3344_v42 = vld [vmem:[#allocation8 + $0x2d4] sm:$0xf0]  ;;  %v2912_v43 = vor.u32 %v3328_v39, %v2911_v38 }
  0x9b   :  { %v2976_v45 = vor.u32 %v3344_v42, %v2975_v41  ;;  %v3364_v24 = vld [vmem:[#allocation8 + $0x374] sm:$0xf0]  ;;  %v3267_v42 = vld [vmem:[#allocation8 + $0x74] sm:$0xf] }
  0x9c   :  { %1869 = vmatpush.bf16.msra.mxu0 %v2664_v25  ;;  %1895 = vmatpush.bf16.msra.mxu2 %v2792_v33  ;;  %v2928_v25 = vor.u32 %v3332_v10, %v2927_v9  ;;  %v2760_v33 = vor.u32 %v3290_v29, %v2759_v28  ;;  %v2887_v9 = vld [vmem:[#allocation8 + $0x220] sm:$0xf]  ;;  %v3322_v10 = vld [vmem:[#allocation8 + $0x224] sm:$0xf0]  ;;  %v2952_v28 = vor.u32 %v3338_v14, %v2951_v13  ;;  %v3376_v13 = vld [vmem:[#allocation8 + $0x3d4] sm:$0xf0] }
  0x9d   :  { %v2888_v22 = vor.u32 %v3322_v10, %v2887_v9  ;;  %v3281_v9 = vld [vmem:[#allocation8 + $0xe4] sm:$0xf]  ;;  %v2729_v10 = vld [vmem:[#allocation8 + $0xe8] sm:$0xf0] }
  0x9e   :  { %1882 = vmatpush.bf16.msra.mxu1 %v2728_v30  ;;  %1908 = vmatpush.bf16.msra.mxu3 %v2856_v63  ;;  %v2919_v30 = vld [vmem:[#allocation8 + $0x260] sm:$0xf] }
  0x9f   :  { %v2920_v36 = vor.u32 %v3330_v31, %v2919_v30  ;;  %v2823_v63 = vld [vmem:[#allocation8 + $0x1a0] sm:$0xf]  ;;  %v2943_v30 = vld [vmem:[#allocation8 + $0x290] sm:$0xf]  ;;  %v3336_v31 = vld [vmem:[#allocation8 + $0x294] sm:$0xf0] }
  0xa0   :  { %1870 = vmatpush.bf16.msra.mxu0 %v2656_v34  ;;  %1896 = vmatpush.bf16.msra.mxu2 %v2784_v57  ;;  %v2983_v34 = vld [vmem:[#allocation8 + $0x2e0] sm:$0xf]  ;;  %v2895_v57 = vld [vmem:[#allocation8 + $0x230] sm:$0xf]  ;;  %v2824_v1 = vor.u32 %v3306_v0, %v2823_v63 }
  0xa1   :  { %v2984_v40 = vor.u32 %v3346_v35, %v2983_v34  ;;  %v2896_v5 = vor.u32 %v3324_v58, %v2895_v57  ;;  %v2871_v35 = vld [vmem:[#allocation8 + $0x200] sm:$0xf] }
  0xa2   :  { %1883 = vmatpush.bf16.msra.mxu1 %v2720_v37  ;;  %1909 = vmatpush.bf16.msra.mxu3 %v2848_v16  ;;  %v3591_v37 = vld [vmem:[#allocation7] sm:$0xff]  ;;  %v3111_v0 = vld [vmem:[#allocation8 + $0x3e0] sm:$0xf] }
  0xa3   :  { %v215_v4 = vperm.slane %v3591_v37, 1  ;;  %v3304_v16 = vld [vmem:[#allocation8 + $0x194] sm:$0xf0] }
  0xa4   :  { %1871 = vmatpush.bf16.msra.mxu0 %v2648_v55  ;;  %1897 = vmatpush.bf16.msra.mxu2 %v2776_v6  ;;  %v214_v55 = vperm.slane %v3591_v37, 0  ;;  %v2743_v6 = vld [vmem:[#allocation8 + $0x100] sm:$0xf]  ;;  %v2816_v19 = vor.u32 %v3304_v16, %v2815_v15  ;;  %v3023_v15 = vld [vmem:[#allocation8 + $0x330] sm:$0xf] }
  0xa5   :  { %v3356_v16 = vld [vmem:[#allocation8 + $0x334] sm:$0xf0] }
  0xa6   :  { %1884 = vmatpush.bf16.msra.mxu1 %v2712_v3  ;;  %1910 = vmatpush.bf16.msra.mxu3 %v2840_v27  ;;  %v3326_v3 = vld [vmem:[#allocation8 + $0x244] sm:$0xf0]  ;;  %v3320_v27 = vld [vmem:[#allocation8 + $0x214] sm:$0xf0] }
  0xa7   :  { %v2904_v52 = vor.u32 %v3326_v3, %v2903_v44  ;;  %v2673_v44 = vld [vmem:[#allocation8 + $0x78] sm:$0xf0]  ;;  %v2944_v3 = vor.u32 %v3336_v31, %v2943_v30 }
  0xa8   :  { %1872 = vmatpush.bf16.msra.mxu0 %v2640_v47  ;;  %1898 = vmatpush.bf16.msra.mxu2 %v2768_v21  ;;  %v3342_v47 = vld [vmem:[#allocation8 + $0x2c4] sm:$0xf0] }
  0xa9   :  { %v2968_v59 = vor.u32 %v3342_v47, %v2967_v46  ;;  %v2935_v46 = vld [vmem:[#allocation8 + $0x280] sm:$0xf]  ;;  %v3334_v47 = vld [vmem:[#allocation8 + $0x284] sm:$0xf0] }
  0xaa   :  { %1885 = vmatpush.bf16.msra.mxu1 %v2704_v50  ;;  %v2832_v50 = vor.u32 %v3308_v49, %v2831_v48  ;;  %v3119_v49 = vld [vmem:[#allocation8 + $0x3f0] sm:$0xf] }
  0xac   :  { %1873 = vmatpush.bf16.msra.mxu0 %v2632_v56  ;;  %1899 = vmatpush.bf16.msra.mxu2 %v2760_v33  ;;  %v3302_v33 = vld [vmem:[#allocation8 + $0x184] sm:$0xf0] }
  0xad   :  { %1911 = vmatpush.bf16.msra.mxu3 %v2832_v50  ;;  %v3380_v50 = vld [vmem:[#allocation8 + $0x3f4] sm:$0xf0] }
  0xae   :  { %1886 = vmatpush.bf16.msra.mxu1 %v2696_v62  ;;  %v3340_v62 = vld [vmem:[#allocation8 + $0x2b4] sm:$0xf0] }
  0xb0   :  { %1874 = vmatpush.bf16.msra.mxu0 %v2624_v7  ;;  %1900 = vmatpush.bf16.msra.mxu2 %v2752_v60  ;;  %v3286_v7 = vld [vmem:[#allocation8 + $0x104] sm:$0xf0]  ;;  %v2676_v60 = vor.u32 %v3267_v42, %v2673_v44  ;;  %v2641_v42 = vld [vmem:[#allocation8 + $0x38] sm:$0xf0]  ;;  %v3372_v44 = vld [vmem:[#allocation8 + $0x3b4] sm:$0xf0] }
  0xb1   :  { %1912 = vmatpush.bf16.msra.mxu3 %v2824_v1  ;;  %v2744_v12 = vor.u32 %v3286_v7, %v2743_v6  ;;  %v3378_v1 = vld [vmem:[#allocation8 + $0x3e4] sm:$0xf0]  ;;  %v3031_v6 = vld [vmem:[#allocation8 + $0x340] sm:$0xf] }
  0xb2   :  { %1887 = vmatpush.bf16.msra.mxu1 %v2688_v11  ;;  %v2960_v11 = vor.u32 %v3340_v62, %v2959_v61  ;;  %v3265_v61 = vld [vmem:[#allocation8 + $0x64] sm:$0xf]  ;;  %v2936_v62 = vor.u32 %v3334_v47, %v2935_v46  ;;  %v3358_v7 = vld [vmem:[#allocation8 + $0x344] sm:$0xf0]  ;;  %v3275_v47 = vld [vmem:[#allocation8 + $0xb4] sm:$0xf] }
  0xb4   :  { %1875 = vmatpush.bf16.msra.mxu0 %v2616_v23  ;;  %v879_v51 = vpop.f32.mrf.mxu0  ;;  %1901 = vmatpush.bf16.msra.mxu2 %v2744_v12  ;;  %v3055_v23 = vld [vmem:[#allocation8 + $0x370] sm:$0xf] }
  0xb5   :  { %v880_v56 = vadd.f32 %v879_v51, %v214_v55  ;;  %1913 = vmatpush.bf16.msra.mxu3 %v2816_v19  ;;  %v3056_v29 = vor.u32 %v3364_v24, %v3055_v23  ;;  %v3047_v55 = vld [vmem:[#allocation8 + $0x360] sm:$0xf]  ;;  %v3103_v12 = vld [vmem:[#allocation8 + $0x3d0] sm:$0xf]  ;;  %v2732_v19 = vor.u32 %v3281_v9, %v2729_v10  ;;  %v3024_v23 = vor.u32 %v3356_v16, %v3023_v15  ;;  %v3299_v9 = vld [vmem:[#allocation8 + $0x174] sm:$0xf] }
  0xb6   :  { %1888 = vmatpush.bf16.msra.mxu1 %v2680_v26  ;;  %v892_v2 = vpop.f32.mrf.mxu1  ;;  %v2879_v26 = vld [vmem:[#allocation8 + $0x210] sm:$0xf]  ;;  %v3095_v24 = vld [vmem:[#allocation8 + $0x3c0] sm:$0xf]  ;;  %v2801_v10 = vld [vmem:[#allocation8 + $0x178] sm:$0xf0] }
  0xb7   :  { %v893_v8 = vadd.f32 %v892_v2, %v880_v56  ;;  %v2880_v41 = vor.u32 %v3320_v27, %v2879_v26  ;;  %v3039_v56 = vld [vmem:[#allocation8 + $0x350] sm:$0xf]  ;;  %v2665_v2 = vld [vmem:[#allocation8 + $0x68] sm:$0xf0]  ;;  %v3374_v26 = vld [vmem:[#allocation8 + $0x3c4] sm:$0xf0] }
  0xb8   :  { %1920 = vmatpush.bf16.msrb.mxu0 %v2928_v25  ;;  %1946 = vmatpush.bf16.msrb.mxu2 %v3056_v29  ;;  %v2668_v14 = vor.u32 %v3265_v61, %v2665_v2  ;;  %v2649_v29 = vld [vmem:[#allocation8 + $0x48] sm:$0xf0]  ;;  %v3096_v31 = vor.u32 %v3374_v26, %v3095_v24  ;;  %v3370_v61 = vld [vmem:[#allocation8 + $0x3a4] sm:$0xf0]  ;;  %v2999_v2 = vld [vmem:[#allocation8 + $0x300] sm:$0xf] }
  0xb9   :  { %v1078_v17 = vmax.f32 %v893_v8, 0.0  ;;  %v2625_v15 = vld [vmem:[#allocation8 + $0x18] sm:$0xf0] }
  0xba   :  { %1933 = vmatpush.bf16.msrb.mxu1 %v2992_v32  ;;  %v905_v18 = vpop.f32.mrf.mxu2  ;;  %v2807_v32 = vld [vmem:[#allocation8 + $0x180] sm:$0xf] }
  0xbb   :  { %v906_v20 = vadd.f32 %v905_v18, %v215_v4  ;;  %v3595_v25 = vpack.c.bf16 %v1078_v17, %v1078_v17  ;;  %v2808_v38 = vor.u32 %v3302_v33, %v2807_v32  ;;  %v2740_v4 = vor.u32 %v3283_v53, %v2737_v54  ;;  %v3263_v17 = vld [vmem:[#allocation8 + $0x54] sm:$0xf]  ;;  %v2657_v18 = vld [vmem:[#allocation8 + $0x58] sm:$0xf0]  ;;  %v3277_v33 = vld [vmem:[#allocation8 + $0xc4] sm:$0xf] }
  0xbc   :  { %1921 = vmatpush.bf16.msrb.mxu0 %v2920_v36  ;;  %v881_v21 = vpop.f32.mrf.mxu0  ;;  %v918_v34 = vpop.f32.mrf.mxu3  ;;  %v3318_v36 = vld [vmem:[#allocation8 + $0x204] sm:$0xf0]  ;;  %v2660_v27 = vor.u32 %v3263_v17, %v2657_v18  ;;  %v216_v32 = vperm.slane %v3591_v37, 2  ;;  %v3257_v54 = vld [vmem:[#allocation8 + $0x24] sm:$0xf]  ;;  %v2804_v17 = vor.u32 %v3299_v9, %v2801_v10 }
  0xbd   :  { %1876 = vmatmul.bf16.vlgmr.msra.gmra.mxu0 %v3595_v25  ;;  %v919_v39 = vadd.f32 %v918_v34, %v906_v20  ;;  %1914 = vmatpush.bf16.msra.mxu3 %v2808_v38  ;;  %v2872_v58 = vor.u32 %v3318_v36, %v2871_v35  ;;  %v3104_v20 = vor.u32 %v3376_v13, %v3103_v12  ;;  %v3279_v21 = vld [vmem:[#allocation8 + $0xd4] sm:$0xf]  ;;  %v2713_v34 = vld [vmem:[#allocation8 + $0xc8] sm:$0xf0]  ;;  %v3015_v35 = vld [vmem:[#allocation8 + $0x320] sm:$0xf] }
  0xbe   :  { %1934 = vmatpush.bf16.msrb.mxu1 %v2984_v40  ;;  %v894_v40 = vpop.f32.mrf.mxu1  ;;  %v3354_v36 = vld [vmem:[#allocation8 + $0x324] sm:$0xf0]  ;;  %v3071_v18 = vld [vmem:[#allocation8 + $0x390] sm:$0xf]  ;;  %v2833_v9 = vld [vmem:[#allocation8 + $0x1b8] sm:$0xf0] }
  0xbf   :  { %v1079_v48 = vmax.f32 %v919_v39, 0.0  ;;  %v3259_v39 = vld [vmem:[#allocation8 + $0x34] sm:$0xf]  ;;  %v3016_v40 = vor.u32 %v3354_v36, %v3015_v35  ;;  %v3366_v35 = vld [vmem:[#allocation8 + $0x384] sm:$0xf0] }
  0xc0   :  { %1922 = vmatpush.bf16.msrb.mxu0 %v2912_v43  ;;  %v3362_v43 = vld [vmem:[#allocation8 + $0x364] sm:$0xf0]  ;;  %v2644_v53 = vor.u32 %v3259_v39, %v2641_v42  ;;  %v3269_v36 = vld [vmem:[#allocation8 + $0x84] sm:$0xf]  ;;  %v2865_v42 = vld [vmem:[#allocation8 + $0x1f8] sm:$0xf0] }
  0xc1   :  { %v3598_v57 = vpack.c.bf16 %v1079_v48, %v1079_v48  ;;  %v2705_v48 = vld [vmem:[#allocation8 + $0xb8] sm:$0xf0] }
  0xc2   :  { %1935 = vmatpush.bf16.msrb.mxu1 %v2976_v45  ;;  %v3048_v45 = vor.u32 %v3362_v43, %v3047_v55  ;;  %v907_v51 = vpop.f32.mrf.mxu2  ;;  %v2716_v55 = vor.u32 %v3277_v33, %v2713_v34  ;;  %v3087_v43 = vld [vmem:[#allocation8 + $0x3b0] sm:$0xf]  ;;  %v3063_v34 = vld [vmem:[#allocation8 + $0x380] sm:$0xf] }
  0xc3   :  { %1889 = vmatmul.bf16.vlgmr.msra.gmra.mxu1 %v3598_v57  ;;  %v3088_v46 = vor.u32 %v3372_v44, %v3087_v43 }
  0xc4   :  { %1923 = vmatpush.bf16.msrb.mxu0 %v2904_v52  ;;  %1947 = vmatpush.bf16.msrb.mxu2 %v3048_v45  ;;  %v3120_v52 = vor.u32 %v3380_v50, %v3119_v49  ;;  %v920_v8 = vpop.f32.mrf.mxu3  ;;  %v3007_v49 = vld [vmem:[#allocation8 + $0x310] sm:$0xf]  ;;  %v3352_v50 = vld [vmem:[#allocation8 + $0x314] sm:$0xf0] }
  0xc6   :  { %1936 = vmatpush.bf16.msrb.mxu1 %v2968_v59  ;;  %v3360_v59 = vld [vmem:[#allocation8 + $0x354] sm:$0xf0]  ;;  %1959 = vmatpush.bf16.msrb.mxu3 %v3120_v52  ;;  %v217_v52 = vperm.slane %v3591_v37, 3 }
  0xc7   :  { %v3040_v63 = vor.u32 %v3360_v59, %v3039_v56  ;;  %v3008_v56 = vor.u32 %v3352_v50, %v3007_v49  ;;  %v2708_v59 = vor.u32 %v3275_v47, %v2705_v48  ;;  %v3313_v49 = vld [vmem:[#allocation8 + $0x1e4] sm:$0xf]  ;;  %v2857_v50 = vld [vmem:[#allocation8 + $0x1e8] sm:$0xf0] }
  0xc8   :  { %1924 = vmatpush.bf16.msrb.mxu0 %v2896_v5  ;;  %v3112_v5 = vor.u32 %v3378_v1, %v3111_v0  ;;  %v3273_v0 = vld [vmem:[#allocation8 + $0xa4] sm:$0xf]  ;;  %v2697_v1 = vld [vmem:[#allocation8 + $0xa8] sm:$0xf0] }
  0xc9   :  { %1948 = vmatpush.bf16.msrb.mxu2 %v3040_v63  ;;  %v2700_v16 = vor.u32 %v3273_v0, %v2697_v1  ;;  %v2841_v0 = vld [vmem:[#allocation8 + $0x1c8] sm:$0xf0] }
  0xca   :  { %1937 = vmatpush.bf16.msrb.mxu1 %v2960_v11  ;;  %v3032_v11 = vor.u32 %v3358_v7, %v3031_v6  ;;  %1960 = vmatpush.bf16.msrb.mxu3 %v3112_v5 }
  0xcc   :  { %1925 = vmatpush.bf16.msrb.mxu0 %v2888_v22  ;;  %v2721_v22 = vld [vmem:[#allocation8 + $0xd8] sm:$0xf0] }
  0xcd   :  { %1949 = vmatpush.bf16.msrb.mxu2 %v3032_v11  ;;  %v2724_v30 = vor.u32 %v3279_v21, %v2721_v22  ;;  %v3271_v21 = vld [vmem:[#allocation8 + $0x94] sm:$0xf]  ;;  %v2689_v22 = vld [vmem:[#allocation8 + $0x98] sm:$0xf0] }
  0xce   :  { %1938 = vmatpush.bf16.msrb.mxu1 %v2952_v28  ;;  %v3261_v28 = vld [vmem:[#allocation8 + $0x44] sm:$0xf]  ;;  %1961 = vmatpush.bf16.msrb.mxu3 %v3104_v20  ;;  %v3368_v20 = vld [vmem:[#allocation8 + $0x394] sm:$0xf0] }
  0xcf   :  { %v2652_v38 = vor.u32 %v3261_v28, %v2649_v29  ;;  %v3072_v24 = vor.u32 %v3368_v20, %v3071_v18  ;;  %v3297_v28 = vld [vmem:[#allocation8 + $0x164] sm:$0xf]  ;;  %v2793_v29 = vld [vmem:[#allocation8 + $0x168] sm:$0xf0] }
  0xd0   :  { %1926 = vmatpush.bf16.msrb.mxu0 %v2880_v41  ;;  %v2796_v33 = vor.u32 %v3297_v28, %v2793_v29  ;;  %v3305_v20 = vld [vmem:[#allocation8 + $0x1a4] sm:$0xf] }
  0xd1   :  { %1950 = vmatpush.bf16.msrb.mxu2 %v3024_v23  ;;  %v3329_v29 = vld [vmem:[#allocation8 + $0x264] sm:$0xf] }
  0xd2   :  { %1939 = vmatpush.bf16.msrb.mxu1 %v2944_v3  ;;  %1962 = vmatpush.bf16.msrb.mxu3 %v3096_v31  ;;  %v2617_v31 = vld [vmem:[#allocation8 + $0x8] sm:$0xf0] }
  0xd4   :  { %1927 = vmatpush.bf16.msrb.mxu0 %v2872_v58  ;;  %v931_v41 = vpop.f32.mrf.mxu0  ;;  %v2633_v58 = vld [vmem:[#allocation8 + $0x28] sm:$0xf0] }
  0xd5   :  { %v932_v3 = vadd.f32 %v931_v41, %v216_v32  ;;  %1951 = vmatpush.bf16.msrb.mxu2 %v3016_v40  ;;  %v2636_v7 = vor.u32 %v3257_v54, %v2633_v58  ;;  %v2692_v32 = vor.u32 %v3271_v21, %v2689_v22  ;;  %v3064_v40 = vor.u32 %v3366_v35, %v3063_v34  ;;  %v3315_v41 = vld [vmem:[#allocation8 + $0x1f4] sm:$0xf]  ;;  %v2849_v58 = vld [vmem:[#allocation8 + $0x1d8] sm:$0xf0]  ;;  %v2825_v21 = vld [vmem:[#allocation8 + $0x1a8] sm:$0xf0] }
  0xd6   :  { %1940 = vmatpush.bf16.msrb.mxu1 %v2936_v62  ;;  %v944_v45 = vpop.f32.mrf.mxu1  ;;  %1963 = vmatpush.bf16.msrb.mxu3 %v3088_v46  ;;  %v2868_v44 = vor.u32 %v3315_v41, %v2865_v42  ;;  %v219_v22 = vperm.slane %v3591_v37, 5  ;;  %v3303_v34 = vld [vmem:[#allocation8 + $0x194] sm:$0xf]  ;;  %v2817_v35 = vld [vmem:[#allocation8 + $0x198] sm:$0xf0] }
  0xd7   :  { %v945_v51 = vadd.f32 %v944_v45, %v932_v3  ;;  %v3295_v3 = vld [vmem:[#allocation8 + $0x154] sm:$0xf]  ;;  %v2785_v45 = vld [vmem:[#allocation8 + $0x158] sm:$0xf0]  ;;  %v2820_v41 = vor.u32 %v3303_v34, %v2817_v35 }
  0xd8   :  { %1972 = vmatpush.bf16.msra.mxu0 %v2676_v60  ;;  %v3079_v60 = vld [vmem:[#allocation8 + $0x3a0] sm:$0xf]  ;;  %v2788_v48 = vor.u32 %v3295_v3, %v2785_v45  ;;  %v2993_v3 = vld [vmem:[#allocation8 + $0x2f8] sm:$0xf0]  ;;  %v3327_v45 = vld [vmem:[#allocation8 + $0x254] sm:$0xf] }
  0xd9   :  { %v1080_v62 = vmax.f32 %v945_v51, 0.0  ;;  %1952 = vmatpush.bf16.msrb.mxu2 %v3008_v56  ;;  %v3080_v63 = vor.u32 %v3370_v61, %v3079_v60  ;;  %v2860_v51 = vor.u32 %v3313_v49, %v2857_v50  ;;  %v3311_v56 = vld [vmem:[#allocation8 + $0x1d4] sm:$0xf]  ;;  %v2769_v61 = vld [vmem:[#allocation8 + $0x138] sm:$0xf0] }
  0xda   :  { %1985 = vmatpush.bf16.msra.mxu1 %v2740_v4  ;;  %v3350_v4 = vld [vmem:[#allocation8 + $0x304] sm:$0xf0]  ;;  %v957_v6 = vpop.f32.mrf.mxu2  ;;  %v3291_v60 = vld [vmem:[#allocation8 + $0x134] sm:$0xf] }
  0xdb   :  { %v3603_v5 = vpack.c.bf16 %v1080_v62, %v1080_v62  ;;  %v3000_v8 = vor.u32 %v3350_v4, %v2999_v2  ;;  %v958_v11 = vadd.f32 %v957_v6, %v217_v52  ;;  %1964 = vmatpush.bf16.msrb.mxu3 %v3080_v63  ;;  %v3293_v52 = vld [vmem:[#allocation8 + $0x144] sm:$0xf]  ;;  %v2772_v62 = vor.u32 %v3291_v60, %v2769_v61  ;;  %v2761_v6 = vld [vmem:[#allocation8 + $0x128] sm:$0xf0] }
  0xdc   :  { %1973 = vmatpush.bf16.msra.mxu0 %v2668_v14  ;;  %v970_v12 = vpop.f32.mrf.mxu3  ;;  %v933_v13 = vpop.f32.mrf.mxu0  ;;  %v3255_v14 = vld [vmem:[#allocation8 + $0x14] sm:$0xf]  ;;  %v3309_v63 = vld [vmem:[#allocation8 + $0x1c4] sm:$0xf]  ;;  %v218_v2 = vperm.slane %v3591_v37, 4 }
  0xdd   :  { %1902 = vmatmul.bf16.vlgmr.msra.gmra.mxu2 %v3603_v5  ;;  %v971_v23 = vadd.f32 %v970_v12, %v958_v11  ;;  %v2628_v26 = vor.u32 %v3255_v14, %v2625_v15  ;;  %v2844_v1 = vor.u32 %v3309_v63, %v2841_v0  ;;  %v3289_v4 = vld [vmem:[#allocation8 + $0x124] sm:$0xf]  ;;  %v3287_v14 = vld [vmem:[#allocation8 + $0x114] sm:$0xf]  ;;  %v2753_v15 = vld [vmem:[#allocation8 + $0x118] sm:$0xf0] }
  0xde   :  { %1986 = vmatpush.bf16.msra.mxu1 %v2732_v19  ;;  %v946_v19 = vpop.f32.mrf.mxu1  ;;  %1953 = vmatpush.bf16.msrb.mxu2 %v3000_v8  ;;  %v3307_v8 = vld [vmem:[#allocation8 + $0x1b4] sm:$0xf]  ;;  %v2905_v60 = vld [vmem:[#allocation8 + $0x248] sm:$0xf0] }
  0xdf   :  { %1965 = vmatpush.bf16.msrb.mxu3 %v3072_v24  ;;  %v2836_v11 = vor.u32 %v3307_v8, %v2833_v9  ;;  %v2929_v19 = vld [vmem:[#allocation8 + $0x278] sm:$0xf0]  ;;  %v3343_v0 = vld [vmem:[#allocation8 + $0x2d4] sm:$0xf]  ;;  %v3341_v8 = vld [vmem:[#allocation8 + $0x2c4] sm:$0xf] }
  0xe0   :  { %1974 = vmatpush.bf16.msra.mxu0 %v2660_v27  ;;  %v3253_v27 = vld [vmem:[#allocation8 + $0x4] sm:$0xf]  ;;  %v2969_v9 = vld [vmem:[#allocation8 + $0x2c8] sm:$0xf0] }
  0xe1   :  { %v2620_v43 = vor.u32 %v3253_v27, %v2617_v31  ;;  %v2745_v27 = vld [vmem:[#allocation8 + $0x108] sm:$0xf0] }
  0xe2   :  { %1987 = vmatpush.bf16.msra.mxu1 %v2724_v30  ;;  %1998 = vmatpush.bf16.msra.mxu2 %v2804_v17  ;;  %v1081_v30 = vmax.f32 %v971_v23, 0.0  ;;  %v2756_v17 = vor.u32 %v3287_v14, %v2753_v15  ;;  %v2828_v23 = vor.u32 %v3305_v20, %v2825_v21  ;;  %v3339_v15 = vld [vmem:[#allocation8 + $0x2b4] sm:$0xf] }
  0xe3   :  { %1966 = vmatpush.bf16.msrb.mxu3 %v3064_v40 }
  0xe4   :  { %1975 = vmatpush.bf16.msra.mxu0 %v2652_v38  ;;  %v2681_v38 = vld [vmem:[#allocation8 + $0x88] sm:$0xf0]  ;;  %v3606_v39 = vpack.c.bf16 %v1081_v30, %v1081_v30  ;;  %v972_v46 = vpop.f32.mrf.mxu3 }
  0xe5   :  { %v2684_v47 = vor.u32 %v3269_v36, %v2681_v38  ;;  %v2913_v46 = vld [vmem:[#allocation8 + $0x258] sm:$0xf0] }
  0xe6   :  { %1988 = vmatpush.bf16.msra.mxu1 %v2716_v55  ;;  %v959_v55 = vpop.f32.mrf.mxu2  ;;  %1999 = vmatpush.bf16.msra.mxu2 %v2796_v33  ;;  %v2921_v33 = vld [vmem:[#allocation8 + $0x268] sm:$0xf0] }
  0xe7   :  { %1915 = vmatmul.bf16.vlgmr.msra.gmra.mxu3 %v3606_v39 }
  0xe8   :  { %1976 = vmatpush.bf16.msra.mxu0 %v2644_v53  ;;  %2011 = vmatpush.bf16.msra.mxu3 %v2868_v44  ;;  %v2777_v53 = vld [vmem:[#allocation8 + $0x148] sm:$0xf0]  ;;  %v3347_v44 = vld [vmem:[#allocation8 + $0x2f4] sm:$0xf] }
  0xe9   :  { %v2780_v54 = vor.u32 %v3293_v52, %v2777_v53  ;;  %v2916_v53 = vor.u32 %v3327_v45, %v2913_v46 }
  0xea   :  { %1989 = vmatpush.bf16.msra.mxu1 %v2708_v59  ;;  %2000 = vmatpush.bf16.msra.mxu2 %v2788_v48  ;;  %v2852_v59 = vor.u32 %v3311_v56, %v2849_v58  ;;  %v2809_v48 = vld [vmem:[#allocation8 + $0x188] sm:$0xf0] }
  0xeb   :  { %v2985_v56 = vld [vmem:[#allocation8 + $0x2e8] sm:$0xf0] }
  0xec   :  { %1977 = vmatpush.bf16.msra.mxu0 %v2636_v7  ;;  %2012 = vmatpush.bf16.msra.mxu3 %v2860_v51  ;;  %v2764_v7 = vor.u32 %v3289_v4, %v2761_v6  ;;  %v2996_v51 = vor.u32 %v3347_v44, %v2993_v3  ;;  %v2897_v4 = vld [vmem:[#allocation8 + $0x238] sm:$0xf0] }
  0xee   :  { %1990 = vmatpush.bf16.msra.mxu1 %v2700_v16  ;;  %2001 = vmatpush.bf16.msra.mxu2 %v2780_v54  ;;  %v3331_v16 = vld [vmem:[#allocation8 + $0x274] sm:$0xf]  ;;  %v3345_v54 = vld [vmem:[#allocation8 + $0x2e4] sm:$0xf] }
  0xef   :  { %v2932_v28 = vor.u32 %v3331_v16, %v2929_v19  ;;  %v2961_v16 = vld [vmem:[#allocation8 + $0x2b8] sm:$0xf0] }
  0xf0   :  { %1978 = vmatpush.bf16.msra.mxu0 %v2628_v26  ;;  %2013 = vmatpush.bf16.msra.mxu3 %v2852_v59  ;;  %v3285_v26 = vld [vmem:[#allocation8 + $0x104] sm:$0xf]  ;;  %v2964_v20 = vor.u32 %v3339_v15, %v2961_v16  ;;  %v3017_v16 = vld [vmem:[#allocation8 + $0x328] sm:$0xf0] }
  0xf1   :  { %v2748_v30 = vor.u32 %v3285_v26, %v2745_v27  ;;  %v3325_v59 = vld [vmem:[#allocation8 + $0x244] sm:$0xf]  ;;  %v2953_v26 = vld [vmem:[#allocation8 + $0x2a8] sm:$0xf0] }
  0xf2   :  { %1991 = vmatpush.bf16.msra.mxu1 %v2692_v32  ;;  %2002 = vmatpush.bf16.msra.mxu2 %v2772_v62  ;;  %v2988_v62 = vor.u32 %v3345_v54, %v2985_v56  ;;  %v2908_v63 = vor.u32 %v3325_v59, %v2905_v60  ;;  %v3317_v27 = vld [vmem:[#allocation8 + $0x204] sm:$0xf]  ;;  %v3041_v54 = vld [vmem:[#allocation8 + $0x358] sm:$0xf0] }
  0xf3   :  { %v3353_v15 = vld [vmem:[#allocation8 + $0x324] sm:$0xf] }
  0xf4   :  { %1979 = vmatpush.bf16.msra.mxu0 %v2620_v43  ;;  %v983_v10 = vpop.f32.mrf.mxu0  ;;  %2014 = vmatpush.bf16.msra.mxu3 %v2844_v1  ;;  %v2924_v43 = vor.u32 %v3329_v29, %v2921_v33  ;;  %v2977_v1 = vld [vmem:[#allocation8 + $0x2d8] sm:$0xf0]  ;;  %v3363_v29 = vld [vmem:[#allocation8 + $0x374] sm:$0xf] }
  0xf5   :  { %v984_v12 = vadd.f32 %v983_v10, %v218_v2  ;;  %v3323_v2 = vld [vmem:[#allocation8 + $0x234] sm:$0xf]  ;;  %v2980_v6 = vor.u32 %v3343_v0, %v2977_v1  ;;  %v3321_v10 = vld [vmem:[#allocation8 + $0x224] sm:$0xf] }
  0xf6   :  { %1992 = vmatpush.bf16.msra.mxu1 %v2684_v47  ;;  %v996_v13 = vpop.f32.mrf.mxu1  ;;  %2003 = vmatpush.bf16.msra.mxu2 %v2764_v7  ;;  %v3301_v47 = vld [vmem:[#allocation8 + $0x184] sm:$0xf]  ;;  %v2900_v7 = vor.u32 %v3323_v2, %v2897_v4  ;;  %v3033_v2 = vld [vmem:[#allocation8 + $0x348] sm:$0xf0] }
  0xf7   :  { %v997_v18 = vadd.f32 %v996_v13, %v984_v12  ;;  %v2812_v50 = vor.u32 %v3301_v47, %v2809_v48  ;;  %v2972_v12 = vor.u32 %v3341_v8, %v2969_v9  ;;  %v220_v13 = vperm.slane %v3591_v37, 6  ;;  %v2937_v47 = vld [vmem:[#allocation8 + $0x288] sm:$0xf0]  ;;  %v3357_v1 = vld [vmem:[#allocation8 + $0x344] sm:$0xf] }
  0xf8   :  { %2015 = vmatpush.bf16.msra.mxu3 %v2836_v11  ;;  %v2889_v11 = vld [vmem:[#allocation8 + $0x228] sm:$0xf0]  ;;  %v3105_v8 = vld [vmem:[#allocation8 + $0x3d8] sm:$0xf0]  ;;  %v3355_v9 = vld [vmem:[#allocation8 + $0x334] sm:$0xf] }
  0xf9   :  { %v1082_v24 = vmax.f32 %v997_v18, 0.0  ;;  %v2892_v14 = vor.u32 %v3321_v10, %v2889_v11  ;;  %v2881_v18 = vld [vmem:[#allocation8 + $0x218] sm:$0xf0] }
  0xfa   :  { %2004 = vmatpush.bf16.msra.mxu2 %v2756_v17  ;;  %v1009_v32 = vpop.f32.mrf.mxu2  ;;  %v3319_v17 = vld [vmem:[#allocation8 + $0x214] sm:$0xf]  ;;  %v3025_v10 = vld [vmem:[#allocation8 + $0x338] sm:$0xf0] }
  0xfb   :  { %v3611_v31 = vpack.c.bf16 %v1082_v24, %v1082_v24  ;;  %v1010_v36 = vadd.f32 %v1009_v32, %v219_v22  ;;  %v3337_v24 = vld [vmem:[#allocation8 + $0x2a4] sm:$0xf]  ;;  %v221_v32 = vperm.slane %v3591_v37, 7 }
  0xfc   :  { %v1022_v38 = vpop.f32.mrf.mxu3  ;;  %v985_v40 = vpop.f32.mrf.mxu0  ;;  %2016 = vmatpush.bf16.msra.mxu3 %v2828_v23  ;;  %v2884_v23 = vor.u32 %v3319_v17, %v2881_v18  ;;  %v2956_v33 = vor.u32 %v3337_v24, %v2953_v26  ;;  %v3333_v37 = vld [vmem:[#allocation8 + $0x284] sm:$0xf]  ;;  %v3020_v18 = vor.u32 %v3353_v15, %v3017_v16  ;;  %v3081_v26 = vld [vmem:[#allocation8 + $0x3a8] sm:$0xf0] }
  0xfd   :  { %1928 = vmatmul.bf16.vlgmr.msrb.gmra.mxu0 %v3611_v31  ;;  %v1023_v55 = vadd.f32 %v1022_v38, %v1010_v36  ;;  %v3335_v36 = vld [vmem:[#allocation8 + $0x294] sm:$0xf]  ;;  %v2945_v38 = vld [vmem:[#allocation8 + $0x298] sm:$0xf0]  ;;  %v3369_v24 = vld [vmem:[#allocation8 + $0x3a4] sm:$0xf] }
  0xfe   :  { %v998_v42 = vpop.f32.mrf.mxu1  ;;  %2005 = vmatpush.bf16.msra.mxu2 %v2748_v30  ;;  %2024 = vmatpush.bf16.msrb.mxu0 %v2932_v28  ;;  %v3057_v30 = vld [vmem:[#allocation8 + $0x378] sm:$0xf0]  ;;  %v2948_v45 = vor.u32 %v3335_v36, %v2945_v38  ;;  %v1222_v36 = vld [vmem:[%s3643_s4] sm:$0x3]  ;;  %s3528_s4 = smov [#allocation10]  }
  0xff   :  { %v1083_v49 = vmax.f32 %v1023_v55, 0.0  ;;  %v3060_v40 = vor.u32 %v3363_v29, %v3057_v30  ;;  %v3361_v55 = vld [vmem:[#allocation8 + $0x364] sm:$0xf]  ;;  %v3367_v29 = vld [vmem:[#allocation8 + $0x394] sm:$0xf]  ;;  %s2087_s15 = sshll.u32 %s3528_s4, 4  ;;  %s2088_s15 = int_to_ptr.vmem [resolvable:$true] %s2087_s15 }
 0x100   :  { %2017 = vmatpush.bf16.msra.mxu3 %v2820_v41  ;;  %v3073_v30 = vld [vmem:[#allocation8 + $0x398] sm:$0xf0] }
 0x101   :  { %v3614_v52 = vpack.c.bf16 %v1083_v49, %v1083_v49 }
 0x102   :  { %2025 = vmatpush.bf16.msrb.mxu0 %v2924_v43  ;;  %v1011_v58 = vpop.f32.mrf.mxu2  ;;  %v3049_v43 = vld [vmem:[#allocation8 + $0x368] sm:$0xf0] }
 0x103   :  { %1941 = vmatmul.bf16.vlgmr.msrb.gmra.mxu1 %v3614_v52  ;;  %v3052_v49 = vor.u32 %v3361_v55, %v3049_v43  ;;  %v2940_v58 = vor.u32 %v3333_v37, %v2937_v47 }
 0x104   :  { %v1024_v61 = vpop.f32.mrf.mxu3  ;;  %2018 = vmatpush.bf16.msra.mxu3 %v2812_v50  ;;  %2037 = vmatpush.bf16.msrb.mxu1 %v2996_v51  ;;  %v3379_v50 = vld [vmem:[#allocation8 + $0x3f4] sm:$0xf]  ;;  %v3121_v51 = vld [vmem:[#allocation8 + $0x3f8] sm:$0xf0] }
 0x105   :  { %v3124_v59 = vor.u32 %v3379_v50, %v3121_v51 }
 0x106   :  { %2026 = vmatpush.bf16.msrb.mxu0 %v2916_v53  ;;  %v3359_v53 = vld [vmem:[#allocation8 + $0x354] sm:$0xf] }
 0x107   :  { %v3044_v61 = vor.u32 %v3359_v53, %v3041_v54 }
 0x108   :  { %2038 = vmatpush.bf16.msrb.mxu1 %v2988_v62  ;;  %v3377_v62 = vld [vmem:[#allocation8 + $0x3e4] sm:$0xf] }
 0x10a   :  { %2027 = vmatpush.bf16.msrb.mxu0 %v2908_v63  ;;  %v3113_v63 = vld [vmem:[#allocation8 + $0x3e8] sm:$0xf0] }
 0x10c   :  { %2039 = vmatpush.bf16.msrb.mxu1 %v2980_v6  ;;  %v3116_v6 = vor.u32 %v3377_v62, %v3113_v63 }
 0x10d   :  { %1980 = vmatmul.bf16.vlgmr.msra.gmra.mxu0 %v3595_v25  ;;  %v2873_v25 = vld [vmem:[#allocation8 + $0x208] sm:$0xf0] }
 0x10e   :  { %2028 = vmatpush.bf16.msrb.mxu0 %v2900_v7  ;;  %v2876_v35 = vor.u32 %v3317_v27, %v2873_v25  ;;  %v3036_v7 = vor.u32 %v3357_v1, %v3033_v2  ;;  %v3349_v27 = vld [vmem:[#allocation8 + $0x304] sm:$0xf]  ;;  %v3001_v25 = vld [vmem:[#allocation8 + $0x308] sm:$0xf0] }
 0x110   :  { %2040 = vmatpush.bf16.msrb.mxu1 %v2972_v12  ;;  %v3028_v12 = vor.u32 %v3355_v9, %v3025_v10 }
 0x112   :  { %2029 = vmatpush.bf16.msrb.mxu0 %v2892_v14  ;;  %v3097_v14 = vld [vmem:[#allocation8 + $0x3c8] sm:$0xf0] }
 0x113   :  { %1993 = vmatmul.bf16.vlgmr.msra.gmra.mxu1 %v3598_v57 }
 0x114   :  { %v1035_v19 = vpop.f32.mrf.mxu0  ;;  %2041 = vmatpush.bf16.msrb.mxu1 %v2964_v20  ;;  %v3089_v20 = vld [vmem:[#allocation8 + $0x3b8] sm:$0xf0] }
 0x115   :  { %v1036_v21 = vadd.f32 %v1035_v19, %v220_v13  ;;  %v3373_v13 = vld [vmem:[#allocation8 + $0x3c4] sm:$0xf]  ;;  %v3371_v19 = vld [vmem:[#allocation8 + $0x3b4] sm:$0xf] }
 0x116   :  { %v1048_v22 = vpop.f32.mrf.mxu1  ;;  %2030 = vmatpush.bf16.msrb.mxu0 %v2884_v23  ;;  %v3100_v17 = vor.u32 %v3373_v13, %v3097_v14 }
 0x117   :  { %v1049_v28 = vadd.f32 %v1048_v22, %v1036_v21  ;;  %v3351_v21 = vld [vmem:[#allocation8 + $0x314] sm:$0xf]  ;;  %v3092_v22 = vor.u32 %v3371_v19, %v3089_v20 }
 0x118   :  { %2042 = vmatpush.bf16.msrb.mxu1 %v2956_v33  ;;  %v3365_v33 = vld [vmem:[#allocation8 + $0x384] sm:$0xf] }
 0x119   :  { %v1084_v34 = vmax.f32 %v1049_v28, 0.0  ;;  %v3084_v28 = vor.u32 %v3369_v24, %v3081_v26 }
 0x11a   :  { %v1061_v42 = vpop.f32.mrf.mxu2  ;;  %2031 = vmatpush.bf16.msrb.mxu0 %v2876_v35 }
 0x11b   :  { %v3621_v41 = vpack.c.bf16 %v1084_v34, %v1084_v34  ;;  %v1062_v44 = vadd.f32 %v1061_v42, %v221_v32  ;;  %v3076_v32 = vor.u32 %v3367_v29, %v3073_v30  ;;  %v3065_v34 = vld [vmem:[#allocation8 + $0x388] sm:$0xf0] }
 0x11c   :  { %v1074_v3 = vpop.f32.mrf.mxu3  ;;  %v1037_v57 = vpop.f32.mrf.mxu0  ;;  %2043 = vmatpush.bf16.msrb.mxu1 %v2948_v45  ;;  %v3068_v35 = vor.u32 %v3365_v33, %v3065_v34 }
 0x11d   :  { %1954 = vmatmul.bf16.vlgmr.msrb.gmra.mxu2 %v3621_v41  ;;  %v1075_v48 = vadd.f32 %v1074_v3, %v1062_v44  ;;  %2032 = vmatmul.bf16.vlgmr.msrb.gmra.mxu0 %v3611_v31  ;;  %v3375_v31 = vld [vmem:[#allocation8 + $0x3d4] sm:$0xf] }
 0x11e   :  { %v1050_v46 = vpop.f32.mrf.mxu1  ;;  %2050 = vmatpush.bf16.msrb.mxu2 %v3060_v40  ;;  %v3108_v11 = vor.u32 %v3375_v31, %v3105_v8 }
 0x11f   :  { %v1085_v56 = vmax.f32 %v1075_v48, 0.0 }
 0x120   :  { %2044 = vmatpush.bf16.msrb.mxu1 %v2940_v58 }
 0x121   :  { %v3625_v60 = vpack.c.bf16 %v1085_v56, %v1085_v56 }
 0x122   :  { %2051 = vmatpush.bf16.msrb.mxu2 %v3052_v49  ;;  %v1063_v0 = vpop.f32.mrf.mxu2 }
 0x123   :  { %1967 = vmatmul.bf16.vlgmr.msrb.gmra.mxu3 %v3625_v60  ;;  %2045 = vmatmul.bf16.vlgmr.msrb.gmra.mxu1 %v3614_v52  ;;  %v3009_v52 = vld [vmem:[#allocation8 + $0x318] sm:$0xf0] }
 0x124   :  { %v1076_v4 = vpop.f32.mrf.mxu3  ;;  %2063 = vmatpush.bf16.msrb.mxu3 %v3124_v59  ;;  %v3012_v23 = vor.u32 %v3351_v21, %v3009_v52 }
 0x126   :  { %2052 = vmatpush.bf16.msrb.mxu2 %v3044_v61 }
 0x128   :  { %2064 = vmatpush.bf16.msrb.mxu3 %v3116_v6 }
 0x12a   :  { %2053 = vmatpush.bf16.msrb.mxu2 %v3036_v7  ;;  %v3390_v7 = vld [vmem:[#allocation2] sm:$0xff] }
 0x12c   :  { %2065 = vmatpush.bf16.msrb.mxu3 %v3108_v11  ;;  %v1225_v11 = vperm.slane %v1222_v36, 1 }
 0x12d   :  { %2006 = vmatmul.bf16.vlgmr.msra.gmra.mxu2 %v3603_v5  ;;  %v3004_v5 = vor.u32 %v3349_v27, %v3001_v25  ;;  %v3391_v27 = vld [vmem:[#allocation2 + $0x8] sm:$0xff] }
 0x12e   :  { %2054 = vmatpush.bf16.msrb.mxu2 %v3028_v12 }
 0x130   :  { %2066 = vmatpush.bf16.msrb.mxu3 %v3100_v17 }
 0x132   :  { %2055 = vmatpush.bf16.msrb.mxu2 %v3020_v18 }
 0x133   :  { %2019 = vmatmul.bf16.vlgmr.msra.gmra.mxu3 %v3606_v39  ;;  %v1224_v39 = vperm.slane %v1222_v36, 0 }
 0x134   :  { %2067 = vmatpush.bf16.msrb.mxu3 %v3092_v22 }
 0x136   :  { %2056 = vmatpush.bf16.msrb.mxu2 %v3012_v23 }
 0x138   :  { %2068 = vmatpush.bf16.msrb.mxu3 %v3084_v28 }
 0x13a   :  { %2057 = vmatpush.bf16.msrb.mxu2 %v3004_v5  ;;  %v1877_v38 = vpop.f32.mrf.mxu0 }
 0x13b   :  { %v1878_v40 = vadd.f32 %v1877_v38, %v1224_v39 }
 0x13c   :  { %2069 = vmatpush.bf16.msrb.mxu3 %v3076_v32 }
 0x13d   :  { %2058 = vmatmul.bf16.vlgmr.msrb.gmra.mxu2 %v3621_v41 }
 0x140   :  { %2070 = vmatpush.bf16.msrb.mxu3 %v3068_v35  ;;  %v1890_v42 = vpop.f32.mrf.mxu1 }
 0x141   :  { %v1891_v55 = vadd.f32 %v1890_v42, %v1878_v40 }
 0x142   :  { %v1879_v43 = vpop.f32.mrf.mxu0 }
 0x143   :  { %2071 = vmatmul.bf16.vlgmr.msrb.gmra.mxu3 %v3625_v60 }
 0x148   :  { %v1892_v44 = vpop.f32.mrf.mxu1 }
 0x160   :  { %v1903_v3 = vpop.f32.mrf.mxu2 }
 0x161   :  { %v1904_v56 = vadd.f32 %v1903_v3, %v1891_v55 }
 0x168   :  { %v1905_v45 = vpop.f32.mrf.mxu2 }
 0x16a   :  { %v1916_v57 = vpop.f32.mrf.mxu3 }
 0x16b   :  { %v1917_v58 = vadd.f32 %v1916_v57, %v1904_v56 }
 0x172   :  { %v1918_v46 = vpop.f32.mrf.mxu3 }
 0x17a   :  { %v1929_v41 = vpop.f32.mrf.mxu0 }
 0x17b   :  { %v1930_v60 = vadd.f32 %v1929_v41, %v1917_v58 }
 0x180   :  { %v1942_v37 = vpop.f32.mrf.mxu1 }
 0x181   :  { %v1943_v61 = vadd.f32 %v1942_v37, %v1930_v60 }
 0x182   :  { %v1931_v47 = vpop.f32.mrf.mxu0 }
 0x188   :  { %v1944_v48 = vpop.f32.mrf.mxu1 }
 0x18a   :  { %v1981_v49 = vpop.f32.mrf.mxu0 }
 0x18b   :  { %v1982_v12 = vadd.f32 %v1981_v49, %v1225_v11 }
 0x190   :  { %v1994_v50 = vpop.f32.mrf.mxu1 }
 0x191   :  { %v1995_v14 = vadd.f32 %v1994_v50, %v1982_v12 }
 0x192   :  { %v1983_v51 = vpop.f32.mrf.mxu0 }
 0x198   :  { %v1996_v53 = vpop.f32.mrf.mxu1 }
 0x19a   :  { %v2033_v54 = vpop.f32.mrf.mxu0 }
 0x1a0   :  { %v1955_v59 = vpop.f32.mrf.mxu2  ;;  %v2046_v62 = vpop.f32.mrf.mxu1 }
 0x1a1   :  { %v1956_v0 = vadd.f32 %v1955_v59, %v1943_v61 }
 0x1a2   :  { %v2035_v63 = vpop.f32.mrf.mxu0 }
 0x1a6   :  { %v1968_v1 = vpop.f32.mrf.mxu3 }
 0x1a7   :  { %v1969_v2 = vadd.f32 %v1968_v1, %v1956_v0 }
 0x1a8   :  { %v1957_v4 = vpop.f32.mrf.mxu2  ;;  %v2048_v8 = vpop.f32.mrf.mxu1 }
 0x1a9   :  { %v2076_v6 = vmax.f32 %v1969_v2, 0.0 }
 0x1ab   :  { %v2078_v31 = vadd.f32 %v3390_v7, %v2076_v6 }
 0x1ad   :  { %2080 = vst [vmem:[#allocation10] sm:$0xff] %v2078_v31 }
 0x1ae   :  { %v1970_v9 = vpop.f32.mrf.mxu3 }
 0x1b0   :  { %v2007_v10 = vpop.f32.mrf.mxu2 }
 0x1b1   :  { %v2008_v16 = vadd.f32 %v2007_v10, %v1995_v14 }
 0x1b6   :  { %v2020_v13 = vpop.f32.mrf.mxu3 }
 0x1b7   :  { %v2021_v17 = vadd.f32 %v2020_v13, %v2008_v16 }
 0x1b8   :  { %v2009_v15 = vpop.f32.mrf.mxu2 }
 0x1b9   :  { %v2034_v19 = vadd.f32 %v2033_v54, %v2021_v17 }
 0x1bb   :  { %v2047_v21 = vadd.f32 %v2046_v62, %v2034_v19 }
 0x1be   :  { %v2022_v18 = vpop.f32.mrf.mxu3 }
 0x1c0   :  { %v2059_v20 = vpop.f32.mrf.mxu2 }
 0x1c1   :  { %v2060_v52 = vadd.f32 %v2059_v20, %v2047_v21 }
 0x1c6   :  { %v2072_v22 = vpop.f32.mrf.mxu3 }
 0x1c7   :  { %v2073_v23 = vadd.f32 %v2072_v22, %v2060_v52 }
 0x1c8   :  { %v2061_v24 = vpop.f32.mrf.mxu2 }
 0x1c9   :  { %v2077_v26 = vmax.f32 %v2073_v23, 0.0 }
 0x1cb   :  { %v2079_v25 = vadd.f32 %v3391_v27, %v2077_v26 }
 0x1cd   :  { %2081 = vst [vmem:[#allocation10 + $0x8] sm:$0xff] %v2079_v25 }
 0x1ce   :  { %v2074_v28 = vpop.f32.mrf.mxu3  ;;  %2092 = dma.vmem_to_hbm [thread:$0]  %s2088_s15, 256, %s2090_s18, [#allocation4]  }
 0x1cf   :  { %3518 = dma.done.wait [#allocation4], 256  }
 0x1d0   :  { %3519 = vsyncadd [#allocation4], 4294967040 }
 0x1d1   :  { %2097 = vsyncpa [#allocation3], 1 }
 0x1d2   :  { %2098 = vsyncpa [#allocation6], 1 }
 0x1d3   :  { %2099 = vsyncpa [#allocation9], 1 }
 0x1d4   :  { %2100 = vsyncpa [#allocation4], 1 }

// kernel: tpu_custom_call.1
= control target key start
LH: loop header
LB: loop body
LE: loop exit
PB: predicated region body
PF: predicated region fallthrough
CT: control target
= control target key end

     0   :  { %10 = vsyncpa [#allocation3], 0  ;;  %s3639_s0 = inlined_call_operand.hbm [shape: f32[8,256], index: 0, kind: input, shape index: {}]   ;;  %s3640_s1 = inlined_call_operand.hbm [shape: bf16[256,1024], index: 1, kind: input, shape index: {}]   ;;  %s3641_s2 = inlined_call_operand.hbm [shape: f32[1,1024], index: 2, kind: input, shape index: {}]   ;;  %s3642_s3 = inlined_call_operand.hbm [shape: bf16[1024,256], index: 3, kind: input, shape index: {}]   ;;  %s3643_s4 = inlined_call_operand.vmem [shape: f32[1,256], index: 4, kind: input, shape index: {}]   ;;  %s3644_s5 = inlined_call_operand.hbm [shape: f32[8,256], index: 5, kind: output, shape index: {}]  }
   0x1   :  { %11 = vsyncpa [#allocation6], 0 }
   0x2   :  { %12 = vsyncpa [#allocation9], 0  ;;  %s29_s20 = sshll.u32 %s3640_s1, 4  ;;  %s30_s20 = int_to_ptr.hbm [resolvable:$true] %s29_s20 }
   0x3   :  { %13 = vsyncpa [#allocation4], 0  ;;  %s3520_s21 = smov [#allocation5]   ;;  %s19_s25 = sshll.u32 %s3639_s0, 4  ;;  %s20_s25 = int_to_ptr.hbm [resolvable:$true] %s19_s25 }
   0x4   :  { %s31_s22 = sshll.u32 %s3520_s21, 4  ;;  %s3521_s26 = smov 512   ;;  %s32_s22 = int_to_ptr.vmem [resolvable:$true] %s31_s22 }
   0x5   :  { %s3522_s27 = smov 32   ;;  %s3523_s28 = smov [#allocation2]  }
   0x6   :  { %37 = dma.hbm_to_vmem [thread:$0]  %s30_s20, 16384, %s32_s22, [#allocation6], %s3521_s26, %s3521_s26, %s3522_s27  }
   0x7   :  { %s21_s29 = sshll.u32 %s3523_s28, 4  ;;  %s43_s7 = sshll.u32 %s3641_s2, 4  ;;  %s22_s29 = int_to_ptr.vmem [resolvable:$true] %s21_s29  ;;  %s44_s7 = int_to_ptr.hbm [resolvable:$true] %s43_s7 }
   0x8   :  { %24 = dma.hbm_to_vmem [thread:$0]  %s20_s25, 256, %s22_s29, [#allocation3]  }
   0x9   :  { %s53_s9 = sshll.u32 %s3642_s3, 4  ;;  %s3524_s10 = smov [#allocation7]   ;;  %s54_s9 = int_to_ptr.hbm [resolvable:$true] %s53_s9 }
   0xa   :  { %s45_s11 = sshll.u32 %s3524_s10, 4  ;;  %s3525_s0 = smov [#allocation8]   ;;  %s46_s11 = int_to_ptr.vmem [resolvable:$true] %s45_s11 }
   0xb   :  { %48 = dma.hbm_to_vmem [thread:$0]  %s44_s7, 128, %s46_s11, [#allocation6]  }
   0xc   :  { %s55_s12 = sshll.u32 %s3525_s0, 4  ;;  %s3526_s13 = smov 128   ;;  %s56_s12 = int_to_ptr.vmem [resolvable:$true] %s55_s12 }
   0xd   :  { %s3527_s14 = smov 8  }
   0xe   :  { %61 = dma.hbm_to_vmem [thread:$0]  %s54_s9, 16384, %s56_s12, [#allocation9], %s3526_s13, %s3526_s13, %s3527_s14  }
   0xf   :  { %3512 = dma.done.wait [#allocation3], 256  }
  0x10   :  { %3513 = vsyncadd [#allocation3], 4294967040 }
  0x11   :  { %3514 = dma.done.wait [#allocation6], 16512  }
  0x12   :  { %3515 = vsyncadd [#allocation6], 4294950784 }
  0x13   :  { %3516 = dma.done.wait [#allocation9], 16384  }
  0x14   :  { %3517 = vsyncadd [#allocation9], 4294950912  ;;  %v2327_v0 = vld [vmem:[#allocation5 + $0x1c0] sm:$0xf]  ;;  %v3181_v5 = vld [vmem:[#allocation5 + $0x1c4] sm:$0xf] }
  0x15   :  { %v3185_v1 = vld [vmem:[#allocation5 + $0x1dc] sm:$0xf0]  ;;  %v2329_v6 = vld [vmem:[#allocation5 + $0x1e0] sm:$0xf0]  ;;  %s2089_s18 = sshll.u32 %s3644_s5, 4  ;;  %s2090_s18 = int_to_ptr.hbm [resolvable:$true] %s2089_s18 }
  0x16   :  { %v2583_v2 = vld [vmem:[#allocation5 + $0x3c0] sm:$0xf]  ;;  %v2328_v3 = vor.u32 %v3185_v1, %v2327_v0  ;;  %v2332_v8 = vor.u32 %v3181_v5, %v2329_v6  ;;  %v3245_v9 = vld [vmem:[#allocation5 + $0x3c4] sm:$0xf] }
  0x17   :  { %v3249_v4 = vld [vmem:[#allocation5 + $0x3dc] sm:$0xf0]  ;;  %v2585_v10 = vld [vmem:[#allocation5 + $0x3e0] sm:$0xf0] }
  0x18   :  { %v2584_v7 = vor.u32 %v3249_v4, %v2583_v2  ;;  %v2295_v11 = vld [vmem:[#allocation5 + $0x180] sm:$0xf]  ;;  %870 = vmatpush.bf16.msra.mxu0 %v2328_v3  ;;  %v2588_v12 = vor.u32 %v3245_v9, %v2585_v10  ;;  %896 = vmatpush.bf16.msra.mxu2 %v2332_v8  ;;  %v3173_v18 = vld [vmem:[#allocation5 + $0x184] sm:$0xf] }
  0x19   :  { %v3177_v13 = vld [vmem:[#allocation5 + $0x19c] sm:$0xf0]  ;;  %v2297_v19 = vld [vmem:[#allocation5 + $0x1a0] sm:$0xf0] }
  0x1a   :  { %v2551_v14 = vld [vmem:[#allocation5 + $0x380] sm:$0xf]  ;;  %883 = vmatpush.bf16.msra.mxu1 %v2584_v7  ;;  %v2296_v16 = vor.u32 %v3177_v13, %v2295_v11  ;;  %v3237_v20 = vld [vmem:[#allocation5 + $0x384] sm:$0xf]  ;;  %909 = vmatpush.bf16.msra.mxu3 %v2588_v12  ;;  %v2300_v21 = vor.u32 %v3173_v18, %v2297_v19 }
  0x1b   :  { %v3241_v15 = vld [vmem:[#allocation5 + $0x39c] sm:$0xf0]  ;;  %v2553_v22 = vld [vmem:[#allocation5 + $0x3a0] sm:$0xf0] }
  0x1c   :  { %v2552_v17 = vor.u32 %v3241_v15, %v2551_v14  ;;  %v2263_v23 = vld [vmem:[#allocation5 + $0x140] sm:$0xf]  ;;  %v2556_v25 = vor.u32 %v3237_v20, %v2553_v22  ;;  %v3165_v28 = vld [vmem:[#allocation5 + $0x144] sm:$0xf]  ;;  %871 = vmatpush.bf16.msra.mxu0 %v2296_v16  ;;  %897 = vmatpush.bf16.msra.mxu2 %v2300_v21 }
  0x1d   :  { %v3169_v24 = vld [vmem:[#allocation5 + $0x15c] sm:$0xf0]  ;;  %v2265_v30 = vld [vmem:[#allocation5 + $0x160] sm:$0xf0] }
  0x1e   :  { %v2519_v26 = vld [vmem:[#allocation5 + $0x340] sm:$0xf]  ;;  %v2264_v29 = vor.u32 %v3169_v24, %v2263_v23  ;;  %v3229_v31 = vld [vmem:[#allocation5 + $0x344] sm:$0xf]  ;;  %884 = vmatpush.bf16.msra.mxu1 %v2552_v17  ;;  %v2268_v34 = vor.u32 %v3165_v28, %v2265_v30  ;;  %910 = vmatpush.bf16.msra.mxu3 %v2556_v25  ;;  %v2335_v28 = vld [vmem:[#allocation5 + $0x1c8] sm:$0xf] }
  0x1f   :  { %v3233_v27 = vld [vmem:[#allocation5 + $0x35c] sm:$0xf0]  ;;  %v2521_v32 = vld [vmem:[#allocation5 + $0x360] sm:$0xf0]  ;;  %v2591_v30 = vld [vmem:[#allocation5 + $0x3c8] sm:$0xf] }
  0x20   :  { %v2520_v33 = vor.u32 %v3233_v27, %v2519_v26  ;;  %v2231_v35 = vld [vmem:[#allocation5 + $0x100] sm:$0xf]  ;;  %v2524_v38 = vor.u32 %v3229_v31, %v2521_v32  ;;  %v3157_v40 = vld [vmem:[#allocation5 + $0x104] sm:$0xf]  ;;  %872 = vmatpush.bf16.msra.mxu0 %v2264_v29  ;;  %898 = vmatpush.bf16.msra.mxu2 %v2268_v34  ;;  %v3186_v29 = vld [vmem:[#allocation5 + $0x1e4] sm:$0xf0] }
  0x21   :  { %v3161_v36 = vld [vmem:[#allocation5 + $0x11c] sm:$0xf0]  ;;  %v2233_v41 = vld [vmem:[#allocation5 + $0x120] sm:$0xf0]  ;;  %v3250_v32 = vld [vmem:[#allocation5 + $0x3e4] sm:$0xf0] }
  0x22   :  { %v2487_v37 = vld [vmem:[#allocation5 + $0x300] sm:$0xf]  ;;  %v3221_v42 = vld [vmem:[#allocation5 + $0x304] sm:$0xf]  ;;  %v2232_v44 = vor.u32 %v3161_v36, %v2231_v35  ;;  %885 = vmatpush.bf16.msra.mxu1 %v2520_v33  ;;  %v2236_v46 = vor.u32 %v3157_v40, %v2233_v41  ;;  %911 = vmatpush.bf16.msra.mxu3 %v2524_v38  ;;  %v3182_v33 = vld [vmem:[#allocation5 + $0x1cc] sm:$0xf]  ;;  %v2336_v40 = vor.u32 %v3186_v29, %v2335_v28 }
  0x23   :  { %v3225_v39 = vld [vmem:[#allocation5 + $0x31c] sm:$0xf0]  ;;  %v2489_v43 = vld [vmem:[#allocation5 + $0x320] sm:$0xf0]  ;;  %v2337_v34 = vld [vmem:[#allocation5 + $0x1e8] sm:$0xf0]  ;;  %v2592_v41 = vor.u32 %v3250_v32, %v2591_v30 }
  0x24   :  { %v2488_v45 = vor.u32 %v3225_v39, %v2487_v37  ;;  %v2199_v47 = vld [vmem:[#allocation5 + $0xc0] sm:$0xf]  ;;  %v2492_v50 = vor.u32 %v3221_v42, %v2489_v43  ;;  %v3149_v52 = vld [vmem:[#allocation5 + $0xc4] sm:$0xf]  ;;  %873 = vmatpush.bf16.msra.mxu0 %v2232_v44  ;;  %899 = vmatpush.bf16.msra.mxu2 %v2236_v46  ;;  %v3246_v37 = vld [vmem:[#allocation5 + $0x3cc] sm:$0xf]  ;;  %v2340_v42 = vor.u32 %v3182_v33, %v2337_v34 }
  0x25   :  { %v3153_v48 = vld [vmem:[#allocation5 + $0xdc] sm:$0xf0]  ;;  %v2201_v53 = vld [vmem:[#allocation5 + $0xe0] sm:$0xf0]  ;;  %v2593_v38 = vld [vmem:[#allocation5 + $0x3e8] sm:$0xf0] }
  0x26   :  { %v2455_v49 = vld [vmem:[#allocation5 + $0x2c0] sm:$0xf]  ;;  %v3213_v54 = vld [vmem:[#allocation5 + $0x2c4] sm:$0xf]  ;;  %v2200_v56 = vor.u32 %v3153_v48, %v2199_v47  ;;  %886 = vmatpush.bf16.msra.mxu1 %v2488_v45  ;;  %v2204_v58 = vor.u32 %v3149_v52, %v2201_v53  ;;  %912 = vmatpush.bf16.msra.mxu3 %v2492_v50  ;;  %v2303_v43 = vld [vmem:[#allocation5 + $0x188] sm:$0xf]  ;;  %v2596_v46 = vor.u32 %v3246_v37, %v2593_v38 }
  0x27   :  { %v3217_v51 = vld [vmem:[#allocation5 + $0x2dc] sm:$0xf0]  ;;  %v2457_v55 = vld [vmem:[#allocation5 + $0x2e0] sm:$0xf0]  ;;  %v3178_v44 = vld [vmem:[#allocation5 + $0x1a4] sm:$0xf0] }
  0x28   :  { %v2456_v57 = vor.u32 %v3217_v51, %v2455_v49  ;;  %v2167_v59 = vld [vmem:[#allocation5 + $0x80] sm:$0xf]  ;;  %v2460_v62 = vor.u32 %v3213_v54, %v2457_v55  ;;  %v3141_v0 = vld [vmem:[#allocation5 + $0x84] sm:$0xf]  ;;  %874 = vmatpush.bf16.msra.mxu0 %v2200_v56  ;;  %900 = vmatpush.bf16.msra.mxu2 %v2204_v58  ;;  %v2559_v45 = vld [vmem:[#allocation5 + $0x388] sm:$0xf]  ;;  %v2304_v53 = vor.u32 %v3178_v44, %v2303_v43 }
  0x29   :  { %v3145_v60 = vld [vmem:[#allocation5 + $0x9c] sm:$0xf0]  ;;  %v2169_v1 = vld [vmem:[#allocation5 + $0xa0] sm:$0xf0]  ;;  %v3242_v47 = vld [vmem:[#allocation5 + $0x3a4] sm:$0xf0] }
  0x2a   :  { %v2423_v61 = vld [vmem:[#allocation5 + $0x280] sm:$0xf]  ;;  %v3205_v2 = vld [vmem:[#allocation5 + $0x284] sm:$0xf]  ;;  %v2168_v4 = vor.u32 %v3145_v60, %v2167_v59  ;;  %887 = vmatpush.bf16.msra.mxu1 %v2456_v57  ;;  %v2172_v6 = vor.u32 %v3141_v0, %v2169_v1  ;;  %913 = vmatpush.bf16.msra.mxu3 %v2460_v62  ;;  %v3174_v48 = vld [vmem:[#allocation5 + $0x18c] sm:$0xf]  ;;  %v2560_v56 = vor.u32 %v3242_v47, %v2559_v45 }
  0x2b   :  { %v3209_v63 = vld [vmem:[#allocation5 + $0x29c] sm:$0xf0]  ;;  %v2425_v3 = vld [vmem:[#allocation5 + $0x2a0] sm:$0xf0]  ;;  %v2305_v49 = vld [vmem:[#allocation5 + $0x1a8] sm:$0xf0] }
  0x2c   :  { %v2424_v5 = vor.u32 %v3209_v63, %v2423_v61  ;;  %v2135_v7 = vld [vmem:[#allocation5 + $0x40] sm:$0xf]  ;;  %v2428_v10 = vor.u32 %v3205_v2, %v2425_v3  ;;  %v3133_v12 = vld [vmem:[#allocation5 + $0x44] sm:$0xf]  ;;  %875 = vmatpush.bf16.msra.mxu0 %v2168_v4  ;;  %901 = vmatpush.bf16.msra.mxu2 %v2172_v6  ;;  %v3238_v50 = vld [vmem:[#allocation5 + $0x38c] sm:$0xf]  ;;  %v2308_v57 = vor.u32 %v3174_v48, %v2305_v49 }
  0x2d   :  { %v3137_v8 = vld [vmem:[#allocation5 + $0x5c] sm:$0xf0]  ;;  %v2137_v13 = vld [vmem:[#allocation5 + $0x60] sm:$0xf0]  ;;  %v2561_v51 = vld [vmem:[#allocation5 + $0x3a8] sm:$0xf0] }
  0x2e   :  { %v2391_v9 = vld [vmem:[#allocation5 + $0x240] sm:$0xf]  ;;  %v3197_v14 = vld [vmem:[#allocation5 + $0x244] sm:$0xf]  ;;  %v2136_v16 = vor.u32 %v3137_v8, %v2135_v7  ;;  %888 = vmatpush.bf16.msra.mxu1 %v2424_v5  ;;  %v2140_v20 = vor.u32 %v3133_v12, %v2137_v13  ;;  %914 = vmatpush.bf16.msra.mxu3 %v2428_v10  ;;  %v80_v52 = vld [vmem:[#allocation2] sm:$0xff]  ;;  %v2564_v61 = vor.u32 %v3238_v50, %v2561_v51 }
  0x2f   :  { %v3201_v11 = vld [vmem:[#allocation5 + $0x25c] sm:$0xf0]  ;;  %v2393_v15 = vld [vmem:[#allocation5 + $0x260] sm:$0xf0]  ;;  %v2271_v54 = vld [vmem:[#allocation5 + $0x148] sm:$0xf]  ;;  %v3571_v55 = vpack.c.bf16 %v80_v52, %v80_v52 }
  0x30   :  { %v2103_v17 = vld [vmem:[#allocation5] sm:$0xf]  ;;  %v2392_v19 = vor.u32 %v3201_v11, %v2391_v9  ;;  %v3125_v23 = vld [vmem:[#allocation5 + $0x4] sm:$0xf]  ;;  %v2396_v24 = vor.u32 %v3197_v14, %v2393_v15  ;;  %876 = vmatpush.bf16.msra.mxu0 %v2136_v16  ;;  %902 = vmatpush.bf16.msra.mxu2 %v2140_v20  ;;  %v3170_v58 = vld [vmem:[#allocation5 + $0x164] sm:$0xf0] }
  0x31   :  { %v3129_v18 = vld [vmem:[#allocation5 + $0x1c] sm:$0xf0]  ;;  %v2105_v25 = vld [vmem:[#allocation5 + $0x20] sm:$0xf0]  ;;  %v2527_v59 = vld [vmem:[#allocation5 + $0x348] sm:$0xf]  ;;  %v2272_v4 = vor.u32 %v3170_v58, %v2271_v54 }
  0x32   :  { %v2359_v21 = vld [vmem:[#allocation5 + $0x200] sm:$0xf]  ;;  %v3189_v26 = vld [vmem:[#allocation5 + $0x204] sm:$0xf]  ;;  %v2104_v31 = vor.u32 %v3129_v18, %v2103_v17  ;;  %889 = vmatpush.bf16.msra.mxu1 %v2392_v19  ;;  %v2108_v36 = vor.u32 %v3125_v23, %v2105_v25  ;;  %915 = vmatpush.bf16.msra.mxu3 %v2396_v24  ;;  %v3234_v60 = vld [vmem:[#allocation5 + $0x364] sm:$0xf0] }
  0x33   :  { %v3193_v22 = vld [vmem:[#allocation5 + $0x21c] sm:$0xf0]  ;;  %v2361_v27 = vld [vmem:[#allocation5 + $0x220] sm:$0xf0]  ;;  %v3166_v62 = vld [vmem:[#allocation5 + $0x14c] sm:$0xf]  ;;  %v2528_v5 = vor.u32 %v3234_v60, %v2527_v59 }
  0x34   :  { %v2360_v35 = vor.u32 %v3193_v22, %v2359_v21  ;;  %v2364_v39 = vor.u32 %v3189_v26, %v2361_v27  ;;  %877 = vmatpush.bf16.msra.mxu0 %v2104_v31  ;;  %903 = vmatpush.bf16.msra.mxu2 %v2108_v36  ;;  %v2273_v63 = vld [vmem:[#allocation5 + $0x168] sm:$0xf0]  ;;  %v81_v0 = vld [vmem:[#allocation2 + $0x8] sm:$0xff]  ;;  %v2239_v7 = vld [vmem:[#allocation5 + $0x108] sm:$0xf] }
  0x35   :  { %v3230_v1 = vld [vmem:[#allocation5 + $0x34c] sm:$0xf]  ;;  %v3575_v3 = vpack.c.bf16 %v81_v0, %v81_v0  ;;  %v2276_v6 = vor.u32 %v3166_v62, %v2273_v63  ;;  %v3162_v8 = vld [vmem:[#allocation5 + $0x124] sm:$0xf0] }
  0x36   :  { %890 = vmatpush.bf16.msra.mxu1 %v2360_v35  ;;  %916 = vmatpush.bf16.msra.mxu3 %v2364_v39  ;;  %v2529_v2 = vld [vmem:[#allocation5 + $0x368] sm:$0xf0]  ;;  %v2495_v9 = vld [vmem:[#allocation5 + $0x308] sm:$0xf]  ;;  %v2240_v16 = vor.u32 %v3162_v8, %v2239_v7  ;;  %v3183_v7 = vld [vmem:[#allocation5 + $0x1d4] sm:$0xf] }
  0x37   :  { %878 = vmatmul.bf16.vlgmr.msra.gmra.mxu0 %v3571_v55  ;;  %904 = vmatmul.bf16.vlgmr.msra.gmra.mxu2 %v3571_v55  ;;  %v2532_v10 = vor.u32 %v3230_v1, %v2529_v2  ;;  %v3226_v11 = vld [vmem:[#allocation5 + $0x324] sm:$0xf0]  ;;  %v3158_v12 = vld [vmem:[#allocation5 + $0x10c] sm:$0xf]  ;;  %v2343_v1 = vld [vmem:[#allocation5 + $0x1d0] sm:$0xf] }
  0x38   :  { %922 = vmatpush.bf16.msrb.mxu0 %v2336_v40  ;;  %948 = vmatpush.bf16.msrb.mxu2 %v2340_v42  ;;  %v2241_v13 = vld [vmem:[#allocation5 + $0x128] sm:$0xf0]  ;;  %v2496_v17 = vor.u32 %v3226_v11, %v2495_v9  ;;  %v2207_v19 = vld [vmem:[#allocation5 + $0xc8] sm:$0xf]  ;;  %v3187_v2 = vld [vmem:[#allocation5 + $0x1ec] sm:$0xf0] }
  0x39   :  { %891 = vmatmul.bf16.vlgmr.msra.gmra.mxu1 %v3575_v3  ;;  %v3222_v14 = vld [vmem:[#allocation5 + $0x30c] sm:$0xf]  ;;  %917 = vmatmul.bf16.vlgmr.msra.gmra.mxu3 %v3575_v3  ;;  %v2244_v18 = vor.u32 %v3158_v12, %v2241_v13  ;;  %v3154_v20 = vld [vmem:[#allocation5 + $0xe4] sm:$0xf0]  ;;  %v2345_v8 = vld [vmem:[#allocation5 + $0x1f0] sm:$0xf0] }
  0x3a   :  { %935 = vmatpush.bf16.msrb.mxu1 %v2592_v41  ;;  %961 = vmatpush.bf16.msrb.mxu3 %v2596_v46  ;;  %v2497_v15 = vld [vmem:[#allocation5 + $0x328] sm:$0xf0]  ;;  %v2463_v21 = vld [vmem:[#allocation5 + $0x2c8] sm:$0xf]  ;;  %v2208_v28 = vor.u32 %v3154_v20, %v2207_v19  ;;  %v3247_v11 = vld [vmem:[#allocation5 + $0x3d4] sm:$0xf] }
  0x3b   :  { %v2500_v22 = vor.u32 %v3222_v14, %v2497_v15  ;;  %v3218_v23 = vld [vmem:[#allocation5 + $0x2e4] sm:$0xf0]  ;;  %v3150_v24 = vld [vmem:[#allocation5 + $0xcc] sm:$0xf]  ;;  %v2601_v12 = vld [vmem:[#allocation5 + $0x3f0] sm:$0xf0]  ;;  %v2344_v14 = vor.u32 %v3187_v2, %v2343_v1 }
  0x3c   :  { %923 = vmatpush.bf16.msrb.mxu0 %v2304_v53  ;;  %949 = vmatpush.bf16.msrb.mxu2 %v2308_v57  ;;  %v2209_v25 = vld [vmem:[#allocation5 + $0xe8] sm:$0xf0]  ;;  %v2464_v29 = vor.u32 %v3218_v23, %v2463_v21  ;;  %v2175_v31 = vld [vmem:[#allocation5 + $0x88] sm:$0xf]  ;;  %v2567_v19 = vld [vmem:[#allocation5 + $0x390] sm:$0xf]  ;;  %v2604_v20 = vor.u32 %v3247_v11, %v2601_v12 }
  0x3d   :  { %v3214_v26 = vld [vmem:[#allocation5 + $0x2cc] sm:$0xf]  ;;  %v2212_v30 = vor.u32 %v3150_v24, %v2209_v25  ;;  %v3146_v32 = vld [vmem:[#allocation5 + $0xa4] sm:$0xf0]  ;;  %v3243_v21 = vld [vmem:[#allocation5 + $0x3ac] sm:$0xf0] }
  0x3e   :  { %936 = vmatpush.bf16.msrb.mxu1 %v2560_v56  ;;  %962 = vmatpush.bf16.msrb.mxu3 %v2564_v61  ;;  %v2465_v27 = vld [vmem:[#allocation5 + $0x2e8] sm:$0xf0]  ;;  %v2431_v33 = vld [vmem:[#allocation5 + $0x288] sm:$0xf]  ;;  %v2176_v40 = vor.u32 %v3146_v32, %v2175_v31  ;;  %v2313_v23 = vld [vmem:[#allocation5 + $0x1b0] sm:$0xf0] }
  0x3f   :  { %v2468_v34 = vor.u32 %v3214_v26, %v2465_v27  ;;  %v3210_v35 = vld [vmem:[#allocation5 + $0x2a4] sm:$0xf0]  ;;  %v3142_v36 = vld [vmem:[#allocation5 + $0x8c] sm:$0xf]  ;;  %v3239_v24 = vld [vmem:[#allocation5 + $0x394] sm:$0xf]  ;;  %v2568_v27 = vor.u32 %v3243_v21, %v2567_v19 }
  0x40   :  { %924 = vmatpush.bf16.msrb.mxu0 %v2272_v4  ;;  %950 = vmatpush.bf16.msrb.mxu2 %v2276_v6  ;;  %v2177_v37 = vld [vmem:[#allocation5 + $0xa8] sm:$0xf0]  ;;  %v2432_v41 = vor.u32 %v3210_v35, %v2431_v33  ;;  %v2143_v43 = vld [vmem:[#allocation5 + $0x48] sm:$0xf]  ;;  %v2599_v4 = vld [vmem:[#allocation5 + $0x3d0] sm:$0xf] }
  0x41   :  { %v3206_v38 = vld [vmem:[#allocation5 + $0x28c] sm:$0xf]  ;;  %v2180_v42 = vor.u32 %v3142_v36, %v2177_v37  ;;  %v3138_v44 = vld [vmem:[#allocation5 + $0x64] sm:$0xf0]  ;;  %v3251_v6 = vld [vmem:[#allocation5 + $0x3ec] sm:$0xf0] }
  0x42   :  { %937 = vmatpush.bf16.msrb.mxu1 %v2528_v5  ;;  %963 = vmatpush.bf16.msrb.mxu3 %v2532_v10  ;;  %v2433_v39 = vld [vmem:[#allocation5 + $0x2a8] sm:$0xf0]  ;;  %v2399_v45 = vld [vmem:[#allocation5 + $0x248] sm:$0xf]  ;;  %v2144_v52 = vor.u32 %v3138_v44, %v2143_v43  ;;  %v2600_v15 = vor.u32 %v3251_v6, %v2599_v4  ;;  %v2569_v25 = vld [vmem:[#allocation5 + $0x3b0] sm:$0xf0] }
  0x43   :  { %v2436_v46 = vor.u32 %v3206_v38, %v2433_v39  ;;  %v3202_v47 = vld [vmem:[#allocation5 + $0x264] sm:$0xf0]  ;;  %v3134_v48 = vld [vmem:[#allocation5 + $0x4c] sm:$0xf]  ;;  %v2535_v31 = vld [vmem:[#allocation5 + $0x350] sm:$0xf]  ;;  %v2572_v32 = vor.u32 %v3239_v24, %v2569_v25 }
  0x44   :  { %925 = vmatpush.bf16.msrb.mxu0 %v2240_v16  ;;  %951 = vmatpush.bf16.msrb.mxu2 %v2244_v18  ;;  %v2145_v49 = vld [vmem:[#allocation5 + $0x68] sm:$0xf0]  ;;  %v2111_v53 = vld [vmem:[#allocation5 + $0x8] sm:$0xf]  ;;  %v2400_v56 = vor.u32 %v3202_v47, %v2399_v45  ;;  %v2348_v16 = vor.u32 %v3183_v7, %v2345_v8  ;;  %v3179_v18 = vld [vmem:[#allocation5 + $0x1ac] sm:$0xf0] }
  0x45   :  { %v3198_v50 = vld [vmem:[#allocation5 + $0x24c] sm:$0xf]  ;;  %v3130_v54 = vld [vmem:[#allocation5 + $0x24] sm:$0xf0]  ;;  %v2148_v57 = vor.u32 %v3134_v48, %v2145_v49  ;;  %v3235_v33 = vld [vmem:[#allocation5 + $0x36c] sm:$0xf0] }
  0x46   :  { %938 = vmatpush.bf16.msrb.mxu1 %v2496_v17  ;;  %964 = vmatpush.bf16.msrb.mxu3 %v2500_v22  ;;  %v2401_v51 = vld [vmem:[#allocation5 + $0x268] sm:$0xf0]  ;;  %v2367_v58 = vld [vmem:[#allocation5 + $0x208] sm:$0xf]  ;;  %v2112_v5 = vor.u32 %v3130_v54, %v2111_v53  ;;  %v2311_v17 = vld [vmem:[#allocation5 + $0x190] sm:$0xf]  ;;  %v2536_v39 = vor.u32 %v3235_v33, %v2535_v31 }
  0x47   :  { %v3194_v59 = vld [vmem:[#allocation5 + $0x224] sm:$0xf0]  ;;  %v3126_v60 = vld [vmem:[#allocation5 + $0xc] sm:$0xf]  ;;  %v2404_v61 = vor.u32 %v3198_v50, %v2401_v51  ;;  %v3175_v22 = vld [vmem:[#allocation5 + $0x194] sm:$0xf]  ;;  %v2312_v26 = vor.u32 %v3179_v18, %v2311_v17 }
  0x48   :  { %926 = vmatpush.bf16.msrb.mxu0 %v2208_v28  ;;  %952 = vmatpush.bf16.msrb.mxu2 %v2212_v30  ;;  %v2113_v62 = vld [vmem:[#allocation5 + $0x28] sm:$0xf0]  ;;  %v2368_v9 = vor.u32 %v3194_v59, %v2367_v58  ;;  %v2316_v28 = vor.u32 %v3175_v22, %v2313_v23  ;;  %v3171_v30 = vld [vmem:[#allocation5 + $0x16c] sm:$0xf0]  ;;  %v2281_v35 = vld [vmem:[#allocation5 + $0x170] sm:$0xf0] }
  0x49   :  { %v3190_v63 = vld [vmem:[#allocation5 + $0x20c] sm:$0xf]  ;;  %v2116_v10 = vor.u32 %v3126_v60, %v2113_v62  ;;  %v3231_v36 = vld [vmem:[#allocation5 + $0x354] sm:$0xf]  ;;  %v2503_v43 = vld [vmem:[#allocation5 + $0x310] sm:$0xf] }
  0x4a   :  { %939 = vmatpush.bf16.msrb.mxu1 %v2464_v29  ;;  %965 = vmatpush.bf16.msrb.mxu3 %v2468_v34  ;;  %v2369_v0 = vld [vmem:[#allocation5 + $0x228] sm:$0xf0]  ;;  %v2279_v29 = vld [vmem:[#allocation5 + $0x150] sm:$0xf]  ;;  %v3167_v34 = vld [vmem:[#allocation5 + $0x154] sm:$0xf] }
  0x4b   :  { %v2372_v13 = vor.u32 %v3190_v63, %v2369_v0  ;;  %v2537_v37 = vld [vmem:[#allocation5 + $0x370] sm:$0xf0]  ;;  %v2280_v38 = vor.u32 %v3171_v30, %v2279_v29  ;;  %v3227_v45 = vld [vmem:[#allocation5 + $0x32c] sm:$0xf0] }
  0x4c   :  { %927 = vmatpush.bf16.msrb.mxu0 %v2176_v40  ;;  %953 = vmatpush.bf16.msrb.mxu2 %v2180_v42  ;;  %v2284_v40 = vor.u32 %v3167_v34, %v2281_v35  ;;  %v3163_v42 = vld [vmem:[#allocation5 + $0x12c] sm:$0xf0]  ;;  %v2540_v44 = vor.u32 %v3231_v36, %v2537_v37  ;;  %v2249_v47 = vld [vmem:[#allocation5 + $0x130] sm:$0xf0]  ;;  %v2504_v51 = vor.u32 %v3227_v45, %v2503_v43  ;;  %v2351_v36 = vld [vmem:[#allocation5 + $0x1d8] sm:$0xf] }
  0x4d   :  { %v3223_v48 = vld [vmem:[#allocation5 + $0x314] sm:$0xf]  ;;  %v2215_v53 = vld [vmem:[#allocation5 + $0xd0] sm:$0xf]  ;;  %v3188_v37 = vld [vmem:[#allocation5 + $0x1f4] sm:$0xf0] }
  0x4e   :  { %940 = vmatpush.bf16.msrb.mxu1 %v2432_v41  ;;  %966 = vmatpush.bf16.msrb.mxu3 %v2436_v46  ;;  %v2247_v41 = vld [vmem:[#allocation5 + $0x110] sm:$0xf]  ;;  %v3159_v46 = vld [vmem:[#allocation5 + $0x114] sm:$0xf]  ;;  %v3248_v45 = vld [vmem:[#allocation5 + $0x3dc] sm:$0xf] }
  0x4f   :  { %v2505_v49 = vld [vmem:[#allocation5 + $0x330] sm:$0xf0]  ;;  %v2248_v50 = vor.u32 %v3163_v42, %v2247_v41  ;;  %v3155_v54 = vld [vmem:[#allocation5 + $0xec] sm:$0xf0]  ;;  %v3184_v41 = vld [vmem:[#allocation5 + $0x1dc] sm:$0xf] }
  0x50   :  { %928 = vmatpush.bf16.msrb.mxu0 %v2144_v52  ;;  %954 = vmatpush.bf16.msrb.mxu2 %v2148_v57  ;;  %v2252_v52 = vor.u32 %v3159_v46, %v2249_v47  ;;  %v2508_v57 = vor.u32 %v3223_v48, %v2505_v49  ;;  %v3219_v58 = vld [vmem:[#allocation5 + $0x2ec] sm:$0xf0]  ;;  %v3151_v59 = vld [vmem:[#allocation5 + $0xd4] sm:$0xf]  ;;  %v2216_v63 = vor.u32 %v3155_v54, %v2215_v53  ;;  %v2353_v42 = vld [vmem:[#allocation5 + $0x1f8] sm:$0xf0] }
  0x51   :  { %v2217_v60 = vld [vmem:[#allocation5 + $0xf0] sm:$0xf0]  ;;  %v2183_v2 = vld [vmem:[#allocation5 + $0x90] sm:$0xf]  ;;  %v2609_v46 = vld [vmem:[#allocation5 + $0x3f8] sm:$0xf0]  ;;  %v2352_v48 = vor.u32 %v3188_v37, %v2351_v36 }
  0x52   :  { %941 = vmatpush.bf16.msrb.mxu1 %v2400_v56  ;;  %967 = vmatpush.bf16.msrb.mxu3 %v2404_v61  ;;  %v2471_v56 = vld [vmem:[#allocation5 + $0x2d0] sm:$0xf]  ;;  %v3215_v61 = vld [vmem:[#allocation5 + $0x2d4] sm:$0xf]  ;;  %v2220_v1 = vor.u32 %v3151_v59, %v2217_v60  ;;  %v2575_v53 = vld [vmem:[#allocation5 + $0x398] sm:$0xf]  ;;  %v2612_v54 = vor.u32 %v3248_v45, %v2609_v46 }
  0x53   :  { %v2473_v62 = vld [vmem:[#allocation5 + $0x2f0] sm:$0xf0]  ;;  %v2472_v0 = vor.u32 %v3219_v58, %v2471_v56  ;;  %v3147_v4 = vld [vmem:[#allocation5 + $0xac] sm:$0xf0]  ;;  %v3244_v56 = vld [vmem:[#allocation5 + $0x3b4] sm:$0xf0] }
  0x54   :  { %929 = vmatpush.bf16.msrb.mxu0 %v2112_v5  ;;  %955 = vmatpush.bf16.msrb.mxu2 %v2116_v10  ;;  %v2439_v5 = vld [vmem:[#allocation5 + $0x290] sm:$0xf]  ;;  %v2476_v6 = vor.u32 %v3215_v61, %v2473_v62  ;;  %v3143_v8 = vld [vmem:[#allocation5 + $0x94] sm:$0xf]  ;;  %v2184_v12 = vor.u32 %v3147_v4, %v2183_v2  ;;  %v2321_v58 = vld [vmem:[#allocation5 + $0x1b8] sm:$0xf0]  ;;  %v2576_v62 = vor.u32 %v3244_v56, %v2575_v53 }
  0x55   :  { %v3211_v7 = vld [vmem:[#allocation5 + $0x2ac] sm:$0xf0]  ;;  %v3207_v10 = vld [vmem:[#allocation5 + $0x294] sm:$0xf]  ;;  %v3240_v59 = vld [vmem:[#allocation5 + $0x39c] sm:$0xf] }
  0x56   :  { %942 = vmatpush.bf16.msrb.mxu1 %v2368_v9  ;;  %968 = vmatpush.bf16.msrb.mxu3 %v2372_v13  ;;  %v2185_v9 = vld [vmem:[#allocation5 + $0xb0] sm:$0xf0]  ;;  %v2440_v13 = vor.u32 %v3211_v7, %v2439_v5  ;;  %v2407_v17 = vld [vmem:[#allocation5 + $0x250] sm:$0xf]  ;;  %v2577_v60 = vld [vmem:[#allocation5 + $0x3b8] sm:$0xf0] }
  0x57   :  { %930 = vmatmul.bf16.vlgmr.msrb.gmra.mxu0 %v3571_v55  ;;  %956 = vmatmul.bf16.vlgmr.msrb.gmra.mxu2 %v3571_v55  ;;  %v2441_v11 = vld [vmem:[#allocation5 + $0x2b0] sm:$0xf0]  ;;  %v3203_v19 = vld [vmem:[#allocation5 + $0x26c] sm:$0xf0]  ;;  %v2543_v2 = vld [vmem:[#allocation5 + $0x358] sm:$0xf]  ;;  %v2580_v4 = vor.u32 %v3240_v59, %v2577_v60 }
  0x58   :  { %974 = vmatpush.bf16.msra.mxu0 %v2344_v14  ;;  %1000 = vmatpush.bf16.msra.mxu2 %v2348_v16  ;;  %v2188_v14 = vor.u32 %v3143_v8, %v2185_v9  ;;  %v3139_v16 = vld [vmem:[#allocation5 + $0x6c] sm:$0xf0]  ;;  %v2444_v18 = vor.u32 %v3207_v10, %v2441_v11  ;;  %v2153_v21 = vld [vmem:[#allocation5 + $0x70] sm:$0xf0]  ;;  %v3236_v5 = vld [vmem:[#allocation5 + $0x374] sm:$0xf0] }
  0x59   :  { %943 = vmatmul.bf16.vlgmr.msrb.gmra.mxu1 %v3575_v3  ;;  %969 = vmatmul.bf16.vlgmr.msrb.gmra.mxu3 %v3575_v3  ;;  %v3199_v22 = vld [vmem:[#allocation5 + $0x254] sm:$0xf]  ;;  %v2119_v25 = vld [vmem:[#allocation5 + $0x10] sm:$0xf]  ;;  %v2289_v7 = vld [vmem:[#allocation5 + $0x178] sm:$0xf0]  ;;  %v2544_v11 = vor.u32 %v3236_v5, %v2543_v2 }
  0x5a   :  { %987 = vmatpush.bf16.msra.mxu1 %v2600_v15  ;;  %1013 = vmatpush.bf16.msra.mxu3 %v2604_v20  ;;  %v2151_v15 = vld [vmem:[#allocation5 + $0x50] sm:$0xf]  ;;  %v3135_v20 = vld [vmem:[#allocation5 + $0x54] sm:$0xf]  ;;  %v3232_v8 = vld [vmem:[#allocation5 + $0x35c] sm:$0xf] }
  0x5b   :  { %v2409_v23 = vld [vmem:[#allocation5 + $0x270] sm:$0xf0]  ;;  %v2152_v24 = vor.u32 %v3139_v16, %v2151_v15  ;;  %v2375_v29 = vld [vmem:[#allocation5 + $0x210] sm:$0xf]  ;;  %v2545_v9 = vld [vmem:[#allocation5 + $0x378] sm:$0xf0] }
  0x5c   :  { %975 = vmatpush.bf16.msra.mxu0 %v2312_v26  ;;  %1001 = vmatpush.bf16.msra.mxu2 %v2316_v28  ;;  %v3131_v26 = vld [vmem:[#allocation5 + $0x2c] sm:$0xf0]  ;;  %v2156_v28 = vor.u32 %v3135_v20, %v2153_v21  ;;  %v3127_v31 = vld [vmem:[#allocation5 + $0x14] sm:$0xf]  ;;  %v2511_v15 = vld [vmem:[#allocation5 + $0x318] sm:$0xf]  ;;  %v2548_v16 = vor.u32 %v3232_v8, %v2545_v9 }
  0x5d   :  { %v3195_v30 = vld [vmem:[#allocation5 + $0x22c] sm:$0xf0]  ;;  %v2121_v33 = vld [vmem:[#allocation5 + $0x30] sm:$0xf0]  ;;  %v3224_v20 = vld [vmem:[#allocation5 + $0x31c] sm:$0xf] }
  0x5e   :  { %988 = vmatpush.bf16.msra.mxu1 %v2568_v27  ;;  %1014 = vmatpush.bf16.msra.mxu3 %v2572_v32  ;;  %v2408_v27 = vor.u32 %v3203_v19, %v2407_v17  ;;  %v2412_v32 = vor.u32 %v3199_v22, %v2409_v23  ;;  %v3191_v34 = vld [vmem:[#allocation5 + $0x214] sm:$0xf]  ;;  %v2376_v43 = vor.u32 %v3195_v30, %v2375_v29  ;;  %v3228_v17 = vld [vmem:[#allocation5 + $0x334] sm:$0xf0]  ;;  %v2257_v19 = vld [vmem:[#allocation5 + $0x138] sm:$0xf0] }
  0x5f   :  { %v2377_v35 = vld [vmem:[#allocation5 + $0x230] sm:$0xf0]  ;;  %v2513_v21 = vld [vmem:[#allocation5 + $0x338] sm:$0xf0]  ;;  %v2512_v23 = vor.u32 %v3228_v17, %v2511_v15  ;;  %v3220_v29 = vld [vmem:[#allocation5 + $0x2f4] sm:$0xf0] }
  0x60   :  { %976 = vmatpush.bf16.msra.mxu0 %v2280_v38  ;;  %1002 = vmatpush.bf16.msra.mxu2 %v2284_v40  ;;  %v2607_v38 = vld [vmem:[#allocation5 + $0x3d8] sm:$0xf]  ;;  %v2380_v47 = vor.u32 %v3191_v34, %v2377_v35  ;;  %v3152_v30 = vld [vmem:[#allocation5 + $0xdc] sm:$0xf]  ;;  %v3268_v9 = vld [vmem:[#allocation8 + $0x74] sm:$0xf0] }
  0x61   :  { %v3252_v40 = vld [vmem:[#allocation5 + $0x3f4] sm:$0xf0]  ;;  %v2449_v45 = vld [vmem:[#allocation5 + $0x2b8] sm:$0xf0] }
  0x62   :  { %989 = vmatpush.bf16.msra.mxu1 %v2536_v39  ;;  %1015 = vmatpush.bf16.msra.mxu3 %v2540_v44  ;;  %v2120_v39 = vor.u32 %v3131_v26, %v2119_v25  ;;  %v2124_v44 = vor.u32 %v3127_v31, %v2121_v33  ;;  %v2608_v49 = vor.u32 %v3252_v40, %v2607_v38  ;;  %v2223_v25 = vld [vmem:[#allocation5 + $0xd8] sm:$0xf]  ;;  %v2225_v31 = vld [vmem:[#allocation5 + $0xf8] sm:$0xf0] }
  0x63   :  { %v3156_v26 = vld [vmem:[#allocation5 + $0xf4] sm:$0xf0]  ;;  %v2481_v33 = vld [vmem:[#allocation5 + $0x2f8] sm:$0xf0]  ;;  %v2228_v36 = vor.u32 %v3152_v30, %v2225_v31 }
  0x64   :  { %977 = vmatpush.bf16.msra.mxu0 %v2248_v50  ;;  %1003 = vmatpush.bf16.msra.mxu2 %v2252_v52  ;;  %v2356_v50 = vor.u32 %v3184_v41, %v2353_v42  ;;  %v3180_v52 = vld [vmem:[#allocation5 + $0x1b4] sm:$0xf0]  ;;  %v2224_v34 = vor.u32 %v3156_v26, %v2223_v25  ;;  %v3144_v42 = vld [vmem:[#allocation5 + $0x9c] sm:$0xf]  ;;  %v2791_v26 = vld [vmem:[#allocation8 + $0x160] sm:$0xf] }
  0x65   :  { %v2191_v37 = vld [vmem:[#allocation5 + $0x98] sm:$0xf]  ;;  %v2161_v56 = vld [vmem:[#allocation5 + $0x78] sm:$0xf0] }
  0x66   :  { %990 = vmatpush.bf16.msra.mxu1 %v2504_v51  ;;  %1016 = vmatpush.bf16.msra.mxu3 %v2508_v57  ;;  %v2319_v51 = vld [vmem:[#allocation5 + $0x198] sm:$0xf]  ;;  %v3176_v57 = vld [vmem:[#allocation5 + $0x19c] sm:$0xf] }
  0x67   :  { %v2320_v61 = vor.u32 %v3180_v52, %v2319_v51  ;;  %v3148_v38 = vld [vmem:[#allocation5 + $0xb4] sm:$0xf0]  ;;  %v2129_v5 = vld [vmem:[#allocation5 + $0x38] sm:$0xf0] }
  0x68   :  { %978 = vmatpush.bf16.msra.mxu0 %v2216_v63  ;;  %1004 = vmatpush.bf16.msra.mxu2 %v2220_v1  ;;  %v2324_v63 = vor.u32 %v3176_v57, %v2321_v58  ;;  %v3172_v1 = vld [vmem:[#allocation5 + $0x174] sm:$0xf0]  ;;  %v2192_v46 = vor.u32 %v3148_v38, %v2191_v37  ;;  %v3200_v57 = vld [vmem:[#allocation5 + $0x25c] sm:$0xf]  ;;  %v2711_v38 = vld [vmem:[#allocation8 + $0xc0] sm:$0xf] }
  0x69   :  { %v3212_v41 = vld [vmem:[#allocation5 + $0x2b4] sm:$0xf0]  ;;  %v2417_v58 = vld [vmem:[#allocation5 + $0x278] sm:$0xf0] }
  0x6a   :  { %991 = vmatpush.bf16.msra.mxu1 %v2472_v0  ;;  %1017 = vmatpush.bf16.msra.mxu3 %v2476_v6  ;;  %v2287_v0 = vld [vmem:[#allocation5 + $0x158] sm:$0xf]  ;;  %v3168_v6 = vld [vmem:[#allocation5 + $0x15c] sm:$0xf]  ;;  %v2420_v2 = vor.u32 %v3200_v57, %v2417_v58  ;;  %v2855_v58 = vld [vmem:[#allocation8 + $0x1e0] sm:$0xf] }
  0x6b   :  { %v2288_v10 = vor.u32 %v3172_v1, %v2287_v0  ;;  %v2415_v51 = vld [vmem:[#allocation5 + $0x258] sm:$0xf] }
  0x6c   :  { %979 = vmatpush.bf16.msra.mxu0 %v2184_v12  ;;  %1005 = vmatpush.bf16.msra.mxu2 %v2188_v14  ;;  %v2292_v12 = vor.u32 %v3168_v6, %v2289_v7  ;;  %v3164_v14 = vld [vmem:[#allocation5 + $0x134] sm:$0xf0]  ;;  %v3192_v6 = vld [vmem:[#allocation5 + $0x21c] sm:$0xf] }
  0x6d   :  { %v3204_v53 = vld [vmem:[#allocation5 + $0x274] sm:$0xf0]  ;;  %v2385_v7 = vld [vmem:[#allocation5 + $0x238] sm:$0xf0] }
  0x6e   :  { %992 = vmatpush.bf16.msra.mxu1 %v2440_v13  ;;  %1018 = vmatpush.bf16.msra.mxu3 %v2444_v18  ;;  %v2255_v13 = vld [vmem:[#allocation5 + $0x118] sm:$0xf]  ;;  %v3160_v18 = vld [vmem:[#allocation5 + $0x11c] sm:$0xf]  ;;  %v2388_v15 = vor.u32 %v3192_v6, %v2385_v7 }
  0x6f   :  { %v2256_v22 = vor.u32 %v3164_v14, %v2255_v13  ;;  %v2127_v60 = vld [vmem:[#allocation5 + $0x18] sm:$0xf] }
  0x70   :  { %980 = vmatpush.bf16.msra.mxu0 %v2152_v24  ;;  %1006 = vmatpush.bf16.msra.mxu2 %v2156_v28  ;;  %v2260_v24 = vor.u32 %v3160_v18, %v2257_v19  ;;  %v2516_v28 = vor.u32 %v3224_v20, %v2513_v21  ;;  %v2383_v0 = vld [vmem:[#allocation5 + $0x218] sm:$0xf]  ;;  %v3300_v18 = vld [vmem:[#allocation8 + $0x174] sm:$0xf0]  ;;  %v2663_v19 = vld [vmem:[#allocation8 + $0x60] sm:$0xf] }
  0x71   :  { %v3196_v1 = vld [vmem:[#allocation5 + $0x234] sm:$0xf0]  ;;  %v3266_v20 = vld [vmem:[#allocation8 + $0x64] sm:$0xf0] }
  0x72   :  { %993 = vmatpush.bf16.msra.mxu1 %v2408_v27  ;;  %1019 = vmatpush.bf16.msra.mxu3 %v2412_v32  ;;  %v2479_v27 = vld [vmem:[#allocation5 + $0x2d8] sm:$0xf]  ;;  %v3216_v32 = vld [vmem:[#allocation5 + $0x2dc] sm:$0xf]  ;;  %v2384_v13 = vor.u32 %v3196_v1, %v2383_v0  ;;  %v2664_v25 = vor.u32 %v3266_v20, %v2663_v19  ;;  %v2775_v0 = vld [vmem:[#allocation8 + $0x140] sm:$0xf] }
  0x73   :  { %v2480_v35 = vor.u32 %v3220_v29, %v2479_v27  ;;  %v2484_v40 = vor.u32 %v3216_v32, %v2481_v33  ;;  %v2671_v8 = vld [vmem:[#allocation8 + $0x70] sm:$0xf]  ;;  %v3298_v27 = vld [vmem:[#allocation8 + $0x164] sm:$0xf0]  ;;  %v3264_v29 = vld [vmem:[#allocation8 + $0x54] sm:$0xf0] }
  0x74   :  { %981 = vmatpush.bf16.msra.mxu0 %v2120_v39  ;;  %1007 = vmatpush.bf16.msra.mxu2 %v2124_v44  ;;  %v2447_v39 = vld [vmem:[#allocation5 + $0x298] sm:$0xf]  ;;  %v3208_v44 = vld [vmem:[#allocation5 + $0x29c] sm:$0xf]  ;;  %v3280_v32 = vld [vmem:[#allocation8 + $0xd4] sm:$0xf0]  ;;  %v2792_v33 = vor.u32 %v3298_v27, %v2791_v26 }
  0x75   :  { %v2452_v52 = vor.u32 %v3208_v44, %v2449_v45  ;;  %v2799_v17 = vld [vmem:[#allocation8 + $0x170] sm:$0xf]  ;;  %v3260_v44 = vld [vmem:[#allocation8 + $0x34] sm:$0xf0] }
  0x76   :  { %994 = vmatpush.bf16.msra.mxu1 %v2376_v43  ;;  %1020 = vmatpush.bf16.msra.mxu3 %v2380_v47  ;;  %v2193_v43 = vld [vmem:[#allocation5 + $0xb8] sm:$0xf0]  ;;  %v2448_v47 = vor.u32 %v3212_v41, %v2447_v39  ;;  %v2719_v31 = vld [vmem:[#allocation8 + $0xd0] sm:$0xf]  ;;  %v3278_v39 = vld [vmem:[#allocation8 + $0xc4] sm:$0xf0] }
  0x77   :  { %982 = vmatmul.bf16.vlgmr.msra.gmra.mxu0 %v3571_v55  ;;  %1008 = vmatmul.bf16.vlgmr.msra.gmra.mxu2 %v3571_v55  ;;  %v2720_v37 = vor.u32 %v3280_v32, %v2719_v31  ;;  %v3316_v41 = vld [vmem:[#allocation8 + $0x1f4] sm:$0xf0]  ;;  %v2703_v45 = vld [vmem:[#allocation8 + $0xb0] sm:$0xf]  ;;  %v3330_v31 = vld [vmem:[#allocation8 + $0x264] sm:$0xf0] }
  0x78   :  { %1026 = vmatpush.bf16.msrb.mxu0 %v2352_v48  ;;  %1052 = vmatpush.bf16.msrb.mxu2 %v2356_v50  ;;  %v2196_v48 = vor.u32 %v3144_v42, %v2193_v43  ;;  %v3140_v50 = vld [vmem:[#allocation5 + $0x74] sm:$0xf0]  ;;  %v3348_v20 = vld [vmem:[#allocation8 + $0x2f4] sm:$0xf0] }
  0x79   :  { %995 = vmatmul.bf16.vlgmr.msra.gmra.mxu1 %v3575_v3  ;;  %1021 = vmatmul.bf16.vlgmr.msra.gmra.mxu3 %v3575_v3  ;;  %v2639_v43 = vld [vmem:[#allocation8 + $0x30] sm:$0xf] }
  0x7a   :  { %1039 = vmatpush.bf16.msrb.mxu1 %v2608_v49  ;;  %1065 = vmatpush.bf16.msrb.mxu3 %v2612_v54  ;;  %v2159_v49 = vld [vmem:[#allocation5 + $0x58] sm:$0xf]  ;;  %v3136_v54 = vld [vmem:[#allocation5 + $0x5c] sm:$0xf] }
  0x7b   :  { %v2160_v59 = vor.u32 %v3140_v50, %v2159_v49  ;;  %v3258_v49 = vld [vmem:[#allocation8 + $0x24] sm:$0xf0]  ;;  %v2687_v1 = vld [vmem:[#allocation8 + $0x90] sm:$0xf] }
  0x7c   :  { %1027 = vmatpush.bf16.msrb.mxu0 %v2320_v61  ;;  %1053 = vmatpush.bf16.msrb.mxu2 %v2324_v63  ;;  %v2416_v61 = vor.u32 %v3204_v53, %v2415_v51  ;;  %v3132_v63 = vld [vmem:[#allocation5 + $0x34] sm:$0xf0]  ;;  %v2695_v51 = vld [vmem:[#allocation8 + $0xa0] sm:$0xf] }
  0x7d   :  { %v2783_v53 = vld [vmem:[#allocation8 + $0x150] sm:$0xf] }
  0x7e   :  { %1040 = vmatpush.bf16.msrb.mxu1 %v2576_v62  ;;  %1066 = vmatpush.bf16.msrb.mxu3 %v2580_v4  ;;  %v2164_v62 = vor.u32 %v3136_v54, %v2161_v56  ;;  %v3128_v4 = vld [vmem:[#allocation5 + $0x1c] sm:$0xf]  ;;  %v3296_v54 = vld [vmem:[#allocation8 + $0x154] sm:$0xf0]  ;;  %v2991_v19 = vld [vmem:[#allocation8 + $0x2f0] sm:$0xf] }
  0x7f   :  { %v2132_v14 = vor.u32 %v3128_v4, %v2129_v5  ;;  %v2784_v57 = vor.u32 %v3296_v54, %v2783_v53  ;;  %v3294_v4 = vld [vmem:[#allocation8 + $0x144] sm:$0xf0]  ;;  %v2615_v5 = vld [vmem:[#allocation8] sm:$0xf]  ;;  %v2992_v32 = vor.u32 %v3348_v20, %v2991_v19  ;;  %v2751_v53 = vld [vmem:[#allocation8 + $0x110] sm:$0xf] }
  0x80   :  { %1028 = vmatpush.bf16.msrb.mxu0 %v2288_v10  ;;  %1054 = vmatpush.bf16.msrb.mxu2 %v2292_v12  ;;  %v2128_v10 = vor.u32 %v3132_v63, %v2127_v60  ;;  %v3284_v12 = vld [vmem:[#allocation8 + $0xf4] sm:$0xf0]  ;;  %v2623_v60 = vld [vmem:[#allocation8 + $0x10] sm:$0xf]  ;;  %v2776_v6 = vor.u32 %v3294_v4, %v2775_v0  ;;  %v3306_v0 = vld [vmem:[#allocation8 + $0x1a4] sm:$0xf0] }
  0x81   :  { %v3288_v54 = vld [vmem:[#allocation8 + $0x114] sm:$0xf0] }
  0x82   :  { %1041 = vmatpush.bf16.msrb.mxu1 %v2544_v11  ;;  %1067 = vmatpush.bf16.msrb.mxu3 %v2548_v16  ;;  %v2735_v11 = vld [vmem:[#allocation8 + $0xf0] sm:$0xf]  ;;  %v2672_v16 = vor.u32 %v3268_v9, %v2671_v8  ;;  %v3254_v8 = vld [vmem:[#allocation8 + $0x4] sm:$0xf0] }
  0x83   :  { %v2736_v21 = vor.u32 %v3284_v12, %v2735_v11  ;;  %v2927_v9 = vld [vmem:[#allocation8 + $0x270] sm:$0xf]  ;;  %v2679_v12 = vld [vmem:[#allocation8 + $0x80] sm:$0xf] }
  0x84   :  { %1029 = vmatpush.bf16.msrb.mxu0 %v2256_v22  ;;  %1055 = vmatpush.bf16.msrb.mxu2 %v2260_v24  ;;  %v2727_v22 = vld [vmem:[#allocation8 + $0xe0] sm:$0xf]  ;;  %v2800_v24 = vor.u32 %v3300_v18, %v2799_v17  ;;  %v2767_v17 = vld [vmem:[#allocation8 + $0x130] sm:$0xf]  ;;  %v3292_v18 = vld [vmem:[#allocation8 + $0x134] sm:$0xf0] }
  0x86   :  { %1042 = vmatpush.bf16.msrb.mxu1 %v2512_v23  ;;  %1068 = vmatpush.bf16.msrb.mxu3 %v2516_v28  ;;  %v3282_v23 = vld [vmem:[#allocation8 + $0xe4] sm:$0xf0]  ;;  %v2655_v28 = vld [vmem:[#allocation8 + $0x50] sm:$0xf] }
  0x87   :  { %v2728_v30 = vor.u32 %v3282_v23, %v2727_v22  ;;  %v2839_v22 = vld [vmem:[#allocation8 + $0x1c0] sm:$0xf]  ;;  %v2616_v23 = vor.u32 %v3254_v8, %v2615_v5 }
  0x88   :  { %1030 = vmatpush.bf16.msrb.mxu0 %v2224_v34  ;;  %1056 = vmatpush.bf16.msrb.mxu2 %v2228_v36  ;;  %v2656_v34 = vor.u32 %v3264_v29, %v2655_v28  ;;  %v3262_v36 = vld [vmem:[#allocation8 + $0x44] sm:$0xf0]  ;;  %v2759_v28 = vld [vmem:[#allocation8 + $0x120] sm:$0xf] }
  0x89   :  { %v3290_v29 = vld [vmem:[#allocation8 + $0x124] sm:$0xf0] }
  0x8a   :  { %1043 = vmatpush.bf16.msrb.mxu1 %v2480_v35  ;;  %1069 = vmatpush.bf16.msrb.mxu3 %v2484_v40  ;;  %v2647_v35 = vld [vmem:[#allocation8 + $0x40] sm:$0xf]  ;;  %v2863_v40 = vld [vmem:[#allocation8 + $0x1f0] sm:$0xf] }
  0x8b   :  { %v2864_v42 = vor.u32 %v3316_v41, %v2863_v40  ;;  %v2975_v41 = vld [vmem:[#allocation8 + $0x2d0] sm:$0xf] }
  0x8c   :  { %1031 = vmatpush.bf16.msrb.mxu0 %v2192_v46  ;;  %1057 = vmatpush.bf16.msrb.mxu2 %v2196_v48  ;;  %v3276_v46 = vld [vmem:[#allocation8 + $0xb4] sm:$0xf0]  ;;  %v2631_v48 = vld [vmem:[#allocation8 + $0x20] sm:$0xf] }
  0x8d   :  { %v2704_v50 = vor.u32 %v3276_v46, %v2703_v45  ;;  %v2632_v56 = vor.u32 %v3258_v49, %v2631_v48  ;;  %v2967_v46 = vld [vmem:[#allocation8 + $0x2c0] sm:$0xf]  ;;  %v2831_v48 = vld [vmem:[#allocation8 + $0x1b0] sm:$0xf]  ;;  %v3308_v49 = vld [vmem:[#allocation8 + $0x1b4] sm:$0xf0] }
  0x8e   :  { %1044 = vmatpush.bf16.msrb.mxu1 %v2448_v47  ;;  %1070 = vmatpush.bf16.msrb.mxu3 %v2452_v52  ;;  %v2640_v47 = vor.u32 %v3260_v44, %v2639_v43  ;;  %v3274_v52 = vld [vmem:[#allocation8 + $0xa4] sm:$0xf0]  ;;  %v2903_v44 = vld [vmem:[#allocation8 + $0x240] sm:$0xf] }
  0x90   :  { %1032 = vmatpush.bf16.msrb.mxu0 %v2160_v59  ;;  %1058 = vmatpush.bf16.msrb.mxu2 %v2164_v62  ;;  %v3314_v59 = vld [vmem:[#allocation8 + $0x1e4] sm:$0xf0]  ;;  %v2696_v62 = vor.u32 %v3274_v52, %v2695_v51 }
  0x91   :  { %v2856_v63 = vor.u32 %v3314_v59, %v2855_v58  ;;  %v3324_v58 = vld [vmem:[#allocation8 + $0x234] sm:$0xf0] }
  0x92   :  { %1045 = vmatpush.bf16.msrb.mxu1 %v2416_v61  ;;  %1071 = vmatpush.bf16.msrb.mxu3 %v2420_v2  ;;  %v3256_v61 = vld [vmem:[#allocation8 + $0x14] sm:$0xf0] }
  0x93   :  { %v3272_v2 = vld [vmem:[#allocation8 + $0x94] sm:$0xf0]  ;;  %v2624_v7 = vor.u32 %v3256_v61, %v2623_v60  ;;  %v2752_v60 = vor.u32 %v3288_v54, %v2751_v53  ;;  %v2959_v61 = vld [vmem:[#allocation8 + $0x2b0] sm:$0xf]  ;;  %v3283_v53 = vld [vmem:[#allocation8 + $0xf4] sm:$0xf] }
  0x94   :  { %1033 = vmatpush.bf16.msrb.mxu0 %v2128_v10  ;;  %1059 = vmatpush.bf16.msrb.mxu2 %v2132_v14  ;;  %v3332_v10 = vld [vmem:[#allocation8 + $0x274] sm:$0xf0]  ;;  %v2688_v11 = vor.u32 %v3272_v2, %v2687_v1  ;;  %v2737_v54 = vld [vmem:[#allocation8 + $0xf8] sm:$0xf0] }
  0x95   :  { %v3312_v14 = vld [vmem:[#allocation8 + $0x1d4] sm:$0xf0] }
  0x96   :  { %1046 = vmatpush.bf16.msrb.mxu1 %v2384_v13  ;;  %1072 = vmatpush.bf16.msrb.mxu3 %v2388_v15  ;;  %v2847_v13 = vld [vmem:[#allocation8 + $0x1d0] sm:$0xf]  ;;  %v3270_v15 = vld [vmem:[#allocation8 + $0x84] sm:$0xf0] }
  0x97   :  { %1034 = vmatmul.bf16.vlgmr.msrb.gmra.mxu0 %v3571_v55  ;;  %1060 = vmatmul.bf16.vlgmr.msrb.gmra.mxu2 %v3571_v55  ;;  %v2648_v55 = vor.u32 %v3262_v36, %v2647_v35  ;;  %v2680_v26 = vor.u32 %v3270_v15, %v2679_v12  ;;  %v3346_v35 = vld [vmem:[#allocation8 + $0x2e4] sm:$0xf0]  ;;  %v2815_v15 = vld [vmem:[#allocation8 + $0x190] sm:$0xf] }
  0x98   :  { %1868 = vmatpush.bf16.msra.mxu0 %v2672_v16  ;;  %1894 = vmatpush.bf16.msra.mxu2 %v2800_v24  ;;  %v2848_v16 = vor.u32 %v3312_v14, %v2847_v13  ;;  %v3310_v24 = vld [vmem:[#allocation8 + $0x1c4] sm:$0xf0]  ;;  %v2951_v13 = vld [vmem:[#allocation8 + $0x2a0] sm:$0xf] }
  0x99   :  { %1047 = vmatmul.bf16.vlgmr.msrb.gmra.mxu1 %v3575_v3  ;;  %1073 = vmatmul.bf16.vlgmr.msrb.gmra.mxu3 %v3575_v3  ;;  %v2712_v3 = vor.u32 %v3278_v39, %v2711_v38  ;;  %v2840_v27 = vor.u32 %v3310_v24, %v2839_v22  ;;  %v2911_v38 = vld [vmem:[#allocation8 + $0x250] sm:$0xf]  ;;  %v3328_v39 = vld [vmem:[#allocation8 + $0x254] sm:$0xf0]  ;;  %v3338_v14 = vld [vmem:[#allocation8 + $0x2a4] sm:$0xf0] }
  0x9a   :  { %1881 = vmatpush.bf16.msra.mxu1 %v2736_v21  ;;  %1907 = vmatpush.bf16.msra.mxu3 %v2864_v42  ;;  %v2768_v21 = vor.u32 %v3292_v18, %v2767_v17  ;;  %v3344_v42 = vld [vmem:[#allocation8 + $0x2d4] sm:$0xf0]  ;;  %v2912_v43 = vor.u32 %v3328_v39, %v2911_v38 }
  0x9b   :  { %v2976_v45 = vor.u32 %v3344_v42, %v2975_v41  ;;  %v3364_v24 = vld [vmem:[#allocation8 + $0x374] sm:$0xf0]  ;;  %v3267_v42 = vld [vmem:[#allocation8 + $0x74] sm:$0xf] }
  0x9c   :  { %1869 = vmatpush.bf16.msra.mxu0 %v2664_v25  ;;  %1895 = vmatpush.bf16.msra.mxu2 %v2792_v33  ;;  %v2928_v25 = vor.u32 %v3332_v10, %v2927_v9  ;;  %v2760_v33 = vor.u32 %v3290_v29, %v2759_v28  ;;  %v2887_v9 = vld [vmem:[#allocation8 + $0x220] sm:$0xf]  ;;  %v3322_v10 = vld [vmem:[#allocation8 + $0x224] sm:$0xf0]  ;;  %v2952_v28 = vor.u32 %v3338_v14, %v2951_v13  ;;  %v3376_v13 = vld [vmem:[#allocation8 + $0x3d4] sm:$0xf0] }
  0x9d   :  { %v2888_v22 = vor.u32 %v3322_v10, %v2887_v9  ;;  %v3281_v9 = vld [vmem:[#allocation8 + $0xe4] sm:$0xf]  ;;  %v2729_v10 = vld [vmem:[#allocation8 + $0xe8] sm:$0xf0] }
  0x9e   :  { %1882 = vmatpush.bf16.msra.mxu1 %v2728_v30  ;;  %1908 = vmatpush.bf16.msra.mxu3 %v2856_v63  ;;  %v2919_v30 = vld [vmem:[#allocation8 + $0x260] sm:$0xf] }
  0x9f   :  { %v2920_v36 = vor.u32 %v3330_v31, %v2919_v30  ;;  %v2823_v63 = vld [vmem:[#allocation8 + $0x1a0] sm:$0xf]  ;;  %v2943_v30 = vld [vmem:[#allocation8 + $0x290] sm:$0xf]  ;;  %v3336_v31 = vld [vmem:[#allocation8 + $0x294] sm:$0xf0] }
  0xa0   :  { %1870 = vmatpush.bf16.msra.mxu0 %v2656_v34  ;;  %1896 = vmatpush.bf16.msra.mxu2 %v2784_v57  ;;  %v2983_v34 = vld [vmem:[#allocation8 + $0x2e0] sm:$0xf]  ;;  %v2895_v57 = vld [vmem:[#allocation8 + $0x230] sm:$0xf]  ;;  %v2824_v1 = vor.u32 %v3306_v0, %v2823_v63 }
  0xa1   :  { %v2984_v40 = vor.u32 %v3346_v35, %v2983_v34  ;;  %v2896_v5 = vor.u32 %v3324_v58, %v2895_v57  ;;  %v2871_v35 = vld [vmem:[#allocation8 + $0x200] sm:$0xf] }
  0xa2   :  { %1883 = vmatpush.bf16.msra.mxu1 %v2720_v37  ;;  %1909 = vmatpush.bf16.msra.mxu3 %v2848_v16  ;;  %v3591_v37 = vld [vmem:[#allocation7] sm:$0xff]  ;;  %v3111_v0 = vld [vmem:[#allocation8 + $0x3e0] sm:$0xf] }
  0xa3   :  { %v215_v4 = vperm.slane %v3591_v37, 1  ;;  %v3304_v16 = vld [vmem:[#allocation8 + $0x194] sm:$0xf0] }
  0xa4   :  { %1871 = vmatpush.bf16.msra.mxu0 %v2648_v55  ;;  %1897 = vmatpush.bf16.msra.mxu2 %v2776_v6  ;;  %v214_v55 = vperm.slane %v3591_v37, 0  ;;  %v2743_v6 = vld [vmem:[#allocation8 + $0x100] sm:$0xf]  ;;  %v2816_v19 = vor.u32 %v3304_v16, %v2815_v15  ;;  %v3023_v15 = vld [vmem:[#allocation8 + $0x330] sm:$0xf] }
  0xa5   :  { %v3356_v16 = vld [vmem:[#allocation8 + $0x334] sm:$0xf0] }
  0xa6   :  { %1884 = vmatpush.bf16.msra.mxu1 %v2712_v3  ;;  %1910 = vmatpush.bf16.msra.mxu3 %v2840_v27  ;;  %v3326_v3 = vld [vmem:[#allocation8 + $0x244] sm:$0xf0]  ;;  %v3320_v27 = vld [vmem:[#allocation8 + $0x214] sm:$0xf0] }
  0xa7   :  { %v2904_v52 = vor.u32 %v3326_v3, %v2903_v44  ;;  %v2673_v44 = vld [vmem:[#allocation8 + $0x78] sm:$0xf0]  ;;  %v2944_v3 = vor.u32 %v3336_v31, %v2943_v30 }
  0xa8   :  { %1872 = vmatpush.bf16.msra.mxu0 %v2640_v47  ;;  %1898 = vmatpush.bf16.msra.mxu2 %v2768_v21  ;;  %v3342_v47 = vld [vmem:[#allocation8 + $0x2c4] sm:$0xf0] }
  0xa9   :  { %v2968_v59 = vor.u32 %v3342_v47, %v2967_v46  ;;  %v2935_v46 = vld [vmem:[#allocation8 + $0x280] sm:$0xf]  ;;  %v3334_v47 = vld [vmem:[#allocation8 + $0x284] sm:$0xf0] }
  0xaa   :  { %1885 = vmatpush.bf16.msra.mxu1 %v2704_v50  ;;  %v2832_v50 = vor.u32 %v3308_v49, %v2831_v48  ;;  %v3119_v49 = vld [vmem:[#allocation8 + $0x3f0] sm:$0xf] }
  0xac   :  { %1873 = vmatpush.bf16.msra.mxu0 %v2632_v56  ;;  %1899 = vmatpush.bf16.msra.mxu2 %v2760_v33  ;;  %v3302_v33 = vld [vmem:[#allocation8 + $0x184] sm:$0xf0] }
  0xad   :  { %1911 = vmatpush.bf16.msra.mxu3 %v2832_v50  ;;  %v3380_v50 = vld [vmem:[#allocation8 + $0x3f4] sm:$0xf0] }
  0xae   :  { %1886 = vmatpush.bf16.msra.mxu1 %v2696_v62  ;;  %v3340_v62 = vld [vmem:[#allocation8 + $0x2b4] sm:$0xf0] }
  0xb0   :  { %1874 = vmatpush.bf16.msra.mxu0 %v2624_v7  ;;  %1900 = vmatpush.bf16.msra.mxu2 %v2752_v60  ;;  %v3286_v7 = vld [vmem:[#allocation8 + $0x104] sm:$0xf0]  ;;  %v2676_v60 = vor.u32 %v3267_v42, %v2673_v44  ;;  %v2641_v42 = vld [vmem:[#allocation8 + $0x38] sm:$0xf0]  ;;  %v3372_v44 = vld [vmem:[#allocation8 + $0x3b4] sm:$0xf0] }
  0xb1   :  { %1912 = vmatpush.bf16.msra.mxu3 %v2824_v1  ;;  %v2744_v12 = vor.u32 %v3286_v7, %v2743_v6  ;;  %v3378_v1 = vld [vmem:[#allocation8 + $0x3e4] sm:$0xf0]  ;;  %v3031_v6 = vld [vmem:[#allocation8 + $0x340] sm:$0xf] }
  0xb2   :  { %1887 = vmatpush.bf16.msra.mxu1 %v2688_v11  ;;  %v2960_v11 = vor.u32 %v3340_v62, %v2959_v61  ;;  %v3265_v61 = vld [vmem:[#allocation8 + $0x64] sm:$0xf]  ;;  %v2936_v62 = vor.u32 %v3334_v47, %v2935_v46  ;;  %v3358_v7 = vld [vmem:[#allocation8 + $0x344] sm:$0xf0]  ;;  %v3275_v47 = vld [vmem:[#allocation8 + $0xb4] sm:$0xf] }
  0xb4   :  { %1875 = vmatpush.bf16.msra.mxu0 %v2616_v23  ;;  %v879_v51 = vpop.f32.mrf.mxu0  ;;  %1901 = vmatpush.bf16.msra.mxu2 %v2744_v12  ;;  %v3055_v23 = vld [vmem:[#allocation8 + $0x370] sm:$0xf] }
  0xb5   :  { %v880_v56 = vadd.f32 %v879_v51, %v214_v55  ;;  %1913 = vmatpush.bf16.msra.mxu3 %v2816_v19  ;;  %v3056_v29 = vor.u32 %v3364_v24, %v3055_v23  ;;  %v3047_v55 = vld [vmem:[#allocation8 + $0x360] sm:$0xf]  ;;  %v3103_v12 = vld [vmem:[#allocation8 + $0x3d0] sm:$0xf]  ;;  %v2732_v19 = vor.u32 %v3281_v9, %v2729_v10  ;;  %v3024_v23 = vor.u32 %v3356_v16, %v3023_v15  ;;  %v3299_v9 = vld [vmem:[#allocation8 + $0x174] sm:$0xf] }
  0xb6   :  { %1888 = vmatpush.bf16.msra.mxu1 %v2680_v26  ;;  %v892_v2 = vpop.f32.mrf.mxu1  ;;  %v2879_v26 = vld [vmem:[#allocation8 + $0x210] sm:$0xf]  ;;  %v3095_v24 = vld [vmem:[#allocation8 + $0x3c0] sm:$0xf]  ;;  %v2801_v10 = vld [vmem:[#allocation8 + $0x178] sm:$0xf0] }
  0xb7   :  { %v893_v8 = vadd.f32 %v892_v2, %v880_v56  ;;  %v2880_v41 = vor.u32 %v3320_v27, %v2879_v26  ;;  %v3039_v56 = vld [vmem:[#allocation8 + $0x350] sm:$0xf]  ;;  %v2665_v2 = vld [vmem:[#allocation8 + $0x68] sm:$0xf0]  ;;  %v3374_v26 = vld [vmem:[#allocation8 + $0x3c4] sm:$0xf0] }
  0xb8   :  { %1920 = vmatpush.bf16.msrb.mxu0 %v2928_v25  ;;  %1946 = vmatpush.bf16.msrb.mxu2 %v3056_v29  ;;  %v2668_v14 = vor.u32 %v3265_v61, %v2665_v2  ;;  %v2649_v29 = vld [vmem:[#allocation8 + $0x48] sm:$0xf0]  ;;  %v3096_v31 = vor.u32 %v3374_v26, %v3095_v24  ;;  %v3370_v61 = vld [vmem:[#allocation8 + $0x3a4] sm:$0xf0]  ;;  %v2999_v2 = vld [vmem:[#allocation8 + $0x300] sm:$0xf] }
  0xb9   :  { %v1078_v17 = vmax.f32 %v893_v8, 0.0  ;;  %v2625_v15 = vld [vmem:[#allocation8 + $0x18] sm:$0xf0] }
  0xba   :  { %1933 = vmatpush.bf16.msrb.mxu1 %v2992_v32  ;;  %v905_v18 = vpop.f32.mrf.mxu2  ;;  %v2807_v32 = vld [vmem:[#allocation8 + $0x180] sm:$0xf] }
  0xbb   :  { %v906_v20 = vadd.f32 %v905_v18, %v215_v4  ;;  %v3595_v25 = vpack.c.bf16 %v1078_v17, %v1078_v17  ;;  %v2808_v38 = vor.u32 %v3302_v33, %v2807_v32  ;;  %v2740_v4 = vor.u32 %v3283_v53, %v2737_v54  ;;  %v3263_v17 = vld [vmem:[#allocation8 + $0x54] sm:$0xf]  ;;  %v2657_v18 = vld [vmem:[#allocation8 + $0x58] sm:$0xf0]  ;;  %v3277_v33 = vld [vmem:[#allocation8 + $0xc4] sm:$0xf] }
  0xbc   :  { %1921 = vmatpush.bf16.msrb.mxu0 %v2920_v36  ;;  %v881_v21 = vpop.f32.mrf.mxu0  ;;  %v918_v34 = vpop.f32.mrf.mxu3  ;;  %v3318_v36 = vld [vmem:[#allocation8 + $0x204] sm:$0xf0]  ;;  %v2660_v27 = vor.u32 %v3263_v17, %v2657_v18  ;;  %v216_v32 = vperm.slane %v3591_v37, 2  ;;  %v3257_v54 = vld [vmem:[#allocation8 + $0x24] sm:$0xf]  ;;  %v2804_v17 = vor.u32 %v3299_v9, %v2801_v10 }
  0xbd   :  { %1876 = vmatmul.bf16.vlgmr.msra.gmra.mxu0 %v3595_v25  ;;  %v919_v39 = vadd.f32 %v918_v34, %v906_v20  ;;  %1914 = vmatpush.bf16.msra.mxu3 %v2808_v38  ;;  %v2872_v58 = vor.u32 %v3318_v36, %v2871_v35  ;;  %v3104_v20 = vor.u32 %v3376_v13, %v3103_v12  ;;  %v3279_v21 = vld [vmem:[#allocation8 + $0xd4] sm:$0xf]  ;;  %v2713_v34 = vld [vmem:[#allocation8 + $0xc8] sm:$0xf0]  ;;  %v3015_v35 = vld [vmem:[#allocation8 + $0x320] sm:$0xf] }
  0xbe   :  { %1934 = vmatpush.bf16.msrb.mxu1 %v2984_v40  ;;  %v894_v40 = vpop.f32.mrf.mxu1  ;;  %v3354_v36 = vld [vmem:[#allocation8 + $0x324] sm:$0xf0]  ;;  %v3071_v18 = vld [vmem:[#allocation8 + $0x390] sm:$0xf]  ;;  %v2833_v9 = vld [vmem:[#allocation8 + $0x1b8] sm:$0xf0] }
  0xbf   :  { %v1079_v48 = vmax.f32 %v919_v39, 0.0  ;;  %v3259_v39 = vld [vmem:[#allocation8 + $0x34] sm:$0xf]  ;;  %v3016_v40 = vor.u32 %v3354_v36, %v3015_v35  ;;  %v3366_v35 = vld [vmem:[#allocation8 + $0x384] sm:$0xf0] }
  0xc0   :  { %1922 = vmatpush.bf16.msrb.mxu0 %v2912_v43  ;;  %v3362_v43 = vld [vmem:[#allocation8 + $0x364] sm:$0xf0]  ;;  %v2644_v53 = vor.u32 %v3259_v39, %v2641_v42  ;;  %v3269_v36 = vld [vmem:[#allocation8 + $0x84] sm:$0xf]  ;;  %v2865_v42 = vld [vmem:[#allocation8 + $0x1f8] sm:$0xf0] }
  0xc1   :  { %v3598_v57 = vpack.c.bf16 %v1079_v48, %v1079_v48  ;;  %v2705_v48 = vld [vmem:[#allocation8 + $0xb8] sm:$0xf0] }
  0xc2   :  { %1935 = vmatpush.bf16.msrb.mxu1 %v2976_v45  ;;  %v3048_v45 = vor.u32 %v3362_v43, %v3047_v55  ;;  %v907_v51 = vpop.f32.mrf.mxu2  ;;  %v2716_v55 = vor.u32 %v3277_v33, %v2713_v34  ;;  %v3087_v43 = vld [vmem:[#allocation8 + $0x3b0] sm:$0xf]  ;;  %v3063_v34 = vld [vmem:[#allocation8 + $0x380] sm:$0xf] }
  0xc3   :  { %1889 = vmatmul.bf16.vlgmr.msra.gmra.mxu1 %v3598_v57  ;;  %v3088_v46 = vor.u32 %v3372_v44, %v3087_v43 }
  0xc4   :  { %1923 = vmatpush.bf16.msrb.mxu0 %v2904_v52  ;;  %1947 = vmatpush.bf16.msrb.mxu2 %v3048_v45  ;;  %v3120_v52 = vor.u32 %v3380_v50, %v3119_v49  ;;  %v920_v8 = vpop.f32.mrf.mxu3  ;;  %v3007_v49 = vld [vmem:[#allocation8 + $0x310] sm:$0xf]  ;;  %v3352_v50 = vld [vmem:[#allocation8 + $0x314] sm:$0xf0] }
  0xc6   :  { %1936 = vmatpush.bf16.msrb.mxu1 %v2968_v59  ;;  %v3360_v59 = vld [vmem:[#allocation8 + $0x354] sm:$0xf0]  ;;  %1959 = vmatpush.bf16.msrb.mxu3 %v3120_v52  ;;  %v217_v52 = vperm.slane %v3591_v37, 3 }
  0xc7   :  { %v3040_v63 = vor.u32 %v3360_v59, %v3039_v56  ;;  %v3008_v56 = vor.u32 %v3352_v50, %v3007_v49  ;;  %v2708_v59 = vor.u32 %v3275_v47, %v2705_v48  ;;  %v3313_v49 = vld [vmem:[#allocation8 + $0x1e4] sm:$0xf]  ;;  %v2857_v50 = vld [vmem:[#allocation8 + $0x1e8] sm:$0xf0] }
  0xc8   :  { %1924 = vmatpush.bf16.msrb.mxu0 %v2896_v5  ;;  %v3112_v5 = vor.u32 %v3378_v1, %v3111_v0  ;;  %v3273_v0 = vld [vmem:[#allocation8 + $0xa4] sm:$0xf]  ;;  %v2697_v1 = vld [vmem:[#allocation8 + $0xa8] sm:$0xf0] }
  0xc9   :  { %1948 = vmatpush.bf16.msrb.mxu2 %v3040_v63  ;;  %v2700_v16 = vor.u32 %v3273_v0, %v2697_v1  ;;  %v2841_v0 = vld [vmem:[#allocation8 + $0x1c8] sm:$0xf0] }
  0xca   :  { %1937 = vmatpush.bf16.msrb.mxu1 %v2960_v11  ;;  %v3032_v11 = vor.u32 %v3358_v7, %v3031_v6  ;;  %1960 = vmatpush.bf16.msrb.mxu3 %v3112_v5 }
  0xcc   :  { %1925 = vmatpush.bf16.msrb.mxu0 %v2888_v22  ;;  %v2721_v22 = vld [vmem:[#allocation8 + $0xd8] sm:$0xf0] }
  0xcd   :  { %1949 = vmatpush.bf16.msrb.mxu2 %v3032_v11  ;;  %v2724_v30 = vor.u32 %v3279_v21, %v2721_v22  ;;  %v3271_v21 = vld [vmem:[#allocation8 + $0x94] sm:$0xf]  ;;  %v2689_v22 = vld [vmem:[#allocation8 + $0x98] sm:$0xf0] }
  0xce   :  { %1938 = vmatpush.bf16.msrb.mxu1 %v2952_v28  ;;  %v3261_v28 = vld [vmem:[#allocation8 + $0x44] sm:$0xf]  ;;  %1961 = vmatpush.bf16.msrb.mxu3 %v3104_v20  ;;  %v3368_v20 = vld [vmem:[#allocation8 + $0x394] sm:$0xf0] }
  0xcf   :  { %v2652_v38 = vor.u32 %v3261_v28, %v2649_v29  ;;  %v3072_v24 = vor.u32 %v3368_v20, %v3071_v18  ;;  %v3297_v28 = vld [vmem:[#allocation8 + $0x164] sm:$0xf]  ;;  %v2793_v29 = vld [vmem:[#allocation8 + $0x168] sm:$0xf0] }
  0xd0   :  { %1926 = vmatpush.bf16.msrb.mxu0 %v2880_v41  ;;  %v2796_v33 = vor.u32 %v3297_v28, %v2793_v29  ;;  %v3305_v20 = vld [vmem:[#allocation8 + $0x1a4] sm:$0xf] }
  0xd1   :  { %1950 = vmatpush.bf16.msrb.mxu2 %v3024_v23  ;;  %v3329_v29 = vld [vmem:[#allocation8 + $0x264] sm:$0xf] }
  0xd2   :  { %1939 = vmatpush.bf16.msrb.mxu1 %v2944_v3  ;;  %1962 = vmatpush.bf16.msrb.mxu3 %v3096_v31  ;;  %v2617_v31 = vld [vmem:[#allocation8 + $0x8] sm:$0xf0] }
  0xd4   :  { %1927 = vmatpush.bf16.msrb.mxu0 %v2872_v58  ;;  %v931_v41 = vpop.f32.mrf.mxu0  ;;  %v2633_v58 = vld [vmem:[#allocation8 + $0x28] sm:$0xf0] }
  0xd5   :  { %v932_v3 = vadd.f32 %v931_v41, %v216_v32  ;;  %1951 = vmatpush.bf16.msrb.mxu2 %v3016_v40  ;;  %v2636_v7 = vor.u32 %v3257_v54, %v2633_v58  ;;  %v2692_v32 = vor.u32 %v3271_v21, %v2689_v22  ;;  %v3064_v40 = vor.u32 %v3366_v35, %v3063_v34  ;;  %v3315_v41 = vld [vmem:[#allocation8 + $0x1f4] sm:$0xf]  ;;  %v2849_v58 = vld [vmem:[#allocation8 + $0x1d8] sm:$0xf0]  ;;  %v2825_v21 = vld [vmem:[#allocation8 + $0x1a8] sm:$0xf0] }
  0xd6   :  { %1940 = vmatpush.bf16.msrb.mxu1 %v2936_v62  ;;  %v944_v45 = vpop.f32.mrf.mxu1  ;;  %1963 = vmatpush.bf16.msrb.mxu3 %v3088_v46  ;;  %v2868_v44 = vor.u32 %v3315_v41, %v2865_v42  ;;  %v219_v22 = vperm.slane %v3591_v37, 5  ;;  %v3303_v34 = vld [vmem:[#allocation8 + $0x194] sm:$0xf]  ;;  %v2817_v35 = vld [vmem:[#allocation8 + $0x198] sm:$0xf0] }
  0xd7   :  { %v945_v51 = vadd.f32 %v944_v45, %v932_v3  ;;  %v3295_v3 = vld [vmem:[#allocation8 + $0x154] sm:$0xf]  ;;  %v2785_v45 = vld [vmem:[#allocation8 + $0x158] sm:$0xf0]  ;;  %v2820_v41 = vor.u32 %v3303_v34, %v2817_v35 }
  0xd8   :  { %1972 = vmatpush.bf16.msra.mxu0 %v2676_v60  ;;  %v3079_v60 = vld [vmem:[#allocation8 + $0x3a0] sm:$0xf]  ;;  %v2788_v48 = vor.u32 %v3295_v3, %v2785_v45  ;;  %v2993_v3 = vld [vmem:[#allocation8 + $0x2f8] sm:$0xf0]  ;;  %v3327_v45 = vld [vmem:[#allocation8 + $0x254] sm:$0xf] }
  0xd9   :  { %v1080_v62 = vmax.f32 %v945_v51, 0.0  ;;  %1952 = vmatpush.bf16.msrb.mxu2 %v3008_v56  ;;  %v3080_v63 = vor.u32 %v3370_v61, %v3079_v60  ;;  %v2860_v51 = vor.u32 %v3313_v49, %v2857_v50  ;;  %v3311_v56 = vld [vmem:[#allocation8 + $0x1d4] sm:$0xf]  ;;  %v2769_v61 = vld [vmem:[#allocation8 + $0x138] sm:$0xf0] }
  0xda   :  { %1985 = vmatpush.bf16.msra.mxu1 %v2740_v4  ;;  %v3350_v4 = vld [vmem:[#allocation8 + $0x304] sm:$0xf0]  ;;  %v957_v6 = vpop.f32.mrf.mxu2  ;;  %v3291_v60 = vld [vmem:[#allocation8 + $0x134] sm:$0xf] }
  0xdb   :  { %v3603_v5 = vpack.c.bf16 %v1080_v62, %v1080_v62  ;;  %v3000_v8 = vor.u32 %v3350_v4, %v2999_v2  ;;  %v958_v11 = vadd.f32 %v957_v6, %v217_v52  ;;  %1964 = vmatpush.bf16.msrb.mxu3 %v3080_v63  ;;  %v3293_v52 = vld [vmem:[#allocation8 + $0x144] sm:$0xf]  ;;  %v2772_v62 = vor.u32 %v3291_v60, %v2769_v61  ;;  %v2761_v6 = vld [vmem:[#allocation8 + $0x128] sm:$0xf0] }
  0xdc   :  { %1973 = vmatpush.bf16.msra.mxu0 %v2668_v14  ;;  %v970_v12 = vpop.f32.mrf.mxu3  ;;  %v933_v13 = vpop.f32.mrf.mxu0  ;;  %v3255_v14 = vld [vmem:[#allocation8 + $0x14] sm:$0xf]  ;;  %v3309_v63 = vld [vmem:[#allocation8 + $0x1c4] sm:$0xf]  ;;  %v218_v2 = vperm.slane %v3591_v37, 4 }
  0xdd   :  { %1902 = vmatmul.bf16.vlgmr.msra.gmra.mxu2 %v3603_v5  ;;  %v971_v23 = vadd.f32 %v970_v12, %v958_v11  ;;  %v2628_v26 = vor.u32 %v3255_v14, %v2625_v15  ;;  %v2844_v1 = vor.u32 %v3309_v63, %v2841_v0  ;;  %v3289_v4 = vld [vmem:[#allocation8 + $0x124] sm:$0xf]  ;;  %v3287_v14 = vld [vmem:[#allocation8 + $0x114] sm:$0xf]  ;;  %v2753_v15 = vld [vmem:[#allocation8 + $0x118] sm:$0xf0] }
  0xde   :  { %1986 = vmatpush.bf16.msra.mxu1 %v2732_v19  ;;  %v946_v19 = vpop.f32.mrf.mxu1  ;;  %1953 = vmatpush.bf16.msrb.mxu2 %v3000_v8  ;;  %v3307_v8 = vld [vmem:[#allocation8 + $0x1b4] sm:$0xf]  ;;  %v2905_v60 = vld [vmem:[#allocation8 + $0x248] sm:$0xf0] }
  0xdf   :  { %1965 = vmatpush.bf16.msrb.mxu3 %v3072_v24  ;;  %v2836_v11 = vor.u32 %v3307_v8, %v2833_v9  ;;  %v2929_v19 = vld [vmem:[#allocation8 + $0x278] sm:$0xf0]  ;;  %v3343_v0 = vld [vmem:[#allocation8 + $0x2d4] sm:$0xf]  ;;  %v3341_v8 = vld [vmem:[#allocation8 + $0x2c4] sm:$0xf] }
  0xe0   :  { %1974 = vmatpush.bf16.msra.mxu0 %v2660_v27  ;;  %v3253_v27 = vld [vmem:[#allocation8 + $0x4] sm:$0xf]  ;;  %v2969_v9 = vld [vmem:[#allocation8 + $0x2c8] sm:$0xf0] }
  0xe1   :  { %v2620_v43 = vor.u32 %v3253_v27, %v2617_v31  ;;  %v2745_v27 = vld [vmem:[#allocation8 + $0x108] sm:$0xf0] }
  0xe2   :  { %1987 = vmatpush.bf16.msra.mxu1 %v2724_v30  ;;  %1998 = vmatpush.bf16.msra.mxu2 %v2804_v17  ;;  %v1081_v30 = vmax.f32 %v971_v23, 0.0  ;;  %v2756_v17 = vor.u32 %v3287_v14, %v2753_v15  ;;  %v2828_v23 = vor.u32 %v3305_v20, %v2825_v21  ;;  %v3339_v15 = vld [vmem:[#allocation8 + $0x2b4] sm:$0xf] }
  0xe3   :  { %1966 = vmatpush.bf16.msrb.mxu3 %v3064_v40 }
  0xe4   :  { %1975 = vmatpush.bf16.msra.mxu0 %v2652_v38  ;;  %v2681_v38 = vld [vmem:[#allocation8 + $0x88] sm:$0xf0]  ;;  %v3606_v39 = vpack.c.bf16 %v1081_v30, %v1081_v30  ;;  %v972_v46 = vpop.f32.mrf.mxu3 }
  0xe5   :  { %v2684_v47 = vor.u32 %v3269_v36, %v2681_v38  ;;  %v2913_v46 = vld [vmem:[#allocation8 + $0x258] sm:$0xf0] }
  0xe6   :  { %1988 = vmatpush.bf16.msra.mxu1 %v2716_v55  ;;  %v959_v55 = vpop.f32.mrf.mxu2  ;;  %1999 = vmatpush.bf16.msra.mxu2 %v2796_v33  ;;  %v2921_v33 = vld [vmem:[#allocation8 + $0x268] sm:$0xf0] }
  0xe7   :  { %1915 = vmatmul.bf16.vlgmr.msra.gmra.mxu3 %v3606_v39 }
  0xe8   :  { %1976 = vmatpush.bf16.msra.mxu0 %v2644_v53  ;;  %2011 = vmatpush.bf16.msra.mxu3 %v2868_v44  ;;  %v2777_v53 = vld [vmem:[#allocation8 + $0x148] sm:$0xf0]  ;;  %v3347_v44 = vld [vmem:[#allocation8 + $0x2f4] sm:$0xf] }
  0xe9   :  { %v2780_v54 = vor.u32 %v3293_v52, %v2777_v53  ;;  %v2916_v53 = vor.u32 %v3327_v45, %v2913_v46 }
  0xea   :  { %1989 = vmatpush.bf16.msra.mxu1 %v2708_v59  ;;  %2000 = vmatpush.bf16.msra.mxu2 %v2788_v48  ;;  %v2852_v59 = vor.u32 %v3311_v56, %v2849_v58  ;;  %v2809_v48 = vld [vmem:[#allocation8 + $0x188] sm:$0xf0] }
  0xeb   :  { %v2985_v56 = vld [vmem:[#allocation8 + $0x2e8] sm:$0xf0] }
  0xec   :  { %1977 = vmatpush.bf16.msra.mxu0 %v2636_v7  ;;  %2012 = vmatpush.bf16.msra.mxu3 %v2860_v51  ;;  %v2764_v7 = vor.u32 %v3289_v4, %v2761_v6  ;;  %v2996_v51 = vor.u32 %v3347_v44, %v2993_v3  ;;  %v2897_v4 = vld [vmem:[#allocation8 + $0x238] sm:$0xf0] }
  0xee   :  { %1990 = vmatpush.bf16.msra.mxu1 %v2700_v16  ;;  %2001 = vmatpush.bf16.msra.mxu2 %v2780_v54  ;;  %v3331_v16 = vld [vmem:[#allocation8 + $0x274] sm:$0xf]  ;;  %v3345_v54 = vld [vmem:[#allocation8 + $0x2e4] sm:$0xf] }
  0xef   :  { %v2932_v28 = vor.u32 %v3331_v16, %v2929_v19  ;;  %v2961_v16 = vld [vmem:[#allocation8 + $0x2b8] sm:$0xf0] }
  0xf0   :  { %1978 = vmatpush.bf16.msra.mxu0 %v2628_v26  ;;  %2013 = vmatpush.bf16.msra.mxu3 %v2852_v59  ;;  %v3285_v26 = vld [vmem:[#allocation8 + $0x104] sm:$0xf]  ;;  %v2964_v20 = vor.u32 %v3339_v15, %v2961_v16  ;;  %v3017_v16 = vld [vmem:[#allocation8 + $0x328] sm:$0xf0] }
  0xf1   :  { %v2748_v30 = vor.u32 %v3285_v26, %v2745_v27  ;;  %v3325_v59 = vld [vmem:[#allocation8 + $0x244] sm:$0xf]  ;;  %v2953_v26 = vld [vmem:[#allocation8 + $0x2a8] sm:$0xf0] }
  0xf2   :  { %1991 = vmatpush.bf16.msra.mxu1 %v2692_v32  ;;  %2002 = vmatpush.bf16.msra.mxu2 %v2772_v62  ;;  %v2988_v62 = vor.u32 %v3345_v54, %v2985_v56  ;;  %v2908_v63 = vor.u32 %v3325_v59, %v2905_v60  ;;  %v3317_v27 = vld [vmem:[#allocation8 + $0x204] sm:$0xf]  ;;  %v3041_v54 = vld [vmem:[#allocation8 + $0x358] sm:$0xf0] }
  0xf3   :  { %v3353_v15 = vld [vmem:[#allocation8 + $0x324] sm:$0xf] }
  0xf4   :  { %1979 = vmatpush.bf16.msra.mxu0 %v2620_v43  ;;  %v983_v10 = vpop.f32.mrf.mxu0  ;;  %2014 = vmatpush.bf16.msra.mxu3 %v2844_v1  ;;  %v2924_v43 = vor.u32 %v3329_v29, %v2921_v33  ;;  %v2977_v1 = vld [vmem:[#allocation8 + $0x2d8] sm:$0xf0]  ;;  %v3363_v29 = vld [vmem:[#allocation8 + $0x374] sm:$0xf] }
  0xf5   :  { %v984_v12 = vadd.f32 %v983_v10, %v218_v2  ;;  %v3323_v2 = vld [vmem:[#allocation8 + $0x234] sm:$0xf]  ;;  %v2980_v6 = vor.u32 %v3343_v0, %v2977_v1  ;;  %v3321_v10 = vld [vmem:[#allocation8 + $0x224] sm:$0xf] }
  0xf6   :  { %1992 = vmatpush.bf16.msra.mxu1 %v2684_v47  ;;  %v996_v13 = vpop.f32.mrf.mxu1  ;;  %2003 = vmatpush.bf16.msra.mxu2 %v2764_v7  ;;  %v3301_v47 = vld [vmem:[#allocation8 + $0x184] sm:$0xf]  ;;  %v2900_v7 = vor.u32 %v3323_v2, %v2897_v4  ;;  %v3033_v2 = vld [vmem:[#allocation8 + $0x348] sm:$0xf0] }
  0xf7   :  { %v997_v18 = vadd.f32 %v996_v13, %v984_v12  ;;  %v2812_v50 = vor.u32 %v3301_v47, %v2809_v48  ;;  %v2972_v12 = vor.u32 %v3341_v8, %v2969_v9  ;;  %v220_v13 = vperm.slane %v3591_v37, 6  ;;  %v2937_v47 = vld [vmem:[#allocation8 + $0x288] sm:$0xf0]  ;;  %v3357_v1 = vld [vmem:[#allocation8 + $0x344] sm:$0xf] }
  0xf8   :  { %2015 = vmatpush.bf16.msra.mxu3 %v2836_v11  ;;  %v2889_v11 = vld [vmem:[#allocation8 + $0x228] sm:$0xf0]  ;;  %v3105_v8 = vld [vmem:[#allocation8 + $0x3d8] sm:$0xf0]  ;;  %v3355_v9 = vld [vmem:[#allocation8 + $0x334] sm:$0xf] }
  0xf9   :  { %v1082_v24 = vmax.f32 %v997_v18, 0.0  ;;  %v2892_v14 = vor.u32 %v3321_v10, %v2889_v11  ;;  %v2881_v18 = vld [vmem:[#allocation8 + $0x218] sm:$0xf0] }
  0xfa   :  { %2004 = vmatpush.bf16.msra.mxu2 %v2756_v17  ;;  %v1009_v32 = vpop.f32.mrf.mxu2  ;;  %v3319_v17 = vld [vmem:[#allocation8 + $0x214] sm:$0xf]  ;;  %v3025_v10 = vld [vmem:[#allocation8 + $0x338] sm:$0xf0] }
  0xfb   :  { %v3611_v31 = vpack.c.bf16 %v1082_v24, %v1082_v24  ;;  %v1010_v36 = vadd.f32 %v1009_v32, %v219_v22  ;;  %v3337_v24 = vld [vmem:[#allocation8 + $0x2a4] sm:$0xf]  ;;  %v221_v32 = vperm.slane %v3591_v37, 7 }
  0xfc   :  { %v1022_v38 = vpop.f32.mrf.mxu3  ;;  %v985_v40 = vpop.f32.mrf.mxu0  ;;  %2016 = vmatpush.bf16.msra.mxu3 %v2828_v23  ;;  %v2884_v23 = vor.u32 %v3319_v17, %v2881_v18  ;;  %v2956_v33 = vor.u32 %v3337_v24, %v2953_v26  ;;  %v3333_v37 = vld [vmem:[#allocation8 + $0x284] sm:$0xf]  ;;  %v3020_v18 = vor.u32 %v3353_v15, %v3017_v16  ;;  %v3081_v26 = vld [vmem:[#allocation8 + $0x3a8] sm:$0xf0] }
  0xfd   :  { %1928 = vmatmul.bf16.vlgmr.msrb.gmra.mxu0 %v3611_v31  ;;  %v1023_v55 = vadd.f32 %v1022_v38, %v1010_v36  ;;  %v3335_v36 = vld [vmem:[#allocation8 + $0x294] sm:$0xf]  ;;  %v2945_v38 = vld [vmem:[#allocation8 + $0x298] sm:$0xf0]  ;;  %v3369_v24 = vld [vmem:[#allocation8 + $0x3a4] sm:$0xf] }
  0xfe   :  { %v998_v42 = vpop.f32.mrf.mxu1  ;;  %2005 = vmatpush.bf16.msra.mxu2 %v2748_v30  ;;  %2024 = vmatpush.bf16.msrb.mxu0 %v2932_v28  ;;  %v3057_v30 = vld [vmem:[#allocation8 + $0x378] sm:$0xf0]  ;;  %v2948_v45 = vor.u32 %v3335_v36, %v2945_v38  ;;  %v1222_v36 = vld [vmem:[%s3643_s4] sm:$0x3]  ;;  %s3528_s4 = smov [#allocation10]  }
  0xff   :  { %v1083_v49 = vmax.f32 %v1023_v55, 0.0  ;;  %v3060_v40 = vor.u32 %v3363_v29, %v3057_v30  ;;  %v3361_v55 = vld [vmem:[#allocation8 + $0x364] sm:$0xf]  ;;  %v3367_v29 = vld [vmem:[#allocation8 + $0x394] sm:$0xf]  ;;  %s2087_s15 = sshll.u32 %s3528_s4, 4  ;;  %s2088_s15 = int_to_ptr.vmem [resolvable:$true] %s2087_s15 }
 0x100   :  { %2017 = vmatpush.bf16.msra.mxu3 %v2820_v41  ;;  %v3073_v30 = vld [vmem:[#allocation8 + $0x398] sm:$0xf0] }
 0x101   :  { %v3614_v52 = vpack.c.bf16 %v1083_v49, %v1083_v49 }
 0x102   :  { %2025 = vmatpush.bf16.msrb.mxu0 %v2924_v43  ;;  %v1011_v58 = vpop.f32.mrf.mxu2  ;;  %v3049_v43 = vld [vmem:[#allocation8 + $0x368] sm:$0xf0] }
 0x103   :  { %1941 = vmatmul.bf16.vlgmr.msrb.gmra.mxu1 %v3614_v52  ;;  %v3052_v49 = vor.u32 %v3361_v55, %v3049_v43  ;;  %v2940_v58 = vor.u32 %v3333_v37, %v2937_v47 }
 0x104   :  { %v1024_v61 = vpop.f32.mrf.mxu3  ;;  %2018 = vmatpush.bf16.msra.mxu3 %v2812_v50  ;;  %2037 = vmatpush.bf16.msrb.mxu1 %v2996_v51  ;;  %v3379_v50 = vld [vmem:[#allocation8 + $0x3f4] sm:$0xf]  ;;  %v3121_v51 = vld [vmem:[#allocation8 + $0x3f8] sm:$0xf0] }
 0x105   :  { %v3124_v59 = vor.u32 %v3379_v50, %v3121_v51 }
 0x106   :  { %2026 = vmatpush.bf16.msrb.mxu0 %v2916_v53  ;;  %v3359_v53 = vld [vmem:[#allocation8 + $0x354] sm:$0xf] }
 0x107   :  { %v3044_v61 = vor.u32 %v3359_v53, %v3041_v54 }
 0x108   :  { %2038 = vmatpush.bf16.msrb.mxu1 %v2988_v62  ;;  %v3377_v62 = vld [vmem:[#allocation8 + $0x3e4] sm:$0xf] }
 0x10a   :  { %2027 = vmatpush.bf16.msrb.mxu0 %v2908_v63  ;;  %v3113_v63 = vld [vmem:[#allocation8 + $0x3e8] sm:$0xf0] }
 0x10c   :  { %2039 = vmatpush.bf16.msrb.mxu1 %v2980_v6  ;;  %v3116_v6 = vor.u32 %v3377_v62, %v3113_v63 }
 0x10d   :  { %1980 = vmatmul.bf16.vlgmr.msra.gmra.mxu0 %v3595_v25  ;;  %v2873_v25 = vld [vmem:[#allocation8 + $0x208] sm:$0xf0] }
 0x10e   :  { %2028 = vmatpush.bf16.msrb.mxu0 %v2900_v7  ;;  %v2876_v35 = vor.u32 %v3317_v27, %v2873_v25  ;;  %v3036_v7 = vor.u32 %v3357_v1, %v3033_v2  ;;  %v3349_v27 = vld [vmem:[#allocation8 + $0x304] sm:$0xf]  ;;  %v3001_v25 = vld [vmem:[#allocation8 + $0x308] sm:$0xf0] }
 0x110   :  { %2040 = vmatpush.bf16.msrb.mxu1 %v2972_v12  ;;  %v3028_v12 = vor.u32 %v3355_v9, %v3025_v10 }
 0x112   :  { %2029 = vmatpush.bf16.msrb.mxu0 %v2892_v14  ;;  %v3097_v14 = vld [vmem:[#allocation8 + $0x3c8] sm:$0xf0] }
 0x113   :  { %1993 = vmatmul.bf16.vlgmr.msra.gmra.mxu1 %v3598_v57 }
 0x114   :  { %v1035_v19 = vpop.f32.mrf.mxu0  ;;  %2041 = vmatpush.bf16.msrb.mxu1 %v2964_v20  ;;  %v3089_v20 = vld [vmem:[#allocation8 + $0x3b8] sm:$0xf0] }
 0x115   :  { %v1036_v21 = vadd.f32 %v1035_v19, %v220_v13  ;;  %v3373_v13 = vld [vmem:[#allocation8 + $0x3c4] sm:$0xf]  ;;  %v3371_v19 = vld [vmem:[#allocation8 + $0x3b4] sm:$0xf] }
 0x116   :  { %v1048_v22 = vpop.f32.mrf.mxu1  ;;  %2030 = vmatpush.bf16.msrb.mxu0 %v2884_v23  ;;  %v3100_v17 = vor.u32 %v3373_v13, %v3097_v14 }
 0x117   :  { %v1049_v28 = vadd.f32 %v1048_v22, %v1036_v21  ;;  %v3351_v21 = vld [vmem:[#allocation8 + $0x314] sm:$0xf]  ;;  %v3092_v22 = vor.u32 %v3371_v19, %v3089_v20 }
 0x118   :  { %2042 = vmatpush.bf16.msrb.mxu1 %v2956_v33  ;;  %v3365_v33 = vld [vmem:[#allocation8 + $0x384] sm:$0xf] }
 0x119   :  { %v1084_v34 = vmax.f32 %v1049_v28, 0.0  ;;  %v3084_v28 = vor.u32 %v3369_v24, %v3081_v26 }
 0x11a   :  { %v1061_v42 = vpop.f32.mrf.mxu2  ;;  %2031 = vmatpush.bf16.msrb.mxu0 %v2876_v35 }
 0x11b   :  { %v3621_v41 = vpack.c.bf16 %v1084_v34, %v1084_v34  ;;  %v1062_v44 = vadd.f32 %v1061_v42, %v221_v32  ;;  %v3076_v32 = vor.u32 %v3367_v29, %v3073_v30  ;;  %v3065_v34 = vld [vmem:[#allocation8 + $0x388] sm:$0xf0] }
 0x11c   :  { %v1074_v3 = vpop.f32.mrf.mxu3  ;;  %v1037_v57 = vpop.f32.mrf.mxu0  ;;  %2043 = vmatpush.bf16.msrb.mxu1 %v2948_v45  ;;  %v3068_v35 = vor.u32 %v3365_v33, %v3065_v34 }
 0x11d   :  { %1954 = vmatmul.bf16.vlgmr.msrb.gmra.mxu2 %v3621_v41  ;;  %v1075_v48 = vadd.f32 %v1074_v3, %v1062_v44  ;;  %2032 = vmatmul.bf16.vlgmr.msrb.gmra.mxu0 %v3611_v31  ;;  %v3375_v31 = vld [vmem:[#allocation8 + $0x3d4] sm:$0xf] }
 0x11e   :  { %v1050_v46 = vpop.f32.mrf.mxu1  ;;  %2050 = vmatpush.bf16.msrb.mxu2 %v3060_v40  ;;  %v3108_v11 = vor.u32 %v3375_v31, %v3105_v8 }
 0x11f   :  { %v1085_v56 = vmax.f32 %v1075_v48, 0.0 }
 0x120   :  { %2044 = vmatpush.bf16.msrb.mxu1 %v2940_v58 }
 0x121   :  { %v3625_v60 = vpack.c.bf16 %v1085_v56, %v1085_v56 }
 0x122   :  { %2051 = vmatpush.bf16.msrb.mxu2 %v3052_v49  ;;  %v1063_v0 = vpop.f32.mrf.mxu2 }
 0x123   :  { %1967 = vmatmul.bf16.vlgmr.msrb.gmra.mxu3 %v3625_v60  ;;  %2045 = vmatmul.bf16.vlgmr.msrb.gmra.mxu1 %v3614_v52  ;;  %v3009_v52 = vld [vmem:[#allocation8 + $0x318] sm:$0xf0] }
 0x124   :  { %v1076_v4 = vpop.f32.mrf.mxu3  ;;  %2063 = vmatpush.bf16.msrb.mxu3 %v3124_v59  ;;  %v3012_v23 = vor.u32 %v3351_v21, %v3009_v52 }
 0x126   :  { %2052 = vmatpush.bf16.msrb.mxu2 %v3044_v61 }
 0x128   :  { %2064 = vmatpush.bf16.msrb.mxu3 %v3116_v6 }
 0x12a   :  { %2053 = vmatpush.bf16.msrb.mxu2 %v3036_v7  ;;  %v3390_v7 = vld [vmem:[#allocation2] sm:$0xff] }
 0x12c   :  { %2065 = vmatpush.bf16.msrb.mxu3 %v3108_v11  ;;  %v1225_v11 = vperm.slane %v1222_v36, 1 }
 0x12d   :  { %2006 = vmatmul.bf16.vlgmr.msra.gmra.mxu2 %v3603_v5  ;;  %v3004_v5 = vor.u32 %v3349_v27, %v3001_v25  ;;  %v3391_v27 = vld [vmem:[#allocation2 + $0x8] sm:$0xff] }
 0x12e   :  { %2054 = vmatpush.bf16.msrb.mxu2 %v3028_v12 }
 0x130   :  { %2066 = vmatpush.bf16.msrb.mxu3 %v3100_v17 }
 0x132   :  { %2055 = vmatpush.bf16.msrb.mxu2 %v3020_v18 }
 0x133   :  { %2019 = vmatmul.bf16.vlgmr.msra.gmra.mxu3 %v3606_v39  ;;  %v1224_v39 = vperm.slane %v1222_v36, 0 }
 0x134   :  { %2067 = vmatpush.bf16.msrb.mxu3 %v3092_v22 }
 0x136   :  { %2056 = vmatpush.bf16.msrb.mxu2 %v3012_v23 }
 0x138   :  { %2068 = vmatpush.bf16.msrb.mxu3 %v3084_v28 }
 0x13a   :  { %2057 = vmatpush.bf16.msrb.mxu2 %v3004_v5  ;;  %v1877_v38 = vpop.f32.mrf.mxu0 }
 0x13b   :  { %v1878_v40 = vadd.f32 %v1877_v38, %v1224_v39 }
 0x13c   :  { %2069 = vmatpush.bf16.msrb.mxu3 %v3076_v32 }
 0x13d   :  { %2058 = vmatmul.bf16.vlgmr.msrb.gmra.mxu2 %v3621_v41 }
 0x140   :  { %2070 = vmatpush.bf16.msrb.mxu3 %v3068_v35  ;;  %v1890_v42 = vpop.f32.mrf.mxu1 }
 0x141   :  { %v1891_v55 = vadd.f32 %v1890_v42, %v1878_v40 }
 0x142   :  { %v1879_v43 = vpop.f32.mrf.mxu0 }
 0x143   :  { %2071 = vmatmul.bf16.vlgmr.msrb.gmra.mxu3 %v3625_v60 }
 0x148   :  { %v1892_v44 = vpop.f32.mrf.mxu1 }
 0x160   :  { %v1903_v3 = vpop.f32.mrf.mxu2 }
 0x161   :  { %v1904_v56 = vadd.f32 %v1903_v3, %v1891_v55 }
 0x168   :  { %v1905_v45 = vpop.f32.mrf.mxu2 }
 0x16a   :  { %v1916_v57 = vpop.f32.mrf.mxu3 }
 0x16b   :  { %v1917_v58 = vadd.f32 %v1916_v57, %v1904_v56 }
 0x172   :  { %v1918_v46 = vpop.f32.mrf.mxu3 }
 0x17a   :  { %v1929_v41 = vpop.f32.mrf.mxu0 }
 0x17b   :  { %v1930_v60 = vadd.f32 %v1929_v41, %v1917_v58 }
 0x180   :  { %v1942_v37 = vpop.f32.mrf.mxu1 }
 0x181   :  { %v1943_v61 = vadd.f32 %v1942_v37, %v1930_v60 }
 0x182   :  { %v1931_v47 = vpop.f32.mrf.mxu0 }
 0x188   :  { %v1944_v48 = vpop.f32.mrf.mxu1 }
 0x18a   :  { %v1981_v49 = vpop.f32.mrf.mxu0 }
 0x18b   :  { %v1982_v12 = vadd.f32 %v1981_v49, %v1225_v11 }
 0x190   :  { %v1994_v50 = vpop.f32.mrf.mxu1 }
 0x191   :  { %v1995_v14 = vadd.f32 %v1994_v50, %v1982_v12 }
 0x192   :  { %v1983_v51 = vpop.f32.mrf.mxu0 }
 0x198   :  { %v1996_v53 = vpop.f32.mrf.mxu1 }
 0x19a   :  { %v2033_v54 = vpop.f32.mrf.mxu0 }
 0x1a0   :  { %v1955_v59 = vpop.f32.mrf.mxu2  ;;  %v2046_v62 = vpop.f32.mrf.mxu1 }
 0x1a1   :  { %v1956_v0 = vadd.f32 %v1955_v59, %v1943_v61 }
 0x1a2   :  { %v2035_v63 = vpop.f32.mrf.mxu0 }
 0x1a6   :  { %v1968_v1 = vpop.f32.mrf.mxu3 }
 0x1a7   :  { %v1969_v2 = vadd.f32 %v1968_v1, %v1956_v0 }
 0x1a8   :  { %v1957_v4 = vpop.f32.mrf.mxu2  ;;  %v2048_v8 = vpop.f32.mrf.mxu1 }
 0x1a9   :  { %v2076_v6 = vmax.f32 %v1969_v2, 0.0 }
 0x1ab   :  { %v2078_v31 = vadd.f32 %v3390_v7, %v2076_v6 }
 0x1ad   :  { %2080 = vst [vmem:[#allocation10] sm:$0xff] %v2078_v31 }
 0x1ae   :  { %v1970_v9 = vpop.f32.mrf.mxu3 }
 0x1b0   :  { %v2007_v10 = vpop.f32.mrf.mxu2 }
 0x1b1   :  { %v2008_v16 = vadd.f32 %v2007_v10, %v1995_v14 }
 0x1b6   :  { %v2020_v13 = vpop.f32.mrf.mxu3 }
 0x1b7   :  { %v2021_v17 = vadd.f32 %v2020_v13, %v2008_v16 }
 0x1b8   :  { %v2009_v15 = vpop.f32.mrf.mxu2 }
 0x1b9   :  { %v2034_v19 = vadd.f32 %v2033_v54, %v2021_v17 }
 0x1bb   :  { %v2047_v21 = vadd.f32 %v2046_v62, %v2034_v19 }
 0x1be   :  { %v2022_v18 = vpop.f32.mrf.mxu3 }
 0x1c0   :  { %v2059_v20 = vpop.f32.mrf.mxu2 }
 0x1c1   :  { %v2060_v52 = vadd.f32 %v2059_v20, %v2047_v21 }
 0x1c6   :  { %v2072_v22 = vpop.f32.mrf.mxu3 }
 0x1c7   :  { %v2073_v23 = vadd.f32 %v2072_v22, %v2060_v52 }
 0x1c8   :  { %v2061_v24 = vpop.f32.mrf.mxu2 }
 0x1c9   :  { %v2077_v26 = vmax.f32 %v2073_v23, 0.0 }
 0x1cb   :  { %v2079_v25 = vadd.f32 %v3391_v27, %v2077_v26 }
 0x1cd   :  { %2081 = vst [vmem:[#allocation10 + $0x8] sm:$0xff] %v2079_v25 }
 0x1ce   :  { %v2074_v28 = vpop.f32.mrf.mxu3  ;;  %2092 = dma.vmem_to_hbm [thread:$0]  %s2088_s15, 256, %s2090_s18, [#allocation4]  }
 0x1cf   :  { %3518 = dma.done.wait [#allocation4], 256  }
 0x1d0   :  { %3519 = vsyncadd [#allocation4], 4294967040 }
 0x1d1   :  { %2097 = vsyncpa [#allocation3], 1 }
 0x1d2   :  { %2098 = vsyncpa [#allocation6], 1 }
 0x1d3   :  { %2099 = vsyncpa [#allocation9], 1 }
 0x1d4   :  { %2100 = vsyncpa [#allocation4], 1 }

</bundles_post_ra>
